<compile_context>
chip_gen: v7x
topology: tpu7x:2x2x1
jax: 0.10.0
libtpu: 0.0.40
codegen_flags: <defaults>
</compile_context>

<pallas_src>
import numpy as np
import jax
import jax.numpy as jnp
from jax.experimental import pallas as pl
from jax.experimental.pallas import tpu as pltpu

# ----------------------------------------------------------------------------
# Model hyper-parameters (small, consistent with the module's constructor)
# ----------------------------------------------------------------------------
SEQ_LEN = 8          # seq_len
EMBED_DIM = 32       # embedding_dim
CELL_SIZE = 64       # cell_size (LSTM hidden)
N_LAYER = 2          # n_layer
BATCH = 2            # batch size for the example forward

LANE = 128           # TPU lane width
SUBLANE = 8          # TPU sublane width


def _round_up(x, m):
    return ((x + m - 1) // m) * m


# ----------------------------------------------------------------------------
# Pallas kernel: 2-layer LSTM over time + deferred fully-connected projection
# ----------------------------------------------------------------------------
def lstm_fc_kernel(x_ref,       # [T*Bp, E]    time-major embedded inputs (row = t*Bp + b)
                   wih0_ref,    # [E, 4*Hp]    layer-0 input weights (gate-padded)
                   b0_ref,      # [1, 4*Hp]    layer-0 bias (b_ih + b_hh)
                   whh0_ref,    # [Hp, 4*Hp]   layer-0 recurrent weights
                   wih1_ref,    # [Hp, 4*Hp]   layer-1 input weights
                   whh1_ref,    # [Hp, 4*Hp]   layer-1 recurrent weights
                   b1_ref,      # [1, 4*Hp]    layer-1 bias
                   wfc_ref,     # [Hp, Vp]     fc weights
                   bfc_ref,     # [1, Vp]      fc bias
                   hinit_ref,   # [2, Bp, Hp]  initial hidden state
                   cinit_ref,   # [2, Bp, Hp]  initial cell state
                   out_ref,     # [T*Bp, Vp]   logits, time-major (row = t*Bp + b)
                   hn_ref,      # [2, Bp, Hp]
                   cn_ref,      # [2, Bp, Hp]
                   xg_ref,      # VMEM scratch [T*Bp, 4*Hp] staged input-side gates
                   hstk_ref):   # VMEM scratch [T*Bp, Hp]   time-major top-layer h
    Hp = whh0_ref.shape[0]
    TB = x_ref.shape[0]
    Bp = hinit_ref.shape[1]
    T = TB // Bp

    # ---- input-side gate contribution for ALL timesteps, staged in VMEM ----
    # (layer-0 bias folded in here, off the serial critical path)
    xg_ref[...] = (jnp.dot(x_ref[...], wih0_ref[...],
                           preferred_element_type=jnp.float32)
                   + b0_ref[...])

    # ---- register-resident recurrent state ----
    h_l0 = hinit_ref[0]
    c_l0 = cinit_ref[0]
    h_l1 = hinit_ref[1]
    c_l1 = cinit_ref[1]

    def sig(v):
        # sigmoid(x) == 0.5 * (1 + tanh(0.5 * x)) -> single EUP op per gate.
        return 0.5 * (jnp.tanh(0.5 * v) + 1.0)

    def gate_split(gates):
        # PyTorch gate order i, f, g, o — each block is lane-aligned (width Hp = 128).
        i = sig(gates[:, 0:Hp])
        f = sig(gates[:, Hp:2 * Hp])
        g = jnp.tanh(gates[:, 2 * Hp:3 * Hp])
        o = sig(gates[:, 3 * Hp:4 * Hp])
        return i, f, g, o

    # T is small and static -> unroll (the recurrence is inherently sequential).
    for t in range(T):
        # ---- layer-1 recurrent matmul depends only on step t-1 state:
        #      issue it first so it overlaps layer-0 MXU/EUP/VPU work. ----
        g1_rec = jnp.dot(h_l1, whh1_ref[...], preferred_element_type=jnp.float32)

        # ---- layer 0: only h_prev @ W_hh0 remains on the per-step critical path ----
        g0 = xg_ref[pl.ds(t * Bp, Bp), :] + jnp.dot(
            h_l0, whh0_ref[...], preferred_element_type=jnp.float32)
        i0, f0, gg0, o0 = gate_split(g0)
        c_l0 = f0 * c_l0 + i0 * gg0
        h_l0 = o0 * jnp.tanh(c_l0)

        # ---- layer 1: add the input-side matmul + bias ----
        g1 = (g1_rec
              + jnp.dot(h_l0, wih1_ref[...], preferred_element_type=jnp.float32)
              + b1_ref[...])
        i1, f1, gg1, o1 = gate_split(g1)
        c_l1 = f1 * c_l1 + i1 * gg1
        h_l1 = o1 * jnp.tanh(c_l1)

        # ---- time-major, lane-dense store of this step's top-layer hidden state ----
        hstk_ref[pl.ds(t * Bp, Bp), :] = h_l1

    # ---- deferred FC projection: one matmul, one lane-dense store (time-major) ----
    out_ref[...] = (jnp.dot(hstk_ref[...], wfc_ref[...],
                            preferred_element_type=jnp.float32)
                    + bfc_ref[...]).astype(out_ref.dtype)

    # ---- final state written once ----
    hn_ref[0] = h_l0
    hn_ref[1] = h_l1
    cn_ref[0] = c_l0
    cn_ref[1] = c_l1


# ----------------------------------------------------------------------------
# Parameter padding: H -> Hp (128) per gate block, V -> Vp (128)
# Zero padding keeps padded h/c lanes exactly zero through the recurrence.
# ----------------------------------------------------------------------------
def _pad_gate_cols(w, H, Hp):
    # w: [..., 4H] -> [..., 4Hp], gate block g placed at columns [g*Hp, g*Hp + H)
    out = jnp.zeros(w.shape[:-1] + (4 * Hp,), jnp.float32)
    for g in range(4):
        out = out.at[..., g * Hp:g * Hp + H].set(w[..., g * H:(g + 1) * H])
    return out


def _prepare_padded_params(params, H, Hp, V, Vp):
    wih0 = _pad_gate_cols(params["wih0"], H, Hp)                         # [E, 4Hp]
    whh0 = jnp.zeros((Hp, 4 * Hp), jnp.float32).at[:H].set(
        _pad_gate_cols(params["whh0"], H, Hp))                           # [Hp, 4Hp]
    b0 = _pad_gate_cols(params["b0"], H, Hp)                             # [1, 4Hp]
    wih1 = jnp.zeros((Hp, 4 * Hp), jnp.float32).at[:H].set(
        _pad_gate_cols(params["wih1"], H, Hp))                           # [Hp, 4Hp]
    whh1 = jnp.zeros((Hp, 4 * Hp), jnp.float32).at[:H].set(
        _pad_gate_cols(params["whh1"], H, Hp))                           # [Hp, 4Hp]
    b1 = _pad_gate_cols(params["b1"], H, Hp)                             # [1, 4Hp]
    wfc = jnp.zeros((Hp, Vp), jnp.float32).at[:H, :V].set(params["wfc"])
    bfc = jnp.zeros((1, Vp), jnp.float32).at[:, :V].set(params["bfc"])
    return dict(wih0=wih0, b0=b0, whh0=whh0, wih1=wih1, whh1=whh1,
                b1=b1, wfc=wfc, bfc=bfc)


# ----------------------------------------------------------------------------
# Wrapper: embedding lookup (glue) + padding + pallas_call (no grid, VMEM specs)
# ----------------------------------------------------------------------------
def forward_pallas(tokens, params, init_state=None):
    emb = params["embedding"]                     # [V, E]
    B, T = tokens.shape
    E = emb.shape[1]
    H = params["whh0"].shape[0]
    V = params["wfc"].shape[1]

    Hp = _round_up(H, LANE)                       # lane-aligned gate blocks
    Vp = _round_up(V, LANE)                       # lane-dense output store
    Bp = _round_up(B, SUBLANE)                    # sublane-aligned batch

    pw = _prepare_padded_params(params, H, Hp, V, Vp)

    # Embedding lookup (gather) in plain JAX, then time-major + batch padding.
    x = jnp.take(emb, tokens, axis=0)              # [B, T, E]
    x = jnp.transpose(x, (1, 0, 2))                # [T, B, E]
    x = jnp.pad(x, ((0, 0), (0, Bp - B), (0, 0)))  # [T, Bp, E]
    x = x.reshape(T * Bp, E)                       # row = t*Bp + b

    if init_state is None:
        hinit = jnp.zeros((N_LAYER, Bp, Hp), jnp.float32)
        cinit = jnp.zeros((N_LAYER, Bp, Hp), jnp.float32)
    else:
        h0, c0 = init_state                        # [n_layer, B, H] each
        hinit = jnp.zeros((N_LAYER, Bp, Hp), jnp.float32).at[:, :B, :H].set(h0)
        cinit = jnp.zeros((N_LAYER, Bp, Hp), jnp.float32).at[:, :B, :H].set(c0)

    args = (x, pw["wih0"], pw["b0"], pw["whh0"], pw["wih1"], pw["whh1"],
            pw["b1"], pw["wfc"], pw["bfc"], hinit, cinit)

    out_shapes = (jax.ShapeDtypeStruct((T * Bp, Vp), jnp.float32),   # time-major logits
                  jax.ShapeDtypeStruct((N_LAYER, Bp, Hp), jnp.float32),
                  jax.ShapeDtypeStruct((N_LAYER, Bp, Hp), jnp.float32))

    # Single invocation, no grid: whole arrays pinned in VMEM, no pipeline
    # prolog/epilog or double-buffered operand copies.
    vmem = lambda: pl.BlockSpec(memory_space=pltpu.MemorySpace.VMEM)

    out_p, hn_p, cn_p = pl.pallas_call(
        lstm_fc_kernel,
        in_specs=[vmem() for _ in args],
        out_specs=tuple(vmem() for _ in out_shapes),
        out_shape=out_shapes,
        scratch_shapes=[
            pltpu.VMEM((T * Bp, 4 * Hp), jnp.float32),   # staged x @ W_ih0 + b0
            pltpu.VMEM((T * Bp, Hp), jnp.float32),       # time-major top-layer h
        ],
    )(*args)

    # Kernel output is time-major [t*Bp + b, :]; reorder to batch-major
    # (rnn_out.contiguous().view(-1, H) semantics) and slice off padding.
    logits = (out_p.reshape(T, Bp, Vp)[:, :B, :V]
              .transpose(1, 0, 2).reshape(B * T, V))
    hn = hn_p[:, :B, :H]
    cn = cn_p[:, :B, :H]
    return logits, (hn, cn)


# ----------------------------------------------------------------------------
# Pure-JAX reference (mirrors the PyTorch forward) for a correctness check
# ----------------------------------------------------------------------------
def forward_reference(tokens, params):
    emb = params["embedding"]
    x = jnp.take(emb, tokens, axis=0)             # [B, T, E]
    B, T, _ = x.shape
    H = params["whh0"].shape[0]

    def cell(x_t, h, c, wih, whh, b):
        gates = x_t @ wih + h @ whh + b
        i, f, g, o = jnp.split(gates, 4, axis=-1)
        c_new = jax.nn.sigmoid(f) * c + jax.nn.sigmoid(i) * jnp.tanh(g)
        h_new = jax.nn.sigmoid(o) * jnp.tanh(c_new)
        return h_new, c_new

    h = [jnp.zeros((B, H), jnp.float32) for _ in range(N_LAYER)]
    c = [jnp.zeros((B, H), jnp.float32) for _ in range(N_LAYER)]
    outs = []
    for t in range(T):
        x_t = x[:, t, :]
        h[0], c[0] = cell(x_t, h[0], c[0], params["wih0"], params["whh0"], params["b0"])
        h[1], c[1] = cell(h[0], h[1], c[1], params["wih1"], params["whh1"], params["b1"])
        outs.append(h[1] @ params["wfc"] + params["bfc"])
    logits = jnp.stack(outs, axis=1).reshape(B * T, -1)
    return logits, (jnp.stack(h), jnp.stack(c))


# ----------------------------------------------------------------------------
# Deterministic parameter construction (shapes from RNNTextGen.build_model)
# ----------------------------------------------------------------------------
def init_params(key, vocab_size):
    H, E, V = CELL_SIZE, EMBED_DIM, vocab_size
    k = 1.0 / np.sqrt(H)
    ks = jax.random.split(key, 10)
    u = lambda kk, shape, bound: jax.random.uniform(kk, shape, jnp.float32, -bound, bound)
    params = {
        "embedding": jax.random.normal(ks[0], (V, E), jnp.float32),
        # LSTM layer 0 (weights stored pre-transposed: x @ W_ih^T  ->  x @ wih0)
        "wih0": u(ks[1], (E, 4 * H), k),
        "whh0": u(ks[2], (H, 4 * H), k),
        "b0":   u(ks[3], (1, 4 * H), k) + u(ks[4], (1, 4 * H), k),   # b_ih + b_hh
        # LSTM layer 1
        "wih1": u(ks[5], (H, 4 * H), k),
        "whh1": u(ks[6], (H, 4 * H), k),
        "b1":   u(ks[7], (1, 4 * H), k) + u(ks[8], (1, 4 * H), k),
        # fc (Linear(cell_size, vocab_size)), pre-transposed: h @ wfc + bfc
        "wfc": u(ks[9], (H, V), 1.0 / np.sqrt(H)),
        "bfc": jnp.zeros((1, V), jnp.float32),
    }
    return params


if __name__ == "__main__":
    # Build the "text" the way preprocessing() would (deterministic vocab).
    text = "the quick brown fox jumps over the lazy dog and the pallas tpu kernel"
    chars = sorted(set(text))
    char2idx = {c: i for i, c in enumerate(chars)}
    vocab_size = len(chars)
    indexed = np.array([char2idx[c] for c in text], dtype=np.int32)

    # Example batch of token ids, shape [BATCH, SEQ_LEN] (as next_batch would yield).
    tokens = jnp.asarray(indexed[:BATCH * SEQ_LEN].reshape(BATCH, SEQ_LEN), dtype=jnp.int32)

    params = init_params(jax.random.PRNGKey(0), vocab_size)

    fwd = jax.jit(forward_pallas)
    logits, (h_n, c_n) = fwd(tokens, params)
    jax.block_until_ready((logits, h_n, c_n))

    # Sanity checks against a pure-JAX reference of the PyTorch forward.
    ref_logits, (ref_h, ref_c) = forward_reference(tokens, params)
    assert logits.shape == (BATCH * SEQ_LEN, vocab_size)
    assert h_n.shape == (N_LAYER, BATCH, CELL_SIZE)
    assert c_n.shape == (N_LAYER, BATCH, CELL_SIZE)
    np.testing.assert_allclose(np.asarray(logits), np.asarray(ref_logits), rtol=1e-4, atol=1e-4)
    np.testing.assert_allclose(np.asarray(h_n), np.asarray(ref_h), rtol=1e-4, atol=1e-4)
    np.testing.assert_allclose(np.asarray(c_n), np.asarray(ref_c), rtol=1e-4, atol=1e-4)

    print("KERNEL_OK")
</pallas_src>

<mosaic_0001>
module attributes {stable_mosaic.version = 11 : i64} {
  func.func @lstm_fc_kernel(%arg0: memref<64x32xf32, #tpu.memory_space<vmem>>, %arg1: memref<32x512xf32, #tpu.memory_space<vmem>>, %arg2: memref<1x512xf32, #tpu.memory_space<vmem>>, %arg3: memref<128x512xf32, #tpu.memory_space<vmem>>, %arg4: memref<128x512xf32, #tpu.memory_space<vmem>>, %arg5: memref<128x512xf32, #tpu.memory_space<vmem>>, %arg6: memref<1x512xf32, #tpu.memory_space<vmem>>, %arg7: memref<128x128xf32, #tpu.memory_space<vmem>>, %arg8: memref<1x128xf32, #tpu.memory_space<vmem>>, %arg9: memref<2x8x128xf32, #tpu.memory_space<vmem>>, %arg10: memref<2x8x128xf32, #tpu.memory_space<vmem>>, %arg11: memref<64x128xf32, #tpu.memory_space<vmem>>, %arg12: memref<2x8x128xf32, #tpu.memory_space<vmem>>, %arg13: memref<2x8x128xf32, #tpu.memory_space<vmem>>, %arg14: memref<64x512xf32, #tpu.memory_space<vmem>>, %arg15: memref<64x128xf32, #tpu.memory_space<vmem>>) attributes {dimension_semantics = [], scalar_prefetch = 0 : i64, scratch_operands = 2 : i64, tpu.core_type = #tpu.core_type<tc>} {
    %c0 = arith.constant 0 : index
    %c0_0 = arith.constant 0 : index
    %0 = vector.load %arg0[%c0, %c0_0] : memref<64x32xf32, #tpu.memory_space<vmem>>, vector<64x32xf32>
    %c0_1 = arith.constant 0 : index
    %c0_2 = arith.constant 0 : index
    %1 = vector.load %arg1[%c0_1, %c0_2] : memref<32x512xf32, #tpu.memory_space<vmem>>, vector<32x512xf32>
    %cst = arith.constant dense<0.000000e+00> : vector<64x512xf32>
    %2 = tpu.matmul %0, %1, %cst {dimension_numbers = #tpu.dot_dimension_numbers<[1], [0], [0], [1], [0, 0, 1, 1], [], []>} : vector<64x32xf32>, vector<32x512xf32>, vector<64x512xf32> -> vector<64x512xf32>
    %c0_3 = arith.constant 0 : index
    %c0_4 = arith.constant 0 : index
    %3 = vector.load %arg2[%c0_3, %c0_4] : memref<1x512xf32, #tpu.memory_space<vmem>>, vector<1x512xf32>
    %4 = vector.broadcast %3 : vector<1x512xf32> to vector<64x512xf32>
    %5 = arith.addf %2, %4 : vector<64x512xf32>
    %c0_5 = arith.constant 0 : index
    %c0_6 = arith.constant 0 : index
    %6 = vector.load %arg14[%c0_5, %c0_6] : memref<64x512xf32, #tpu.memory_space<vmem>>, vector<64x512xf32>
    tpu.vector_store %arg14[%c0_5, %c0_6], %5 {strides = array<i32>} : memref<64x512xf32, #tpu.memory_space<vmem>>, vector<64x512xf32>,
    %c0_7 = arith.constant 0 : index
    %c0_8 = arith.constant 0 : index
    %c0_9 = arith.constant 0 : index
    %7 = vector.load %arg9[%c0_7, %c0_8, %c0_9] : memref<2x8x128xf32, #tpu.memory_space<vmem>>, vector<1x8x128xf32>
    %8 = vector.shape_cast %7 : vector<1x8x128xf32> to vector<8x128xf32>
    %c0_10 = arith.constant 0 : index
    %c0_11 = arith.constant 0 : index
    %c0_12 = arith.constant 0 : index
    %9 = vector.load %arg10[%c0_10, %c0_11, %c0_12] : memref<2x8x128xf32, #tpu.memory_space<vmem>>, vector<1x8x128xf32>
    %10 = vector.shape_cast %9 : vector<1x8x128xf32> to vector<8x128xf32>
    %c1 = arith.constant 1 : index
    %c0_13 = arith.constant 0 : index
    %c0_14 = arith.constant 0 : index
    %11 = vector.load %arg9[%c1, %c0_13, %c0_14] : memref<2x8x128xf32, #tpu.memory_space<vmem>>, vector<1x8x128xf32>
    %12 = vector.shape_cast %11 : vector<1x8x128xf32> to vector<8x128xf32>
    %c1_15 = arith.constant 1 : index
    %c0_16 = arith.constant 0 : index
    %c0_17 = arith.constant 0 : index
    %13 = vector.load %arg10[%c1_15, %c0_16, %c0_17] : memref<2x8x128xf32, #tpu.memory_space<vmem>>, vector<1x8x128xf32>
    %14 = vector.shape_cast %13 : vector<1x8x128xf32> to vector<8x128xf32>
    %c0_18 = arith.constant 0 : index
    %c0_19 = arith.constant 0 : index
    %15 = vector.load %arg5[%c0_18, %c0_19] : memref<128x512xf32, #tpu.memory_space<vmem>>, vector<128x512xf32>
    %cst_20 = arith.constant dense<0.000000e+00> : vector<8x512xf32>
    %16 = tpu.matmul %12, %15, %cst_20 {dimension_numbers = #tpu.dot_dimension_numbers<[1], [0], [0], [1], [0, 0, 1, 1], [], []>} : vector<8x128xf32>, vector<128x512xf32>, vector<8x512xf32> -> vector<8x512xf32>
    %c0_21 = arith.constant 0 : index
    %c0_22 = arith.constant 0 : index
    %17 = vector.load %arg14[%c0_21, %c0_22] : memref<64x512xf32, #tpu.memory_space<vmem>>, vector<8x512xf32>
    %c0_23 = arith.constant 0 : index
    %c0_24 = arith.constant 0 : index
    %18 = vector.load %arg3[%c0_23, %c0_24] : memref<128x512xf32, #tpu.memory_space<vmem>>, vector<128x512xf32>
    %cst_25 = arith.constant dense<0.000000e+00> : vector<8x512xf32>
    %19 = tpu.matmul %8, %18, %cst_25 {dimension_numbers = #tpu.dot_dimension_numbers<[1], [0], [0], [1], [0, 0, 1, 1], [], []>} : vector<8x128xf32>, vector<128x512xf32>, vector<8x512xf32> -> vector<8x512xf32>
    %20 = arith.addf %17, %19 : vector<8x512xf32>
    %21 = vector.extract_strided_slice %20 {offsets = [0, 0], sizes = [8, 128], strides = [1, 1]} : vector<8x512xf32> to vector<8x128xf32>
    %cst_26 = arith.constant 5.000000e-01 : f32
    %22 = vector.broadcast %cst_26 : f32 to vector<8x128xf32>
    %23 = arith.mulf %22, %21 : vector<8x128xf32>
    %24 = math.tanh %23 : vector<8x128xf32>
    %cst_27 = arith.constant 1.000000e+00 : f32
    %25 = vector.broadcast %cst_27 : f32 to vector<8x128xf32>
    %26 = arith.addf %24, %25 : vector<8x128xf32>
    %cst_28 = arith.constant 5.000000e-01 : f32
    %27 = vector.broadcast %cst_28 : f32 to vector<8x128xf32>
    %28 = arith.mulf %27, %26 : vector<8x128xf32>
    %29 = vector.extract_strided_slice %20 {offsets = [0, 128], sizes = [8, 128], strides = [1, 1]} : vector<8x512xf32> to vector<8x128xf32>
    %cst_29 = arith.constant 5.000000e-01 : f32
    %30 = vector.broadcast %cst_29 : f32 to vector<8x128xf32>
    %31 = arith.mulf %30, %29 : vector<8x128xf32>
    %32 = math.tanh %31 : vector<8x128xf32>
    %cst_30 = arith.constant 1.000000e+00 : f32
    %33 = vector.broadcast %cst_30 : f32 to vector<8x128xf32>
    %34 = arith.addf %32, %33 : vector<8x128xf32>
    %cst_31 = arith.constant 5.000000e-01 : f32
    %35 = vector.broadcast %cst_31 : f32 to vector<8x128xf32>
    %36 = arith.mulf %35, %34 : vector<8x128xf32>
    %37 = vector.extract_strided_slice %20 {offsets = [0, 256], sizes = [8, 128], strides = [1, 1]} : vector<8x512xf32> to vector<8x128xf32>
    %38 = math.tanh %37 : vector<8x128xf32>
    %39 = vector.extract_strided_slice %20 {offsets = [0, 384], sizes = [8, 128], strides = [1, 1]} : vector<8x512xf32> to vector<8x128xf32>
    %cst_32 = arith.constant 5.000000e-01 : f32
    %40 = vector.broadcast %cst_32 : f32 to vector<8x128xf32>
    %41 = arith.mulf %40, %39 : vector<8x128xf32>
    %42 = math.tanh %41 : vector<8x128xf32>
    %cst_33 = arith.constant 1.000000e+00 : f32
    %43 = vector.broadcast %cst_33 : f32 to vector<8x128xf32>
    %44 = arith.addf %42, %43 : vector<8x128xf32>
    %cst_34 = arith.constant 5.000000e-01 : f32
    %45 = vector.broadcast %cst_34 : f32 to vector<8x128xf32>
    %46 = arith.mulf %45, %44 : vector<8x128xf32>
    %47 = arith.mulf %36, %10 : vector<8x128xf32>
    %48 = arith.mulf %28, %38 : vector<8x128xf32>
    %49 = arith.addf %47, %48 : vector<8x128xf32>
    %50 = math.tanh %49 : vector<8x128xf32>
    %51 = arith.mulf %46, %50 : vector<8x128xf32>
    %c0_35 = arith.constant 0 : index
    %c0_36 = arith.constant 0 : index
    %52 = vector.load %arg4[%c0_35, %c0_36] : memref<128x512xf32, #tpu.memory_space<vmem>>, vector<128x512xf32>
    %cst_37 = arith.constant dense<0.000000e+00> : vector<8x512xf32>
    %53 = tpu.matmul %51, %52, %cst_37 {dimension_numbers = #tpu.dot_dimension_numbers<[1], [0], [0], [1], [0, 0, 1, 1], [], []>} : vector<8x128xf32>, vector<128x512xf32>, vector<8x512xf32> -> vector<8x512xf32>
    %54 = arith.addf %16, %53 : vector<8x512xf32>
    %c0_38 = arith.constant 0 : index
    %c0_39 = arith.constant 0 : index
    %55 = vector.load %arg6[%c0_38, %c0_39] : memref<1x512xf32, #tpu.memory_space<vmem>>, vector<1x512xf32>
    %56 = vector.broadcast %55 : vector<1x512xf32> to vector<8x512xf32>
    %57 = arith.addf %54, %56 : vector<8x512xf32>
    %58 = vector.extract_strided_slice %57 {offsets = [0, 0], sizes = [8, 128], strides = [1, 1]} : vector<8x512xf32> to vector<8x128xf32>
    %cst_40 = arith.constant 5.000000e-01 : f32
    %59 = vector.broadcast %cst_40 : f32 to vector<8x128xf32>
    %60 = arith.mulf %59, %58 : vector<8x128xf32>
    %61 = math.tanh %60 : vector<8x128xf32>
    %cst_41 = arith.constant 1.000000e+00 : f32
    %62 = vector.broadcast %cst_41 : f32 to vector<8x128xf32>
    %63 = arith.addf %61, %62 : vector<8x128xf32>
    %cst_42 = arith.constant 5.000000e-01 : f32
    %64 = vector.broadcast %cst_42 : f32 to vector<8x128xf32>
    %65 = arith.mulf %64, %63 : vector<8x128xf32>
    %66 = vector.extract_strided_slice %57 {offsets = [0, 128], sizes = [8, 128], strides = [1, 1]} : vector<8x512xf32> to vector<8x128xf32>
    %cst_43 = arith.constant 5.000000e-01 : f32
    %67 = vector.broadcast %cst_43 : f32 to vector<8x128xf32>
    %68 = arith.mulf %67, %66 : vector<8x128xf32>
    %69 = math.tanh %68 : vector<8x128xf32>
    %cst_44 = arith.constant 1.000000e+00 : f32
    %70 = vector.broadcast %cst_44 : f32 to vector<8x128xf32>
    %71 = arith.addf %69, %70 : vector<8x128xf32>
    %cst_45 = arith.constant 5.000000e-01 : f32
    %72 = vector.broadcast %cst_45 : f32 to vector<8x128xf32>
    %73 = arith.mulf %72, %71 : vector<8x128xf32>
    %74 = vector.extract_strided_slice %57 {offsets = [0, 256], sizes = [8, 128], strides = [1, 1]} : vector<8x512xf32> to vector<8x128xf32>
    %75 = math.tanh %74 : vector<8x128xf32>
    %76 = vector.extract_strided_slice %57 {offsets = [0, 384], sizes = [8, 128], strides = [1, 1]} : vector<8x512xf32> to vector<8x128xf32>
    %cst_46 = arith.constant 5.000000e-01 : f32
    %77 = vector.broadcast %cst_46 : f32 to vector<8x128xf32>
    %78 = arith.mulf %77, %76 : vector<8x128xf32>
    %79 = math.tanh %78 : vector<8x128xf32>
    %cst_47 = arith.constant 1.000000e+00 : f32
    %80 = vector.broadcast %cst_47 : f32 to vector<8x128xf32>
    %81 = arith.addf %79, %80 : vector<8x128xf32>
    %cst_48 = arith.constant 5.000000e-01 : f32
    %82 = vector.broadcast %cst_48 : f32 to vector<8x128xf32>
    %83 = arith.mulf %82, %81 : vector<8x128xf32>
    %84 = arith.mulf %73, %14 : vector<8x128xf32>
    %85 = arith.mulf %65, %75 : vector<8x128xf32>
    %86 = arith.addf %84, %85 : vector<8x128xf32>
    %87 = math.tanh %86 : vector<8x128xf32>
    %88 = arith.mulf %83, %87 : vector<8x128xf32>
    %c0_49 = arith.constant 0 : index
    %c0_50 = arith.constant 0 : index
    %89 = vector.load %arg15[%c0_49, %c0_50] : memref<64x128xf32, #tpu.memory_space<vmem>>, vector<8x128xf32>
    tpu.vector_store %arg15[%c0_49, %c0_50], %88 {strides = array<i32>} : memref<64x128xf32, #tpu.memory_space<vmem>>, vector<8x128xf32>,
    %c0_51 = arith.constant 0 : index
    %c0_52 = arith.constant 0 : index
    %90 = vector.load %arg5[%c0_51, %c0_52] : memref<128x512xf32, #tpu.memory_space<vmem>>, vector<128x512xf32>
    %cst_53 = arith.constant dense<0.000000e+00> : vector<8x512xf32>
    %91 = tpu.matmul %88, %90, %cst_53 {dimension_numbers = #tpu.dot_dimension_numbers<[1], [0], [0], [1], [0, 0, 1, 1], [], []>} : vector<8x128xf32>, vector<128x512xf32>, vector<8x512xf32> -> vector<8x512xf32>
    %c8 = arith.constant 8 : index
    %c0_54 = arith.constant 0 : index
    %92 = vector.load %arg14[%c8, %c0_54] : memref<64x512xf32, #tpu.memory_space<vmem>>, vector<8x512xf32>
    %c0_55 = arith.constant 0 : index
    %c0_56 = arith.constant 0 : index
    %93 = vector.load %arg3[%c0_55, %c0_56] : memref<128x512xf32, #tpu.memory_space<vmem>>, vector<128x512xf32>
    %cst_57 = arith.constant dense<0.000000e+00> : vector<8x512xf32>
    %94 = tpu.matmul %51, %93, %cst_57 {dimension_numbers = #tpu.dot_dimension_numbers<[1], [0], [0], [1], [0, 0, 1, 1], [], []>} : vector<8x128xf32>, vector<128x512xf32>, vector<8x512xf32> -> vector<8x512xf32>
    %95 = arith.addf %92, %94 : vector<8x512xf32>
    %96 = vector.extract_strided_slice %95 {offsets = [0, 0], sizes = [8, 128], strides = [1, 1]} : vector<8x512xf32> to vector<8x128xf32>
    %cst_58 = arith.constant 5.000000e-01 : f32
    %97 = vector.broadcast %cst_58 : f32 to vector<8x128xf32>
    %98 = arith.mulf %97, %96 : vector<8x128xf32>
    %99 = math.tanh %98 : vector<8x128xf32>
    %cst_59 = arith.constant 1.000000e+00 : f32
    %100 = vector.broadcast %cst_59 : f32 to vector<8x128xf32>
    %101 = arith.addf %99, %100 : vector<8x128xf32>
    %cst_60 = arith.constant 5.000000e-01 : f32
    %102 = vector.broadcast %cst_60 : f32 to vector<8x128xf32>
    %103 = arith.mulf %102, %101 : vector<8x128xf32>
    %104 = vector.extract_strided_slice %95 {offsets = [0, 128], sizes = [8, 128], strides = [1, 1]} : vector<8x512xf32> to vector<8x128xf32>
    %cst_61 = arith.constant 5.000000e-01 : f32
    %105 = vector.broadcast %cst_61 : f32 to vector<8x128xf32>
    %106 = arith.mulf %105, %104 : vector<8x128xf32>
    %107 = math.tanh %106 : vector<8x128xf32>
    %cst_62 = arith.constant 1.000000e+00 : f32
    %108 = vector.broadcast %cst_62 : f32 to vector<8x128xf32>
    %109 = arith.addf %107, %108 : vector<8x128xf32>
    %cst_63 = arith.constant 5.000000e-01 : f32
    %110 = vector.broadcast %cst_63 : f32 to vector<8x128xf32>
    %111 = arith.mulf %110, %109 : vector<8x128xf32>
    %112 = vector.extract_strided_slice %95 {offsets = [0, 256], sizes = [8, 128], strides = [1, 1]} : vector<8x512xf32> to vector<8x128xf32>
    %113 = math.tanh %112 : vector<8x128xf32>
    %114 = vector.extract_strided_slice %95 {offsets = [0, 384], sizes = [8, 128], strides = [1, 1]} : vector<8x512xf32> to vector<8x128xf32>
    %cst_64 = arith.constant 5.000000e-01 : f32
    %115 = vector.broadcast %cst_64 : f32 to vector<8x128xf32>
    %116 = arith.mulf %115, %114 : vector<8x128xf32>
    %117 = math.tanh %116 : vector<8x128xf32>
    %cst_65 = arith.constant 1.000000e+00 : f32
    %118 = vector.broadcast %cst_65 : f32 to vector<8x128xf32>
    %119 = arith.addf %117, %118 : vector<8x128xf32>
    %cst_66 = arith.constant 5.000000e-01 : f32
    %120 = vector.broadcast %cst_66 : f32 to vector<8x128xf32>
    %121 = arith.mulf %120, %119 : vector<8x128xf32>
    %122 = arith.mulf %111, %49 : vector<8x128xf32>
    %123 = arith.mulf %103, %113 : vector<8x128xf32>
    %124 = arith.addf %122, %123 : vector<8x128xf32>
    %125 = math.tanh %124 : vector<8x128xf32>
    %126 = arith.mulf %121, %125 : vector<8x128xf32>
    %c0_67 = arith.constant 0 : index
    %c0_68 = arith.constant 0 : index
    %127 = vector.load %arg4[%c0_67, %c0_68] : memref<128x512xf32, #tpu.memory_space<vmem>>, vector<128x512xf32>
    %cst_69 = arith.constant dense<0.000000e+00> : vector<8x512xf32>
    %128 = tpu.matmul %126, %127, %cst_69 {dimension_numbers = #tpu.dot_dimension_numbers<[1], [0], [0], [1], [0, 0, 1, 1], [], []>} : vector<8x128xf32>, vector<128x512xf32>, vector<8x512xf32> -> vector<8x512xf32>
    %129 = arith.addf %91, %128 : vector<8x512xf32>
    %c0_70 = arith.constant 0 : index
    %c0_71 = arith.constant 0 : index
    %130 = vector.load %arg6[%c0_70, %c0_71] : memref<1x512xf32, #tpu.memory_space<vmem>>, vector<1x512xf32>
    %131 = vector.broadcast %130 : vector<1x512xf32> to vector<8x512xf32>
    %132 = arith.addf %129, %131 : vector<8x512xf32>
    %133 = vector.extract_strided_slice %132 {offsets = [0, 0], sizes = [8, 128], strides = [1, 1]} : vector<8x512xf32> to vector<8x128xf32>
    %cst_72 = arith.constant 5.000000e-01 : f32
    %134 = vector.broadcast %cst_72 : f32 to vector<8x128xf32>
    %135 = arith.mulf %134, %133 : vector<8x128xf32>
    %136 = math.tanh %135 : vector<8x128xf32>
    %cst_73 = arith.constant 1.000000e+00 : f32
    %137 = vector.broadcast %cst_73 : f32 to vector<8x128xf32>
    %138 = arith.addf %136, %137 : vector<8x128xf32>
    %cst_74 = arith.constant 5.000000e-01 : f32
    %139 = vector.broadcast %cst_74 : f32 to vector<8x128xf32>
    %140 = arith.mulf %139, %138 : vector<8x128xf32>
    %141 = vector.extract_strided_slice %132 {offsets = [0, 128], sizes = [8, 128], strides = [1, 1]} : vector<8x512xf32> to vector<8x128xf32>
    %cst_75 = arith.constant 5.000000e-01 : f32
    %142 = vector.broadcast %cst_75 : f32 to vector<8x128xf32>
    %143 = arith.mulf %142, %141 : vector<8x128xf32>
    %144 = math.tanh %143 : vector<8x128xf32>
    %cst_76 = arith.constant 1.000000e+00 : f32
    %145 = vector.broadcast %cst_76 : f32 to vector<8x128xf32>
    %146 = arith.addf %144, %145 : vector<8x128xf32>
    %cst_77 = arith.constant 5.000000e-01 : f32
    %147 = vector.broadcast %cst_77 : f32 to vector<8x128xf32>
    %148 = arith.mulf %147, %146 : vector<8x128xf32>
    %149 = vector.extract_strided_slice %132 {offsets = [0, 256], sizes = [8, 128], strides = [1, 1]} : vector<8x512xf32> to vector<8x128xf32>
    %150 = math.tanh %149 : vector<8x128xf32>
    %151 = vector.extract_strided_slice %132 {offsets = [0, 384], sizes = [8, 128], strides = [1, 1]} : vector<8x512xf32> to vector<8x128xf32>
    %cst_78 = arith.constant 5.000000e-01 : f32
    %152 = vector.broadcast %cst_78 : f32 to vector<8x128xf32>
    %153 = arith.mulf %152, %151 : vector<8x128xf32>
    %154 = math.tanh %153 : vector<8x128xf32>
    %cst_79 = arith.constant 1.000000e+00 : f32
    %155 = vector.broadcast %cst_79 : f32 to vector<8x128xf32>
    %156 = arith.addf %154, %155 : vector<8x128xf32>
    %cst_80 = arith.constant 5.000000e-01 : f32
    %157 = vector.broadcast %cst_80 : f32 to vector<8x128xf32>
    %158 = arith.mulf %157, %156 : vector<8x128xf32>
    %159 = arith.mulf %148, %86 : vector<8x128xf32>
    %160 = arith.mulf %140, %150 : vector<8x128xf32>
    %161 = arith.addf %159, %160 : vector<8x128xf32>
    %162 = math.tanh %161 : vector<8x128xf32>
    %163 = arith.mulf %158, %162 : vector<8x128xf32>
    %c8_81 = arith.constant 8 : index
    %c0_82 = arith.constant 0 : index
    %164 = vector.load %arg15[%c8_81, %c0_82] : memref<64x128xf32, #tpu.memory_space<vmem>>, vector<8x128xf32>
    tpu.vector_store %arg15[%c8_81, %c0_82], %163 {strides = array<i32>} : memref<64x128xf32, #tpu.memory_space<vmem>>, vector<8x128xf32>,
    %c0_83 = arith.constant 0 : index
    %c0_84 = arith.constant 0 : index
    %165 = vector.load %arg5[%c0_83, %c0_84] : memref<128x512xf32, #tpu.memory_space<vmem>>, vector<128x512xf32>
    %cst_85 = arith.constant dense<0.000000e+00> : vector<8x512xf32>
    %166 = tpu.matmul %163, %165, %cst_85 {dimension_numbers = #tpu.dot_dimension_numbers<[1], [0], [0], [1], [0, 0, 1, 1], [], []>} : vector<8x128xf32>, vector<128x512xf32>, vector<8x512xf32> -> vector<8x512xf32>
    %c16 = arith.constant 16 : index
    %c0_86 = arith.constant 0 : index
    %167 = vector.load %arg14[%c16, %c0_86] : memref<64x512xf32, #tpu.memory_space<vmem>>, vector<8x512xf32>
    %c0_87 = arith.constant 0 : index
    %c0_88 = arith.constant 0 : index
    %168 = vector.load %arg3[%c0_87, %c0_88] : memref<128x512xf32, #tpu.memory_space<vmem>>, vector<128x512xf32>
    %cst_89 = arith.constant dense<0.000000e+00> : vector<8x512xf32>
    %169 = tpu.matmul %126, %168, %cst_89 {dimension_numbers = #tpu.dot_dimension_numbers<[1], [0], [0], [1], [0, 0, 1, 1], [], []>} : vector<8x128xf32>, vector<128x512xf32>, vector<8x512xf32> -> vector<8x512xf32>
    %170 = arith.addf %167, %169 : vector<8x512xf32>
    %171 = vector.extract_strided_slice %170 {offsets = [0, 0], sizes = [8, 128], strides = [1, 1]} : vector<8x512xf32> to vector<8x128xf32>
    %cst_90 = arith.constant 5.000000e-01 : f32
    %172 = vector.broadcast %cst_90 : f32 to vector<8x128xf32>
    %173 = arith.mulf %172, %171 : vector<8x128xf32>
    %174 = math.tanh %173 : vector<8x128xf32>
    %cst_91 = arith.constant 1.000000e+00 : f32
    %175 = vector.broadcast %cst_91 : f32 to vector<8x128xf32>
    %176 = arith.addf %174, %175 : vector<8x128xf32>
    %cst_92 = arith.constant 5.000000e-01 : f32
    %177 = vector.broadcast %cst_92 : f32 to vector<8x128xf32>
    %178 = arith.mulf %177, %176 : vector<8x128xf32>
    %179 = vector.extract_strided_slice %170 {offsets = [0, 128], sizes = [8, 128], strides = [1, 1]} : vector<8x512xf32> to vector<8x128xf32>
    %cst_93 = arith.constant 5.000000e-01 : f32
    %180 = vector.broadcast %cst_93 : f32 to vector<8x128xf32>
    %181 = arith.mulf %180, %179 : vector<8x128xf32>
    %182 = math.tanh %181 : vector<8x128xf32>
    %cst_94 = arith.constant 1.000000e+00 : f32
    %183 = vector.broadcast %cst_94 : f32 to vector<8x128xf32>
    %184 = arith.addf %182, %183 : vector<8x128xf32>
    %cst_95 = arith.constant 5.000000e-01 : f32
    %185 = vector.broadcast %cst_95 : f32 to vector<8x128xf32>
    %186 = arith.mulf %185, %184 : vector<8x128xf32>
    %187 = vector.extract_strided_slice %170 {offsets = [0, 256], sizes = [8, 128], strides = [1, 1]} : vector<8x512xf32> to vector<8x128xf32>
    %188 = math.tanh %187 : vector<8x128xf32>
    %189 = vector.extract_strided_slice %170 {offsets = [0, 384], sizes = [8, 128], strides = [1, 1]} : vector<8x512xf32> to vector<8x128xf32>
    %cst_96 = arith.constant 5.000000e-01 : f32
    %190 = vector.broadcast %cst_96 : f32 to vector<8x128xf32>
    %191 = arith.mulf %190, %189 : vector<8x128xf32>
    %192 = math.tanh %191 : vector<8x128xf32>
    %cst_97 = arith.constant 1.000000e+00 : f32
    %193 = vector.broadcast %cst_97 : f32 to vector<8x128xf32>
    %194 = arith.addf %192, %193 : vector<8x128xf32>
    %cst_98 = arith.constant 5.000000e-01 : f32
    %195 = vector.broadcast %cst_98 : f32 to vector<8x128xf32>
    %196 = arith.mulf %195, %194 : vector<8x128xf32>
    %197 = arith.mulf %186, %124 : vector<8x128xf32>
    %198 = arith.mulf %178, %188 : vector<8x128xf32>
    %199 = arith.addf %197, %198 : vector<8x128xf32>
    %200 = math.tanh %199 : vector<8x128xf32>
    %201 = arith.mulf %196, %200 : vector<8x128xf32>
    %c0_99 = arith.constant 0 : index
    %c0_100 = arith.constant 0 : index
    %202 = vector.load %arg4[%c0_99, %c0_100] : memref<128x512xf32, #tpu.memory_space<vmem>>, vector<128x512xf32>
    %cst_101 = arith.constant dense<0.000000e+00> : vector<8x512xf32>
    %203 = tpu.matmul %201, %202, %cst_101 {dimension_numbers = #tpu.dot_dimension_numbers<[1], [0], [0], [1], [0, 0, 1, 1], [], []>} : vector<8x128xf32>, vector<128x512xf32>, vector<8x512xf32> -> vector<8x512xf32>
    %204 = arith.addf %166, %203 : vector<8x512xf32>
    %c0_102 = arith.constant 0 : index
    %c0_103 = arith.constant 0 : index
    %205 = vector.load %arg6[%c0_102, %c0_103] : memref<1x512xf32, #tpu.memory_space<vmem>>, vector<1x512xf32>
    %206 = vector.broadcast %205 : vector<1x512xf32> to vector<8x512xf32>
    %207 = arith.addf %204, %206 : vector<8x512xf32>
    %208 = vector.extract_strided_slice %207 {offsets = [0, 0], sizes = [8, 128], strides = [1, 1]} : vector<8x512xf32> to vector<8x128xf32>
    %cst_104 = arith.constant 5.000000e-01 : f32
    %209 = vector.broadcast %cst_104 : f32 to vector<8x128xf32>
    %210 = arith.mulf %209, %208 : vector<8x128xf32>
    %211 = math.tanh %210 : vector<8x128xf32>
    %cst_105 = arith.constant 1.000000e+00 : f32
    %212 = vector.broadcast %cst_105 : f32 to vector<8x128xf32>
    %213 = arith.addf %211, %212 : vector<8x128xf32>
    %cst_106 = arith.constant 5.000000e-01 : f32
    %214 = vector.broadcast %cst_106 : f32 to vector<8x128xf32>
    %215 = arith.mulf %214, %213 : vector<8x128xf32>
    %216 = vector.extract_strided_slice %207 {offsets = [0, 128], sizes = [8, 128], strides = [1, 1]} : vector<8x512xf32> to vector<8x128xf32>
    %cst_107 = arith.constant 5.000000e-01 : f32
    %217 = vector.broadcast %cst_107 : f32 to vector<8x128xf32>
    %218 = arith.mulf %217, %216 : vector<8x128xf32>
    %219 = math.tanh %218 : vector<8x128xf32>
    %cst_108 = arith.constant 1.000000e+00 : f32
    %220 = vector.broadcast %cst_108 : f32 to vector<8x128xf32>
    %221 = arith.addf %219, %220 : vector<8x128xf32>
    %cst_109 = arith.constant 5.000000e-01 : f32
    %222 = vector.broadcast %cst_109 : f32 to vector<8x128xf32>
    %223 = arith.mulf %222, %221 : vector<8x128xf32>
    %224 = vector.extract_strided_slice %207 {offsets = [0, 256], sizes = [8, 128], strides = [1, 1]} : vector<8x512xf32> to vector<8x128xf32>
    %225 = math.tanh %224 : vector<8x128xf32>
    %226 = vector.extract_strided_slice %207 {offsets = [0, 384], sizes = [8, 128], strides = [1, 1]} : vector<8x512xf32> to vector<8x128xf32>
    %cst_110 = arith.constant 5.000000e-01 : f32
    %227 = vector.broadcast %cst_110 : f32 to vector<8x128xf32>
    %228 = arith.mulf %227, %226 : vector<8x128xf32>
    %229 = math.tanh %228 : vector<8x128xf32>
    %cst_111 = arith.constant 1.000000e+00 : f32
    %230 = vector.broadcast %cst_111 : f32 to vector<8x128xf32>
    %231 = arith.addf %229, %230 : vector<8x128xf32>
    %cst_112 = arith.constant 5.000000e-01 : f32
    %232 = vector.broadcast %cst_112 : f32 to vector<8x128xf32>
    %233 = arith.mulf %232, %231 : vector<8x128xf32>
    %234 = arith.mulf %223, %161 : vector<8x128xf32>
    %235 = arith.mulf %215, %225 : vector<8x128xf32>
    %236 = arith.addf %234, %235 : vector<8x128xf32>
    %237 = math.tanh %236 : vector<8x128xf32>
    %238 = arith.mulf %233, %237 : vector<8x128xf32>
    %c16_113 = arith.constant 16 : index
    %c0_114 = arith.constant 0 : index
    %239 = vector.load %arg15[%c16_113, %c0_114] : memref<64x128xf32, #tpu.memory_space<vmem>>, vector<8x128xf32>
    tpu.vector_store %arg15[%c16_113, %c0_114], %238 {strides = array<i32>} : memref<64x128xf32, #tpu.memory_space<vmem>>, vector<8x128xf32>,
    %c0_115 = arith.constant 0 : index
    %c0_116 = arith.constant 0 : index
    %240 = vector.load %arg5[%c0_115, %c0_116] : memref<128x512xf32, #tpu.memory_space<vmem>>, vector<128x512xf32>
    %cst_117 = arith.constant dense<0.000000e+00> : vector<8x512xf32>
    %241 = tpu.matmul %238, %240, %cst_117 {dimension_numbers = #tpu.dot_dimension_numbers<[1], [0], [0], [1], [0, 0, 1, 1], [], []>} : vector<8x128xf32>, vector<128x512xf32>, vector<8x512xf32> -> vector<8x512xf32>
    %c24 = arith.constant 24 : index
    %c0_118 = arith.constant 0 : index
    %242 = vector.load %arg14[%c24, %c0_118] : memref<64x512xf32, #tpu.memory_space<vmem>>, vector<8x512xf32>
    %c0_119 = arith.constant 0 : index
    %c0_120 = arith.constant 0 : index
    %243 = vector.load %arg3[%c0_119, %c0_120] : memref<128x512xf32, #tpu.memory_space<vmem>>, vector<128x512xf32>
    %cst_121 = arith.constant dense<0.000000e+00> : vector<8x512xf32>
    %244 = tpu.matmul %201, %243, %cst_121 {dimension_numbers = #tpu.dot_dimension_numbers<[1], [0], [0], [1], [0, 0, 1, 1], [], []>} : vector<8x128xf32>, vector<128x512xf32>, vector<8x512xf32> -> vector<8x512xf32>
    %245 = arith.addf %242, %244 : vector<8x512xf32>
    %246 = vector.extract_strided_slice %245 {offsets = [0, 0], sizes = [8, 128], strides = [1, 1]} : vector<8x512xf32> to vector<8x128xf32>
    %cst_122 = arith.constant 5.000000e-01 : f32
    %247 = vector.broadcast %cst_122 : f32 to vector<8x128xf32>
    %248 = arith.mulf %247, %246 : vector<8x128xf32>
    %249 = math.tanh %248 : vector<8x128xf32>
    %cst_123 = arith.constant 1.000000e+00 : f32
    %250 = vector.broadcast %cst_123 : f32 to vector<8x128xf32>
    %251 = arith.addf %249, %250 : vector<8x128xf32>
    %cst_124 = arith.constant 5.000000e-01 : f32
    %252 = vector.broadcast %cst_124 : f32 to vector<8x128xf32>
    %253 = arith.mulf %252, %251 : vector<8x128xf32>
    %254 = vector.extract_strided_slice %245 {offsets = [0, 128], sizes = [8, 128], strides = [1, 1]} : vector<8x512xf32> to vector<8x128xf32>
    %cst_125 = arith.constant 5.000000e-01 : f32
    %255 = vector.broadcast %cst_125 : f32 to vector<8x128xf32>
    %256 = arith.mulf %255, %254 : vector<8x128xf32>
    %257 = math.tanh %256 : vector<8x128xf32>
    %cst_126 = arith.constant 1.000000e+00 : f32
    %258 = vector.broadcast %cst_126 : f32 to vector<8x128xf32>
    %259 = arith.addf %257, %258 : vector<8x128xf32>
    %cst_127 = arith.constant 5.000000e-01 : f32
    %260 = vector.broadcast %cst_127 : f32 to vector<8x128xf32>
    %261 = arith.mulf %260, %259 : vector<8x128xf32>
    %262 = vector.extract_strided_slice %245 {offsets = [0, 256], sizes = [8, 128], strides = [1, 1]} : vector<8x512xf32> to vector<8x128xf32>
    %263 = math.tanh %262 : vector<8x128xf32>
    %264 = vector.extract_strided_slice %245 {offsets = [0, 384], sizes = [8, 128], strides = [1, 1]} : vector<8x512xf32> to vector<8x128xf32>
    %cst_128 = arith.constant 5.000000e-01 : f32
    %265 = vector.broadcast %cst_128 : f32 to vector<8x128xf32>
    %266 = arith.mulf %265, %264 : vector<8x128xf32>
    %267 = math.tanh %266 : vector<8x128xf32>
    %cst_129 = arith.constant 1.000000e+00 : f32
    %268 = vector.broadcast %cst_129 : f32 to vector<8x128xf32>
    %269 = arith.addf %267, %268 : vector<8x128xf32>
    %cst_130 = arith.constant 5.000000e-01 : f32
    %270 = vector.broadcast %cst_130 : f32 to vector<8x128xf32>
    %271 = arith.mulf %270, %269 : vector<8x128xf32>
    %272 = arith.mulf %261, %199 : vector<8x128xf32>
    %273 = arith.mulf %253, %263 : vector<8x128xf32>
    %274 = arith.addf %272, %273 : vector<8x128xf32>
    %275 = math.tanh %274 : vector<8x128xf32>
    %276 = arith.mulf %271, %275 : vector<8x128xf32>
    %c0_131 = arith.constant 0 : index
    %c0_132 = arith.constant 0 : index
    %277 = vector.load %arg4[%c0_131, %c0_132] : memref<128x512xf32, #tpu.memory_space<vmem>>, vector<128x512xf32>
    %cst_133 = arith.constant dense<0.000000e+00> : vector<8x512xf32>
    %278 = tpu.matmul %276, %277, %cst_133 {dimension_numbers = #tpu.dot_dimension_numbers<[1], [0], [0], [1], [0, 0, 1, 1], [], []>} : vector<8x128xf32>, vector<128x512xf32>, vector<8x512xf32> -> vector<8x512xf32>
    %279 = arith.addf %241, %278 : vector<8x512xf32>
    %c0_134 = arith.constant 0 : index
    %c0_135 = arith.constant 0 : index
    %280 = vector.load %arg6[%c0_134, %c0_135] : memref<1x512xf32, #tpu.memory_space<vmem>>, vector<1x512xf32>
    %281 = vector.broadcast %280 : vector<1x512xf32> to vector<8x512xf32>
    %282 = arith.addf %279, %281 : vector<8x512xf32>
    %283 = vector.extract_strided_slice %282 {offsets = [0, 0], sizes = [8, 128], strides = [1, 1]} : vector<8x512xf32> to vector<8x128xf32>
    %cst_136 = arith.constant 5.000000e-01 : f32
    %284 = vector.broadcast %cst_136 : f32 to vector<8x128xf32>
    %285 = arith.mulf %284, %283 : vector<8x128xf32>
    %286 = math.tanh %285 : vector<8x128xf32>
    %cst_137 = arith.constant 1.000000e+00 : f32
    %287 = vector.broadcast %cst_137 : f32 to vector<8x128xf32>
    %288 = arith.addf %286, %287 : vector<8x128xf32>
    %cst_138 = arith.constant 5.000000e-01 : f32
    %289 = vector.broadcast %cst_138 : f32 to vector<8x128xf32>
    %290 = arith.mulf %289, %288 : vector<8x128xf32>
    %291 = vector.extract_strided_slice %282 {offsets = [0, 128], sizes = [8, 128], strides = [1, 1]} : vector<8x512xf32> to vector<8x128xf32>
    %cst_139 = arith.constant 5.000000e-01 : f32
    %292 = vector.broadcast %cst_139 : f32 to vector<8x128xf32>
    %293 = arith.mulf %292, %291 : vector<8x128xf32>
    %294 = math.tanh %293 : vector<8x128xf32>
    %cst_140 = arith.constant 1.000000e+00 : f32
    %295 = vector.broadcast %cst_140 : f32 to vector<8x128xf32>
    %296 = arith.addf %294, %295 : vector<8x128xf32>
    %cst_141 = arith.constant 5.000000e-01 : f32
    %297 = vector.broadcast %cst_141 : f32 to vector<8x128xf32>
    %298 = arith.mulf %297, %296 : vector<8x128xf32>
    %299 = vector.extract_strided_slice %282 {offsets = [0, 256], sizes = [8, 128], strides = [1, 1]} : vector<8x512xf32> to vector<8x128xf32>
    %300 = math.tanh %299 : vector<8x128xf32>
    %301 = vector.extract_strided_slice %282 {offsets = [0, 384], sizes = [8, 128], strides = [1, 1]} : vector<8x512xf32> to vector<8x128xf32>
    %cst_142 = arith.constant 5.000000e-01 : f32
    %302 = vector.broadcast %cst_142 : f32 to vector<8x128xf32>
    %303 = arith.mulf %302, %301 : vector<8x128xf32>
    %304 = math.tanh %303 : vector<8x128xf32>
    %cst_143 = arith.constant 1.000000e+00 : f32
    %305 = vector.broadcast %cst_143 : f32 to vector<8x128xf32>
    %306 = arith.addf %304, %305 : vector<8x128xf32>
    %cst_144 = arith.constant 5.000000e-01 : f32
    %307 = vector.broadcast %cst_144 : f32 to vector<8x128xf32>
    %308 = arith.mulf %307, %306 : vector<8x128xf32>
    %309 = arith.mulf %298, %236 : vector<8x128xf32>
    %310 = arith.mulf %290, %300 : vector<8x128xf32>
    %311 = arith.addf %309, %310 : vector<8x128xf32>
    %312 = math.tanh %311 : vector<8x128xf32>
    %313 = arith.mulf %308, %312 : vector<8x128xf32>
    %c24_145 = arith.constant 24 : index
    %c0_146 = arith.constant 0 : index
    %314 = vector.load %arg15[%c24_145, %c0_146] : memref<64x128xf32, #tpu.memory_space<vmem>>, vector<8x128xf32>
    tpu.vector_store %arg15[%c24_145, %c0_146], %313 {strides = array<i32>} : memref<64x128xf32, #tpu.memory_space<vmem>>, vector<8x128xf32>,
    %c0_147 = arith.constant 0 : index
    %c0_148 = arith.constant 0 : index
    %315 = vector.load %arg5[%c0_147, %c0_148] : memref<128x512xf32, #tpu.memory_space<vmem>>, vector<128x512xf32>
    %cst_149 = arith.constant dense<0.000000e+00> : vector<8x512xf32>
    %316 = tpu.matmul %313, %315, %cst_149 {dimension_numbers = #tpu.dot_dimension_numbers<[1], [0], [0], [1], [0, 0, 1, 1], [], []>} : vector<8x128xf32>, vector<128x512xf32>, vector<8x512xf32> -> vector<8x512xf32>
    %c32 = arith.constant 32 : index
    %c0_150 = arith.constant 0 : index
    %317 = vector.load %arg14[%c32, %c0_150] : memref<64x512xf32, #tpu.memory_space<vmem>>, vector<8x512xf32>
    %c0_151 = arith.constant 0 : index
    %c0_152 = arith.constant 0 : index
    %318 = vector.load %arg3[%c0_151, %c0_152] : memref<128x512xf32, #tpu.memory_space<vmem>>, vector<128x512xf32>
    %cst_153 = arith.constant dense<0.000000e+00> : vector<8x512xf32>
    %319 = tpu.matmul %276, %318, %cst_153 {dimension_numbers = #tpu.dot_dimension_numbers<[1], [0], [0], [1], [0, 0, 1, 1], [], []>} : vector<8x128xf32>, vector<128x512xf32>, vector<8x512xf32> -> vector<8x512xf32>
    %320 = arith.addf %317, %319 : vector<8x512xf32>
    %321 = vector.extract_strided_slice %320 {offsets = [0, 0], sizes = [8, 128], strides = [1, 1]} : vector<8x512xf32> to vector<8x128xf32>
    %cst_154 = arith.constant 5.000000e-01 : f32
    %322 = vector.broadcast %cst_154 : f32 to vector<8x128xf32>
    %323 = arith.mulf %322, %321 : vector<8x128xf32>
    %324 = math.tanh %323 : vector<8x128xf32>
    %cst_155 = arith.constant 1.000000e+00 : f32
    %325 = vector.broadcast %cst_155 : f32 to vector<8x128xf32>
    %326 = arith.addf %324, %325 : vector<8x128xf32>
    %cst_156 = arith.constant 5.000000e-01 : f32
    %327 = vector.broadcast %cst_156 : f32 to vector<8x128xf32>
    %328 = arith.mulf %327, %326 : vector<8x128xf32>
    %329 = vector.extract_strided_slice %320 {offsets = [0, 128], sizes = [8, 128], strides = [1, 1]} : vector<8x512xf32> to vector<8x128xf32>
    %cst_157 = arith.constant 5.000000e-01 : f32
    %330 = vector.broadcast %cst_157 : f32 to vector<8x128xf32>
    %331 = arith.mulf %330, %329 : vector<8x128xf32>
    %332 = math.tanh %331 : vector<8x128xf32>
    %cst_158 = arith.constant 1.000000e+00 : f32
    %333 = vector.broadcast %cst_158 : f32 to vector<8x128xf32>
    %334 = arith.addf %332, %333 : vector<8x128xf32>
    %cst_159 = arith.constant 5.000000e-01 : f32
    %335 = vector.broadcast %cst_159 : f32 to vector<8x128xf32>
    %336 = arith.mulf %335, %334 : vector<8x128xf32>
    %337 = vector.extract_strided_slice %320 {offsets = [0, 256], sizes = [8, 128], strides = [1, 1]} : vector<8x512xf32> to vector<8x128xf32>
    %338 = math.tanh %337 : vector<8x128xf32>
    %339 = vector.extract_strided_slice %320 {offsets = [0, 384], sizes = [8, 128], strides = [1, 1]} : vector<8x512xf32> to vector<8x128xf32>
    %cst_160 = arith.constant 5.000000e-01 : f32
    %340 = vector.broadcast %cst_160 : f32 to vector<8x128xf32>
    %341 = arith.mulf %340, %339 : vector<8x128xf32>
    %342 = math.tanh %341 : vector<8x128xf32>
    %cst_161 = arith.constant 1.000000e+00 : f32
    %343 = vector.broadcast %cst_161 : f32 to vector<8x128xf32>
    %344 = arith.addf %342, %343 : vector<8x128xf32>
    %cst_162 = arith.constant 5.000000e-01 : f32
    %345 = vector.broadcast %cst_162 : f32 to vector<8x128xf32>
    %346 = arith.mulf %345, %344 : vector<8x128xf32>
    %347 = arith.mulf %336, %274 : vector<8x128xf32>
    %348 = arith.mulf %328, %338 : vector<8x128xf32>
    %349 = arith.addf %347, %348 : vector<8x128xf32>
    %350 = math.tanh %349 : vector<8x128xf32>
    %351 = arith.mulf %346, %350 : vector<8x128xf32>
    %c0_163 = arith.constant 0 : index
    %c0_164 = arith.constant 0 : index
    %352 = vector.load %arg4[%c0_163, %c0_164] : memref<128x512xf32, #tpu.memory_space<vmem>>, vector<128x512xf32>
    %cst_165 = arith.constant dense<0.000000e+00> : vector<8x512xf32>
    %353 = tpu.matmul %351, %352, %cst_165 {dimension_numbers = #tpu.dot_dimension_numbers<[1], [0], [0], [1], [0, 0, 1, 1], [], []>} : vector<8x128xf32>, vector<128x512xf32>, vector<8x512xf32> -> vector<8x512xf32>
    %354 = arith.addf %316, %353 : vector<8x512xf32>
    %c0_166 = arith.constant 0 : index
    %c0_167 = arith.constant 0 : index
    %355 = vector.load %arg6[%c0_166, %c0_167] : memref<1x512xf32, #tpu.memory_space<vmem>>, vector<1x512xf32>
    %356 = vector.broadcast %355 : vector<1x512xf32> to vector<8x512xf32>
    %357 = arith.addf %354, %356 : vector<8x512xf32>
    %358 = vector.extract_strided_slice %357 {offsets = [0, 0], sizes = [8, 128], strides = [1, 1]} : vector<8x512xf32> to vector<8x128xf32>
    %cst_168 = arith.constant 5.000000e-01 : f32
    %359 = vector.broadcast %cst_168 : f32 to vector<8x128xf32>
    %360 = arith.mulf %359, %358 : vector<8x128xf32>
    %361 = math.tanh %360 : vector<8x128xf32>
    %cst_169 = arith.constant 1.000000e+00 : f32
    %362 = vector.broadcast %cst_169 : f32 to vector<8x128xf32>
    %363 = arith.addf %361, %362 : vector<8x128xf32>
    %cst_170 = arith.constant 5.000000e-01 : f32
    %364 = vector.broadcast %cst_170 : f32 to vector<8x128xf32>
    %365 = arith.mulf %364, %363 : vector<8x128xf32>
    %366 = vector.extract_strided_slice %357 {offsets = [0, 128], sizes = [8, 128], strides = [1, 1]} : vector<8x512xf32> to vector<8x128xf32>
    %cst_171 = arith.constant 5.000000e-01 : f32
    %367 = vector.broadcast %cst_171 : f32 to vector<8x128xf32>
    %368 = arith.mulf %367, %366 : vector<8x128xf32>
    %369 = math.tanh %368 : vector<8x128xf32>
    %cst_172 = arith.constant 1.000000e+00 : f32
    %370 = vector.broadcast %cst_172 : f32 to vector<8x128xf32>
    %371 = arith.addf %369, %370 : vector<8x128xf32>
    %cst_173 = arith.constant 5.000000e-01 : f32
    %372 = vector.broadcast %cst_173 : f32 to vector<8x128xf32>
    %373 = arith.mulf %372, %371 : vector<8x128xf32>
    %374 = vector.extract_strided_slice %357 {offsets = [0, 256], sizes = [8, 128], strides = [1, 1]} : vector<8x512xf32> to vector<8x128xf32>
    %375 = math.tanh %374 : vector<8x128xf32>
    %376 = vector.extract_strided_slice %357 {offsets = [0, 384], sizes = [8, 128], strides = [1, 1]} : vector<8x512xf32> to vector<8x128xf32>
    %cst_174 = arith.constant 5.000000e-01 : f32
    %377 = vector.broadcast %cst_174 : f32 to vector<8x128xf32>
    %378 = arith.mulf %377, %376 : vector<8x128xf32>
    %379 = math.tanh %378 : vector<8x128xf32>
    %cst_175 = arith.constant 1.000000e+00 : f32
    %380 = vector.broadcast %cst_175 : f32 to vector<8x128xf32>
    %381 = arith.addf %379, %380 : vector<8x128xf32>
    %cst_176 = arith.constant 5.000000e-01 : f32
    %382 = vector.broadcast %cst_176 : f32 to vector<8x128xf32>
    %383 = arith.mulf %382, %381 : vector<8x128xf32>
    %384 = arith.mulf %373, %311 : vector<8x128xf32>
    %385 = arith.mulf %365, %375 : vector<8x128xf32>
    %386 = arith.addf %384, %385 : vector<8x128xf32>
    %387 = math.tanh %386 : vector<8x128xf32>
    %388 = arith.mulf %383, %387 : vector<8x128xf32>
    %c32_177 = arith.constant 32 : index
    %c0_178 = arith.constant 0 : index
    %389 = vector.load %arg15[%c32_177, %c0_178] : memref<64x128xf32, #tpu.memory_space<vmem>>, vector<8x128xf32>
    tpu.vector_store %arg15[%c32_177, %c0_178], %388 {strides = array<i32>} : memref<64x128xf32, #tpu.memory_space<vmem>>, vector<8x128xf32>,
    %c0_179 = arith.constant 0 : index
    %c0_180 = arith.constant 0 : index
    %390 = vector.load %arg5[%c0_179, %c0_180] : memref<128x512xf32, #tpu.memory_space<vmem>>, vector<128x512xf32>
    %cst_181 = arith.constant dense<0.000000e+00> : vector<8x512xf32>
    %391 = tpu.matmul %388, %390, %cst_181 {dimension_numbers = #tpu.dot_dimension_numbers<[1], [0], [0], [1], [0, 0, 1, 1], [], []>} : vector<8x128xf32>, vector<128x512xf32>, vector<8x512xf32> -> vector<8x512xf32>
    %c40 = arith.constant 40 : index
    %c0_182 = arith.constant 0 : index
    %392 = vector.load %arg14[%c40, %c0_182] : memref<64x512xf32, #tpu.memory_space<vmem>>, vector<8x512xf32>
    %c0_183 = arith.constant 0 : index
    %c0_184 = arith.constant 0 : index
    %393 = vector.load %arg3[%c0_183, %c0_184] : memref<128x512xf32, #tpu.memory_space<vmem>>, vector<128x512xf32>
    %cst_185 = arith.constant dense<0.000000e+00> : vector<8x512xf32>
    %394 = tpu.matmul %351, %393, %cst_185 {dimension_numbers = #tpu.dot_dimension_numbers<[1], [0], [0], [1], [0, 0, 1, 1], [], []>} : vector<8x128xf32>, vector<128x512xf32>, vector<8x512xf32> -> vector<8x512xf32>
    %395 = arith.addf %392, %394 : vector<8x512xf32>
    %396 = vector.extract_strided_slice %395 {offsets = [0, 0], sizes = [8, 128], strides = [1, 1]} : vector<8x512xf32> to vector<8x128xf32>
    %cst_186 = arith.constant 5.000000e-01 : f32
    %397 = vector.broadcast %cst_186 : f32 to vector<8x128xf32>
    %398 = arith.mulf %397, %396 : vector<8x128xf32>
    %399 = math.tanh %398 : vector<8x128xf32>
    %cst_187 = arith.constant 1.000000e+00 : f32
    %400 = vector.broadcast %cst_187 : f32 to vector<8x128xf32>
    %401 = arith.addf %399, %400 : vector<8x128xf32>
    %cst_188 = arith.constant 5.000000e-01 : f32
    %402 = vector.broadcast %cst_188 : f32 to vector<8x128xf32>
    %403 = arith.mulf %402, %401 : vector<8x128xf32>
    %404 = vector.extract_strided_slice %395 {offsets = [0, 128], sizes = [8, 128], strides = [1, 1]} : vector<8x512xf32> to vector<8x128xf32>
    %cst_189 = arith.constant 5.000000e-01 : f32
    %405 = vector.broadcast %cst_189 : f32 to vector<8x128xf32>
    %406 = arith.mulf %405, %404 : vector<8x128xf32>
    %407 = math.tanh %406 : vector<8x128xf32>
    %cst_190 = arith.constant 1.000000e+00 : f32
    %408 = vector.broadcast %cst_190 : f32 to vector<8x128xf32>
    %409 = arith.addf %407, %408 : vector<8x128xf32>
    %cst_191 = arith.constant 5.000000e-01 : f32
    %410 = vector.broadcast %cst_191 : f32 to vector<8x128xf32>
    %411 = arith.mulf %410, %409 : vector<8x128xf32>
    %412 = vector.extract_strided_slice %395 {offsets = [0, 256], sizes = [8, 128], strides = [1, 1]} : vector<8x512xf32> to vector<8x128xf32>
    %413 = math.tanh %412 : vector<8x128xf32>
    %414 = vector.extract_strided_slice %395 {offsets = [0, 384], sizes = [8, 128], strides = [1, 1]} : vector<8x512xf32> to vector<8x128xf32>
    %cst_192 = arith.constant 5.000000e-01 : f32
    %415 = vector.broadcast %cst_192 : f32 to vector<8x128xf32>
    %416 = arith.mulf %415, %414 : vector<8x128xf32>
    %417 = math.tanh %416 : vector<8x128xf32>
    %cst_193 = arith.constant 1.000000e+00 : f32
    %418 = vector.broadcast %cst_193 : f32 to vector<8x128xf32>
    %419 = arith.addf %417, %418 : vector<8x128xf32>
    %cst_194 = arith.constant 5.000000e-01 : f32
    %420 = vector.broadcast %cst_194 : f32 to vector<8x128xf32>
    %421 = arith.mulf %420, %419 : vector<8x128xf32>
    %422 = arith.mulf %411, %349 : vector<8x128xf32>
    %423 = arith.mulf %403, %413 : vector<8x128xf32>
    %424 = arith.addf %422, %423 : vector<8x128xf32>
    %425 = math.tanh %424 : vector<8x128xf32>
    %426 = arith.mulf %421, %425 : vector<8x128xf32>
    %c0_195 = arith.constant 0 : index
    %c0_196 = arith.constant 0 : index
    %427 = vector.load %arg4[%c0_195, %c0_196] : memref<128x512xf32, #tpu.memory_space<vmem>>, vector<128x512xf32>
    %cst_197 = arith.constant dense<0.000000e+00> : vector<8x512xf32>
    %428 = tpu.matmul %426, %427, %cst_197 {dimension_numbers = #tpu.dot_dimension_numbers<[1], [0], [0], [1], [0, 0, 1, 1], [], []>} : vector<8x128xf32>, vector<128x512xf32>, vector<8x512xf32> -> vector<8x512xf32>
    %429 = arith.addf %391, %428 : vector<8x512xf32>
    %c0_198 = arith.constant 0 : index
    %c0_199 = arith.constant 0 : index
    %430 = vector.load %arg6[%c0_198, %c0_199] : memref<1x512xf32, #tpu.memory_space<vmem>>, vector<1x512xf32>
    %431 = vector.broadcast %430 : vector<1x512xf32> to vector<8x512xf32>
    %432 = arith.addf %429, %431 : vector<8x512xf32>
    %433 = vector.extract_strided_slice %432 {offsets = [0, 0], sizes = [8, 128], strides = [1, 1]} : vector<8x512xf32> to vector<8x128xf32>
    %cst_200 = arith.constant 5.000000e-01 : f32
    %434 = vector.broadcast %cst_200 : f32 to vector<8x128xf32>
    %435 = arith.mulf %434, %433 : vector<8x128xf32>
    %436 = math.tanh %435 : vector<8x128xf32>
    %cst_201 = arith.constant 1.000000e+00 : f32
    %437 = vector.broadcast %cst_201 : f32 to vector<8x128xf32>
    %438 = arith.addf %436, %437 : vector<8x128xf32>
    %cst_202 = arith.constant 5.000000e-01 : f32
    %439 = vector.broadcast %cst_202 : f32 to vector<8x128xf32>
    %440 = arith.mulf %439, %438 : vector<8x128xf32>
    %441 = vector.extract_strided_slice %432 {offsets = [0, 128], sizes = [8, 128], strides = [1, 1]} : vector<8x512xf32> to vector<8x128xf32>
    %cst_203 = arith.constant 5.000000e-01 : f32
    %442 = vector.broadcast %cst_203 : f32 to vector<8x128xf32>
    %443 = arith.mulf %442, %441 : vector<8x128xf32>
    %444 = math.tanh %443 : vector<8x128xf32>
    %cst_204 = arith.constant 1.000000e+00 : f32
    %445 = vector.broadcast %cst_204 : f32 to vector<8x128xf32>
    %446 = arith.addf %444, %445 : vector<8x128xf32>
    %cst_205 = arith.constant 5.000000e-01 : f32
    %447 = vector.broadcast %cst_205 : f32 to vector<8x128xf32>
    %448 = arith.mulf %447, %446 : vector<8x128xf32>
    %449 = vector.extract_strided_slice %432 {offsets = [0, 256], sizes = [8, 128], strides = [1, 1]} : vector<8x512xf32> to vector<8x128xf32>
    %450 = math.tanh %449 : vector<8x128xf32>
    %451 = vector.extract_strided_slice %432 {offsets = [0, 384], sizes = [8, 128], strides = [1, 1]} : vector<8x512xf32> to vector<8x128xf32>
    %cst_206 = arith.constant 5.000000e-01 : f32
    %452 = vector.broadcast %cst_206 : f32 to vector<8x128xf32>
    %453 = arith.mulf %452, %451 : vector<8x128xf32>
    %454 = math.tanh %453 : vector<8x128xf32>
    %cst_207 = arith.constant 1.000000e+00 : f32
    %455 = vector.broadcast %cst_207 : f32 to vector<8x128xf32>
    %456 = arith.addf %454, %455 : vector<8x128xf32>
    %cst_208 = arith.constant 5.000000e-01 : f32
    %457 = vector.broadcast %cst_208 : f32 to vector<8x128xf32>
    %458 = arith.mulf %457, %456 : vector<8x128xf32>
    %459 = arith.mulf %448, %386 : vector<8x128xf32>
    %460 = arith.mulf %440, %450 : vector<8x128xf32>
    %461 = arith.addf %459, %460 : vector<8x128xf32>
    %462 = math.tanh %461 : vector<8x128xf32>
    %463 = arith.mulf %458, %462 : vector<8x128xf32>
    %c40_209 = arith.constant 40 : index
    %c0_210 = arith.constant 0 : index
    %464 = vector.load %arg15[%c40_209, %c0_210] : memref<64x128xf32, #tpu.memory_space<vmem>>, vector<8x128xf32>
    tpu.vector_store %arg15[%c40_209, %c0_210], %463 {strides = array<i32>} : memref<64x128xf32, #tpu.memory_space<vmem>>, vector<8x128xf32>,
    %c0_211 = arith.constant 0 : index
    %c0_212 = arith.constant 0 : index
    %465 = vector.load %arg5[%c0_211, %c0_212] : memref<128x512xf32, #tpu.memory_space<vmem>>, vector<128x512xf32>
    %cst_213 = arith.constant dense<0.000000e+00> : vector<8x512xf32>
    %466 = tpu.matmul %463, %465, %cst_213 {dimension_numbers = #tpu.dot_dimension_numbers<[1], [0], [0], [1], [0, 0, 1, 1], [], []>} : vector<8x128xf32>, vector<128x512xf32>, vector<8x512xf32> -> vector<8x512xf32>
    %c48 = arith.constant 48 : index
    %c0_214 = arith.constant 0 : index
    %467 = vector.load %arg14[%c48, %c0_214] : memref<64x512xf32, #tpu.memory_space<vmem>>, vector<8x512xf32>
    %c0_215 = arith.constant 0 : index
    %c0_216 = arith.constant 0 : index
    %468 = vector.load %arg3[%c0_215, %c0_216] : memref<128x512xf32, #tpu.memory_space<vmem>>, vector<128x512xf32>
    %cst_217 = arith.constant dense<0.000000e+00> : vector<8x512xf32>
    %469 = tpu.matmul %426, %468, %cst_217 {dimension_numbers = #tpu.dot_dimension_numbers<[1], [0], [0], [1], [0, 0, 1, 1], [], []>} : vector<8x128xf32>, vector<128x512xf32>, vector<8x512xf32> -> vector<8x512xf32>
    %470 = arith.addf %467, %469 : vector<8x512xf32>
    %471 = vector.extract_strided_slice %470 {offsets = [0, 0], sizes = [8, 128], strides = [1, 1]} : vector<8x512xf32> to vector<8x128xf32>
    %cst_218 = arith.constant 5.000000e-01 : f32
    %472 = vector.broadcast %cst_218 : f32 to vector<8x128xf32>
    %473 = arith.mulf %472, %471 : vector<8x128xf32>
    %474 = math.tanh %473 : vector<8x128xf32>
    %cst_219 = arith.constant 1.000000e+00 : f32
    %475 = vector.broadcast %cst_219 : f32 to vector<8x128xf32>
    %476 = arith.addf %474, %475 : vector<8x128xf32>
    %cst_220 = arith.constant 5.000000e-01 : f32
    %477 = vector.broadcast %cst_220 : f32 to vector<8x128xf32>
    %478 = arith.mulf %477, %476 : vector<8x128xf32>
    %479 = vector.extract_strided_slice %470 {offsets = [0, 128], sizes = [8, 128], strides = [1, 1]} : vector<8x512xf32> to vector<8x128xf32>
    %cst_221 = arith.constant 5.000000e-01 : f32
    %480 = vector.broadcast %cst_221 : f32 to vector<8x128xf32>
    %481 = arith.mulf %480, %479 : vector<8x128xf32>
    %482 = math.tanh %481 : vector<8x128xf32>
    %cst_222 = arith.constant 1.000000e+00 : f32
    %483 = vector.broadcast %cst_222 : f32 to vector<8x128xf32>
    %484 = arith.addf %482, %483 : vector<8x128xf32>
    %cst_223 = arith.constant 5.000000e-01 : f32
    %485 = vector.broadcast %cst_223 : f32 to vector<8x128xf32>
    %486 = arith.mulf %485, %484 : vector<8x128xf32>
    %487 = vector.extract_strided_slice %470 {offsets = [0, 256], sizes = [8, 128], strides = [1, 1]} : vector<8x512xf32> to vector<8x128xf32>
    %488 = math.tanh %487 : vector<8x128xf32>
    %489 = vector.extract_strided_slice %470 {offsets = [0, 384], sizes = [8, 128], strides = [1, 1]} : vector<8x512xf32> to vector<8x128xf32>
    %cst_224 = arith.constant 5.000000e-01 : f32
    %490 = vector.broadcast %cst_224 : f32 to vector<8x128xf32>
    %491 = arith.mulf %490, %489 : vector<8x128xf32>
    %492 = math.tanh %491 : vector<8x128xf32>
    %cst_225 = arith.constant 1.000000e+00 : f32
    %493 = vector.broadcast %cst_225 : f32 to vector<8x128xf32>
    %494 = arith.addf %492, %493 : vector<8x128xf32>
    %cst_226 = arith.constant 5.000000e-01 : f32
    %495 = vector.broadcast %cst_226 : f32 to vector<8x128xf32>
    %496 = arith.mulf %495, %494 : vector<8x128xf32>
    %497 = arith.mulf %486, %424 : vector<8x128xf32>
    %498 = arith.mulf %478, %488 : vector<8x128xf32>
    %499 = arith.addf %497, %498 : vector<8x128xf32>
    %500 = math.tanh %499 : vector<8x128xf32>
    %501 = arith.mulf %496, %500 : vector<8x128xf32>
    %c0_227 = arith.constant 0 : index
    %c0_228 = arith.constant 0 : index
    %502 = vector.load %arg4[%c0_227, %c0_228] : memref<128x512xf32, #tpu.memory_space<vmem>>, vector<128x512xf32>
    %cst_229 = arith.constant dense<0.000000e+00> : vector<8x512xf32>
    %503 = tpu.matmul %501, %502, %cst_229 {dimension_numbers = #tpu.dot_dimension_numbers<[1], [0], [0], [1], [0, 0, 1, 1], [], []>} : vector<8x128xf32>, vector<128x512xf32>, vector<8x512xf32> -> vector<8x512xf32>
    %504 = arith.addf %466, %503 : vector<8x512xf32>
    %c0_230 = arith.constant 0 : index
    %c0_231 = arith.constant 0 : index
    %505 = vector.load %arg6[%c0_230, %c0_231] : memref<1x512xf32, #tpu.memory_space<vmem>>, vector<1x512xf32>
    %506 = vector.broadcast %505 : vector<1x512xf32> to vector<8x512xf32>
    %507 = arith.addf %504, %506 : vector<8x512xf32>
    %508 = vector.extract_strided_slice %507 {offsets = [0, 0], sizes = [8, 128], strides = [1, 1]} : vector<8x512xf32> to vector<8x128xf32>
    %cst_232 = arith.constant 5.000000e-01 : f32
    %509 = vector.broadcast %cst_232 : f32 to vector<8x128xf32>
    %510 = arith.mulf %509, %508 : vector<8x128xf32>
    %511 = math.tanh %510 : vector<8x128xf32>
    %cst_233 = arith.constant 1.000000e+00 : f32
    %512 = vector.broadcast %cst_233 : f32 to vector<8x128xf32>
    %513 = arith.addf %511, %512 : vector<8x128xf32>
    %cst_234 = arith.constant 5.000000e-01 : f32
    %514 = vector.broadcast %cst_234 : f32 to vector<8x128xf32>
    %515 = arith.mulf %514, %513 : vector<8x128xf32>
    %516 = vector.extract_strided_slice %507 {offsets = [0, 128], sizes = [8, 128], strides = [1, 1]} : vector<8x512xf32> to vector<8x128xf32>
    %cst_235 = arith.constant 5.000000e-01 : f32
    %517 = vector.broadcast %cst_235 : f32 to vector<8x128xf32>
    %518 = arith.mulf %517, %516 : vector<8x128xf32>
    %519 = math.tanh %518 : vector<8x128xf32>
    %cst_236 = arith.constant 1.000000e+00 : f32
    %520 = vector.broadcast %cst_236 : f32 to vector<8x128xf32>
    %521 = arith.addf %519, %520 : vector<8x128xf32>
    %cst_237 = arith.constant 5.000000e-01 : f32
    %522 = vector.broadcast %cst_237 : f32 to vector<8x128xf32>
    %523 = arith.mulf %522, %521 : vector<8x128xf32>
    %524 = vector.extract_strided_slice %507 {offsets = [0, 256], sizes = [8, 128], strides = [1, 1]} : vector<8x512xf32> to vector<8x128xf32>
    %525 = math.tanh %524 : vector<8x128xf32>
    %526 = vector.extract_strided_slice %507 {offsets = [0, 384], sizes = [8, 128], strides = [1, 1]} : vector<8x512xf32> to vector<8x128xf32>
    %cst_238 = arith.constant 5.000000e-01 : f32
    %527 = vector.broadcast %cst_238 : f32 to vector<8x128xf32>
    %528 = arith.mulf %527, %526 : vector<8x128xf32>
    %529 = math.tanh %528 : vector<8x128xf32>
    %cst_239 = arith.constant 1.000000e+00 : f32
    %530 = vector.broadcast %cst_239 : f32 to vector<8x128xf32>
    %531 = arith.addf %529, %530 : vector<8x128xf32>
    %cst_240 = arith.constant 5.000000e-01 : f32
    %532 = vector.broadcast %cst_240 : f32 to vector<8x128xf32>
    %533 = arith.mulf %532, %531 : vector<8x128xf32>
    %534 = arith.mulf %523, %461 : vector<8x128xf32>
    %535 = arith.mulf %515, %525 : vector<8x128xf32>
    %536 = arith.addf %534, %535 : vector<8x128xf32>
    %537 = math.tanh %536 : vector<8x128xf32>
    %538 = arith.mulf %533, %537 : vector<8x128xf32>
    %c48_241 = arith.constant 48 : index
    %c0_242 = arith.constant 0 : index
    %539 = vector.load %arg15[%c48_241, %c0_242] : memref<64x128xf32, #tpu.memory_space<vmem>>, vector<8x128xf32>
    tpu.vector_store %arg15[%c48_241, %c0_242], %538 {strides = array<i32>} : memref<64x128xf32, #tpu.memory_space<vmem>>, vector<8x128xf32>,
    %c0_243 = arith.constant 0 : index
    %c0_244 = arith.constant 0 : index
    %540 = vector.load %arg5[%c0_243, %c0_244] : memref<128x512xf32, #tpu.memory_space<vmem>>, vector<128x512xf32>
    %cst_245 = arith.constant dense<0.000000e+00> : vector<8x512xf32>
    %541 = tpu.matmul %538, %540, %cst_245 {dimension_numbers = #tpu.dot_dimension_numbers<[1], [0], [0], [1], [0, 0, 1, 1], [], []>} : vector<8x128xf32>, vector<128x512xf32>, vector<8x512xf32> -> vector<8x512xf32>
    %c56 = arith.constant 56 : index
    %c0_246 = arith.constant 0 : index
    %542 = vector.load %arg14[%c56, %c0_246] : memref<64x512xf32, #tpu.memory_space<vmem>>, vector<8x512xf32>
    %c0_247 = arith.constant 0 : index
    %c0_248 = arith.constant 0 : index
    %543 = vector.load %arg3[%c0_247, %c0_248] : memref<128x512xf32, #tpu.memory_space<vmem>>, vector<128x512xf32>
    %cst_249 = arith.constant dense<0.000000e+00> : vector<8x512xf32>
    %544 = tpu.matmul %501, %543, %cst_249 {dimension_numbers = #tpu.dot_dimension_numbers<[1], [0], [0], [1], [0, 0, 1, 1], [], []>} : vector<8x128xf32>, vector<128x512xf32>, vector<8x512xf32> -> vector<8x512xf32>
    %545 = arith.addf %542, %544 : vector<8x512xf32>
    %546 = vector.extract_strided_slice %545 {offsets = [0, 0], sizes = [8, 128], strides = [1, 1]} : vector<8x512xf32> to vector<8x128xf32>
    %cst_250 = arith.constant 5.000000e-01 : f32
    %547 = vector.broadcast %cst_250 : f32 to vector<8x128xf32>
    %548 = arith.mulf %547, %546 : vector<8x128xf32>
    %549 = math.tanh %548 : vector<8x128xf32>
    %cst_251 = arith.constant 1.000000e+00 : f32
    %550 = vector.broadcast %cst_251 : f32 to vector<8x128xf32>
    %551 = arith.addf %549, %550 : vector<8x128xf32>
    %cst_252 = arith.constant 5.000000e-01 : f32
    %552 = vector.broadcast %cst_252 : f32 to vector<8x128xf32>
    %553 = arith.mulf %552, %551 : vector<8x128xf32>
    %554 = vector.extract_strided_slice %545 {offsets = [0, 128], sizes = [8, 128], strides = [1, 1]} : vector<8x512xf32> to vector<8x128xf32>
    %cst_253 = arith.constant 5.000000e-01 : f32
    %555 = vector.broadcast %cst_253 : f32 to vector<8x128xf32>
    %556 = arith.mulf %555, %554 : vector<8x128xf32>
    %557 = math.tanh %556 : vector<8x128xf32>
    %cst_254 = arith.constant 1.000000e+00 : f32
    %558 = vector.broadcast %cst_254 : f32 to vector<8x128xf32>
    %559 = arith.addf %557, %558 : vector<8x128xf32>
    %cst_255 = arith.constant 5.000000e-01 : f32
    %560 = vector.broadcast %cst_255 : f32 to vector<8x128xf32>
    %561 = arith.mulf %560, %559 : vector<8x128xf32>
    %562 = vector.extract_strided_slice %545 {offsets = [0, 256], sizes = [8, 128], strides = [1, 1]} : vector<8x512xf32> to vector<8x128xf32>
    %563 = math.tanh %562 : vector<8x128xf32>
    %564 = vector.extract_strided_slice %545 {offsets = [0, 384], sizes = [8, 128], strides = [1, 1]} : vector<8x512xf32> to vector<8x128xf32>
    %cst_256 = arith.constant 5.000000e-01 : f32
    %565 = vector.broadcast %cst_256 : f32 to vector<8x128xf32>
    %566 = arith.mulf %565, %564 : vector<8x128xf32>
    %567 = math.tanh %566 : vector<8x128xf32>
    %cst_257 = arith.constant 1.000000e+00 : f32
    %568 = vector.broadcast %cst_257 : f32 to vector<8x128xf32>
    %569 = arith.addf %567, %568 : vector<8x128xf32>
    %cst_258 = arith.constant 5.000000e-01 : f32
    %570 = vector.broadcast %cst_258 : f32 to vector<8x128xf32>
    %571 = arith.mulf %570, %569 : vector<8x128xf32>
    %572 = arith.mulf %561, %499 : vector<8x128xf32>
    %573 = arith.mulf %553, %563 : vector<8x128xf32>
    %574 = arith.addf %572, %573 : vector<8x128xf32>
    %575 = math.tanh %574 : vector<8x128xf32>
    %576 = arith.mulf %571, %575 : vector<8x128xf32>
    %c0_259 = arith.constant 0 : index
    %c0_260 = arith.constant 0 : index
    %577 = vector.load %arg4[%c0_259, %c0_260] : memref<128x512xf32, #tpu.memory_space<vmem>>, vector<128x512xf32>
    %cst_261 = arith.constant dense<0.000000e+00> : vector<8x512xf32>
    %578 = tpu.matmul %576, %577, %cst_261 {dimension_numbers = #tpu.dot_dimension_numbers<[1], [0], [0], [1], [0, 0, 1, 1], [], []>} : vector<8x128xf32>, vector<128x512xf32>, vector<8x512xf32> -> vector<8x512xf32>
    %579 = arith.addf %541, %578 : vector<8x512xf32>
    %c0_262 = arith.constant 0 : index
    %c0_263 = arith.constant 0 : index
    %580 = vector.load %arg6[%c0_262, %c0_263] : memref<1x512xf32, #tpu.memory_space<vmem>>, vector<1x512xf32>
    %581 = vector.broadcast %580 : vector<1x512xf32> to vector<8x512xf32>
    %582 = arith.addf %579, %581 : vector<8x512xf32>
    %583 = vector.extract_strided_slice %582 {offsets = [0, 0], sizes = [8, 128], strides = [1, 1]} : vector<8x512xf32> to vector<8x128xf32>
    %cst_264 = arith.constant 5.000000e-01 : f32
    %584 = vector.broadcast %cst_264 : f32 to vector<8x128xf32>
    %585 = arith.mulf %584, %583 : vector<8x128xf32>
    %586 = math.tanh %585 : vector<8x128xf32>
    %cst_265 = arith.constant 1.000000e+00 : f32
    %587 = vector.broadcast %cst_265 : f32 to vector<8x128xf32>
    %588 = arith.addf %586, %587 : vector<8x128xf32>
    %cst_266 = arith.constant 5.000000e-01 : f32
    %589 = vector.broadcast %cst_266 : f32 to vector<8x128xf32>
    %590 = arith.mulf %589, %588 : vector<8x128xf32>
    %591 = vector.extract_strided_slice %582 {offsets = [0, 128], sizes = [8, 128], strides = [1, 1]} : vector<8x512xf32> to vector<8x128xf32>
    %cst_267 = arith.constant 5.000000e-01 : f32
    %592 = vector.broadcast %cst_267 : f32 to vector<8x128xf32>
    %593 = arith.mulf %592, %591 : vector<8x128xf32>
    %594 = math.tanh %593 : vector<8x128xf32>
    %cst_268 = arith.constant 1.000000e+00 : f32
    %595 = vector.broadcast %cst_268 : f32 to vector<8x128xf32>
    %596 = arith.addf %594, %595 : vector<8x128xf32>
    %cst_269 = arith.constant 5.000000e-01 : f32
    %597 = vector.broadcast %cst_269 : f32 to vector<8x128xf32>
    %598 = arith.mulf %597, %596 : vector<8x128xf32>
    %599 = vector.extract_strided_slice %582 {offsets = [0, 256], sizes = [8, 128], strides = [1, 1]} : vector<8x512xf32> to vector<8x128xf32>
    %600 = math.tanh %599 : vector<8x128xf32>
    %601 = vector.extract_strided_slice %582 {offsets = [0, 384], sizes = [8, 128], strides = [1, 1]} : vector<8x512xf32> to vector<8x128xf32>
    %cst_270 = arith.constant 5.000000e-01 : f32
    %602 = vector.broadcast %cst_270 : f32 to vector<8x128xf32>
    %603 = arith.mulf %602, %601 : vector<8x128xf32>
    %604 = math.tanh %603 : vector<8x128xf32>
    %cst_271 = arith.constant 1.000000e+00 : f32
    %605 = vector.broadcast %cst_271 : f32 to vector<8x128xf32>
    %606 = arith.addf %604, %605 : vector<8x128xf32>
    %cst_272 = arith.constant 5.000000e-01 : f32
    %607 = vector.broadcast %cst_272 : f32 to vector<8x128xf32>
    %608 = arith.mulf %607, %606 : vector<8x128xf32>
    %609 = arith.mulf %598, %536 : vector<8x128xf32>
    %610 = arith.mulf %590, %600 : vector<8x128xf32>
    %611 = arith.addf %609, %610 : vector<8x128xf32>
    %612 = math.tanh %611 : vector<8x128xf32>
    %613 = arith.mulf %608, %612 : vector<8x128xf32>
    %c56_273 = arith.constant 56 : index
    %c0_274 = arith.constant 0 : index
    %614 = vector.load %arg15[%c56_273, %c0_274] : memref<64x128xf32, #tpu.memory_space<vmem>>, vector<8x128xf32>
    tpu.vector_store %arg15[%c56_273, %c0_274], %613 {strides = array<i32>} : memref<64x128xf32, #tpu.memory_space<vmem>>, vector<8x128xf32>,
    %c0_275 = arith.constant 0 : index
    %c0_276 = arith.constant 0 : index
    %615 = vector.load %arg15[%c0_275, %c0_276] : memref<64x128xf32, #tpu.memory_space<vmem>>, vector<64x128xf32>
    %c0_277 = arith.constant 0 : index
    %c0_278 = arith.constant 0 : index
    %616 = vector.load %arg7[%c0_277, %c0_278] : memref<128x128xf32, #tpu.memory_space<vmem>>, vector<128x128xf32>
    %cst_279 = arith.constant dense<0.000000e+00> : vector<64x128xf32>
    %617 = tpu.matmul %615, %616, %cst_279 {dimension_numbers = #tpu.dot_dimension_numbers<[1], [0], [0], [1], [0, 0, 1, 1], [], []>} : vector<64x128xf32>, vector<128x128xf32>, vector<64x128xf32> -> vector<64x128xf32>
    %c0_280 = arith.constant 0 : index
    %c0_281 = arith.constant 0 : index
    %618 = vector.load %arg8[%c0_280, %c0_281] : memref<1x128xf32, #tpu.memory_space<vmem>>, vector<1x128xf32>
    %619 = vector.broadcast %618 : vector<1x128xf32> to vector<64x128xf32>
    %620 = arith.addf %617, %619 : vector<64x128xf32>
    %c0_282 = arith.constant 0 : index
    %c0_283 = arith.constant 0 : index
    %621 = vector.load %arg11[%c0_282, %c0_283] : memref<64x128xf32, #tpu.memory_space<vmem>>, vector<64x128xf32>
    tpu.vector_store %arg11[%c0_282, %c0_283], %620 {strides = array<i32>} : memref<64x128xf32, #tpu.memory_space<vmem>>, vector<64x128xf32>,
    %c0_284 = arith.constant 0 : index
    %c0_285 = arith.constant 0 : index
    %c0_286 = arith.constant 0 : index
    %622 = vector.load %arg12[%c0_284, %c0_285, %c0_286] : memref<2x8x128xf32, #tpu.memory_space<vmem>>, vector<1x8x128xf32>
    %623 = vector.shape_cast %622 : vector<1x8x128xf32> to vector<8x128xf32>
    %624 = vector.shape_cast %576 : vector<8x128xf32> to vector<1x8x128xf32>
    tpu.vector_store %arg12[%c0_284, %c0_285, %c0_286], %624 {strides = array<i32>} : memref<2x8x128xf32, #tpu.memory_space<vmem>>, vector<1x8x128xf32>,
    %c1_287 = arith.constant 1 : index
    %c0_288 = arith.constant 0 : index
    %c0_289 = arith.constant 0 : index
    %625 = vector.load %arg12[%c1_287, %c0_288, %c0_289] : memref<2x8x128xf32, #tpu.memory_space<vmem>>, vector<1x8x128xf32>
    %626 = vector.shape_cast %625 : vector<1x8x128xf32> to vector<8x128xf32>
    %627 = vector.shape_cast %613 : vector<8x128xf32> to vector<1x8x128xf32>
    tpu.vector_store %arg12[%c1_287, %c0_288, %c0_289], %627 {strides = array<i32>} : memref<2x8x128xf32, #tpu.memory_space<vmem>>, vector<1x8x128xf32>,
    %c0_290 = arith.constant 0 : index
    %c0_291 = arith.constant 0 : index
    %c0_292 = arith.constant 0 : index
    %628 = vector.load %arg13[%c0_290, %c0_291, %c0_292] : memref<2x8x128xf32, #tpu.memory_space<vmem>>, vector<1x8x128xf32>
    %629 = vector.shape_cast %628 : vector<1x8x128xf32> to vector<8x128xf32>
    %630 = vector.shape_cast %574 : vector<8x128xf32> to vector<1x8x128xf32>
    tpu.vector_store %arg13[%c0_290, %c0_291, %c0_292], %630 {strides = array<i32>} : memref<2x8x128xf32, #tpu.memory_space<vmem>>, vector<1x8x128xf32>,
    %c1_293 = arith.constant 1 : index
    %c0_294 = arith.constant 0 : index
    %c0_295 = arith.constant 0 : index
    %631 = vector.load %arg13[%c1_293, %c0_294, %c0_295] : memref<2x8x128xf32, #tpu.memory_space<vmem>>, vector<1x8x128xf32>
    %632 = vector.shape_cast %631 : vector<1x8x128xf32> to vector<8x128xf32>
    %633 = vector.shape_cast %611 : vector<8x128xf32> to vector<1x8x128xf32>
    tpu.vector_store %arg13[%c1_293, %c0_294, %c0_295], %633 {strides = array<i32>} : memref<2x8x128xf32, #tpu.memory_space<vmem>>, vector<1x8x128xf32>,
    return
  }
}

</mosaic_0001>

<bundles_post_ra>
// kernel: forward_pallas.1
= control target key start
LH: loop header
LB: loop body
LE: loop exit
PB: predicated region body
PF: predicated region fallthrough
CT: control target
= control target key end

     0   :  { %v12482_v3 = vmov 0.0   ;;  %vm87_vm0 = vcmask 261120   ;;  %s12468_s1 = inlined_call_operand.vmem [shape: f32[32,512], index: 1, kind: input, shape index: {}]   ;;  %s12469_s3 = inlined_call_operand.vmem [shape: f32[128,512], index: 3, kind: input, shape index: {}]   ;;  %s12470_s0 = inlined_call_operand.vmem [shape: f32[64,32], index: 0, kind: input, shape index: {}]   ;;  %s12471_s9 = inlined_call_operand.vmem [shape: f32[2,8,128], index: 9, kind: input, shape index: {}, may-alias: {9,10}]   ;;  %s12472_s4 = inlined_call_operand.vmem [shape: f32[128,512], index: 4, kind: input, shape index: {}]   ;;  %s12473_s5 = inlined_call_operand.vmem [shape: f32[128,512], index: 5, kind: input, shape index: {}]   ;;  %s12474_s2 = inlined_call_operand.vmem [shape: f32[1,512], index: 2, kind: input, shape index: {}]   ;;  %s12475_s10 = inlined_call_operand.vmem [shape: f32[2,8,128], index: 10, kind: input, shape index: {}, may-alias: {9,10}]   ;;  %s12476_s6 = inlined_call_operand.vmem [shape: f32[1,512], index: 6, kind: input, shape index: {}]   ;;  %s12477_s13 = inlined_call_operand.vmem [shape: f32[2,8,128], index: 13, kind: output, shape index: {2}]   ;;  %s12478_s12 = inlined_call_operand.vmem [shape: f32[2,8,128], index: 12, kind: output, shape index: {1}]   ;;  %s12479_s7 = inlined_call_operand.vmem [shape: f32[128,128], index: 7, kind: input, shape index: {}]   ;;  %s12480_s8 = inlined_call_operand.vmem [shape: f32[1,128], index: 8, kind: input, shape index: {}]   ;;  %s12481_s11 = inlined_call_operand.vmem [shape: f32[64,128], index: 11, kind: output, shape index: {0}]  }
   0x1   :  { %v52_v0 = vld [vmem:[%s12468_s1 + $0x18] sm:$0xff]  ;;  %v51_v2 = vld [vmem:[%s12468_s1 + $0x10] sm:$0xff]  ;;  %289 = vmatprep.mubr.f32.mxu1 %v12482_v3  ;;  %176 = vmatprep.mubr.f32.mxu0 %v12482_v3  ;;  %v445_v12 = vld [vmem:[%s12469_s3 + $0x8] sm:$0xff] }
   0x2   :  { %v56_v1 = vld [vmem:[%s12468_s1 + $0x38] sm:$0xff]  ;;  %v55_v5 = vld [vmem:[%s12468_s1 + $0x30] sm:$0xff]  ;;  %v449_v13 = vld [vmem:[%s12469_s3 + $0x28] sm:$0xff] }
   0x3   :  { %v6147_v4 = vpack.c.bf16 %v56_v1, %v52_v0  ;;  %v60_v6 = vld [vmem:[%s12468_s1 + $0x58] sm:$0xff]  ;;  %v6149_v8 = vpack.c.bf16 %v55_v5, %v51_v2  ;;  %v59_v10 = vld [vmem:[%s12468_s1 + $0x50] sm:$0xff]  ;;  %v8083_v15 = vpack.c.bf16 %v449_v13, %v445_v12  ;;  %v444_v16 = vld [vmem:[%s12469_s3] sm:$0xff] }
   0x4   :  { %v64_v7 = vld [vmem:[%s12468_s1 + $0x78] sm:$0xff]  ;;  %v63_v11 = vld [vmem:[%s12468_s1 + $0x70] sm:$0xff]  ;;  %v448_v17 = vld [vmem:[%s12469_s3 + $0x20] sm:$0xff] }
   0x5   :  { %v6151_v9 = vpack.c.bf16 %v64_v7, %v60_v6  ;;  %6148 = vmatprep.subr.bf16.mxu1 %v6147_v4  ;;  %v6153_v14 = vpack.c.bf16 %v63_v11, %v59_v10  ;;  %v453_v18 = vld [vmem:[%s12469_s3 + $0x48] sm:$0xff]  ;;  %v8100_v20 = vld [vmem:[%s12470_s0] sm:$0xff]  ;;  %v8102_v21 = vpack.c.bf16 %v448_v17, %v444_v16  ;;  %v8162_v40 = vld [vmem:[%s12470_s0 + $0x10] sm:$0xff] }
   0x6   :  { %6150 = vmatpush1.bf16.msra.mxu1 %v6149_v8  ;;  %v457_v19 = vld [vmem:[%s12469_s3 + $0x68] sm:$0xff]  ;;  %v452_v23 = vld [vmem:[%s12469_s3 + $0x40] sm:$0xff]  ;;  %v44_v53 = vld [vmem:[%s12470_s0 + $0x18] sm:$0xff] }
   0x7   :  { %6152 = vmatprep.subr.bf16.mxu1 %v6151_v9  ;;  %v8105_v22 = vpack.c.bf16 %v457_v19, %v453_v18  ;;  %v456_v24 = vld [vmem:[%s12469_s3 + $0x60] sm:$0xff]  ;;  %v461_v25 = vld [vmem:[%s12469_s3 + $0x88] sm:$0xff]  ;;  %v47_v11 = vld [vmem:[%s12470_s0 + $0x30] sm:$0xff] }
   0x8   :  { %v465_v26 = vld [vmem:[%s12469_s3 + $0xa8] sm:$0xff]  ;;  %v8128_v28 = vpack.c.bf16 %v456_v24, %v452_v23  ;;  %v460_v29 = vld [vmem:[%s12469_s3 + $0x80] sm:$0xff]  ;;  %v447_v17 = vld [vmem:[%s12469_s3 + $0x18] sm:$0xff] }
   0x9   :  { %v8124_v27 = vld [vmem:[%s12470_s0 + $0x8] sm:$0xff]  ;;  %v464_v30 = vld [vmem:[%s12469_s3 + $0xa0] sm:$0xff]  ;;  %v8140_v32 = vpack.c.bf16 %v465_v26, %v461_v25  ;;  %v451_v18 = vld [vmem:[%s12469_s3 + $0x38] sm:$0xff] }
   0xa   :  { %6154 = vmatpush1.bf16.msra.mxu1 %v6153_v14  ;;  %v50_v31 = vld [vmem:[%s12468_s1 + $0x8] sm:$0xff]  ;;  %v49_v34 = vld [vmem:[%s12468_s1] sm:$0xff]  ;;  %v8169_v42 = vpack.c.bf16 %v464_v30, %v460_v29  ;;  %v48_v19 = vld [vmem:[%s12470_s0 + $0x38] sm:$0xff]  ;;  %v8277_v23 = vpack.c.bf16 %v451_v18, %v447_v17 }
   0xb   :  { %6156 = vmatprep.subr.bf16.mxu1 %v8083_v15  ;;  %v54_v33 = vld [vmem:[%s12468_s1 + $0x28] sm:$0xff]  ;;  %v53_v35 = vld [vmem:[%s12468_s1 + $0x20] sm:$0xff]  ;;  %v446_v24 = vld [vmem:[%s12469_s3 + $0x10] sm:$0xff] }
   0xc   :  { %v469_v36 = vld [vmem:[%s12469_s3 + $0xc8] sm:$0xff]  ;;  %v6139_v38 = vpack.c.bf16 %v54_v33, %v50_v31  ;;  %v6141_v39 = vpack.c.bf16 %v53_v35, %v49_v34  ;;  %v57_v44 = vld [vmem:[%s12468_s1 + $0x40] sm:$0xff]  ;;  %v450_v25 = vld [vmem:[%s12469_s3 + $0x30] sm:$0xff] }
   0xd   :  { %6058 = vmatmul.mubr.msk.f32.vlgmr.msra.gmra.mrb[0].mxu1 %vm87_vm0, %v8100_v20  ;;  %v473_v37 = vld [vmem:[%s12469_s3 + $0xe8] sm:$0xff]  ;;  %v61_v45 = vld [vmem:[%s12468_s1 + $0x60] sm:$0xff]  ;;  %v455_v26 = vld [vmem:[%s12469_s3 + $0x58] sm:$0xff]  ;;  %v8300_v30 = vpack.c.bf16 %v450_v25, %v446_v24 }
   0xe   :  { %6158 = vmatpush1.bf16.msra.mxu1 %v8102_v21  ;;  %295 = vmatprep.mubr.f32.mxu1 %v12482_v3  ;;  %v58_v41 = vld [vmem:[%s12468_s1 + $0x48] sm:$0xff]  ;;  %v6167_v46 = vpack.c.bf16 %v473_v37, %v469_v36  ;;  %v468_v47 = vld [vmem:[%s12469_s3 + $0xc0] sm:$0xff]  ;;  %v6145_v52 = vpack.c.bf16 %v61_v45, %v57_v44  ;;  %v454_v33 = vld [vmem:[%s12469_s3 + $0x50] sm:$0xff] }
   0xf   :  { %6160 = vmatprep.subr.bf16.mxu1 %v8105_v22  ;;  %v62_v43 = vld [vmem:[%s12468_s1 + $0x68] sm:$0xff]  ;;  %v472_v48 = vld [vmem:[%s12469_s3 + $0xe0] sm:$0xff]  ;;  %6140 = vmatprep.subr.bf16.mxu0 %v6139_v38  ;;  %v458_v34 = vld [vmem:[%s12469_s3 + $0x70] sm:$0xff] }
  0x10   :  { %v6143_v49 = vpack.c.bf16 %v62_v43, %v58_v41  ;;  %v477_v50 = vld [vmem:[%s12469_s3 + $0x108] sm:$0xff]  ;;  %6142 = vmatpush1.bf16.msra.mxu0 %v6141_v39  ;;  %v6169_v54 = vpack.c.bf16 %v472_v48, %v468_v47  ;;  %v476_v56 = vld [vmem:[%s12469_s3 + $0x100] sm:$0xff]  ;;  %v463_v35 = vld [vmem:[%s12469_s3 + $0x98] sm:$0xff]  ;;  %v8321_v37 = vpack.c.bf16 %v458_v34, %v454_v33 }
  0x11   :  { %6059 = vmatmul.mubr.msk.f32.gmra.mrb[2].mxu1 %vm87_vm0, %v8124_v27  ;;  %v481_v51 = vld [vmem:[%s12469_s3 + $0x128] sm:$0xff]  ;;  %v480_v57 = vld [vmem:[%s12469_s3 + $0x120] sm:$0xff]  ;;  %v467_v36 = vld [vmem:[%s12469_s3 + $0xb8] sm:$0xff] }
  0x12   :  { %6162 = vmatpush1.bf16.msra.mxu1 %v8128_v28  ;;  %301 = vmatprep.mubr.f32.mxu1 %v12482_v3  ;;  %v6171_v55 = vpack.c.bf16 %v481_v51, %v477_v50  ;;  %v485_v58 = vld [vmem:[%s12469_s3 + $0x148] sm:$0xff]  ;;  %v45_v60 = vld [vmem:[%s12470_s0 + $0x20] sm:$0xff]  ;;  %v6173_v61 = vpack.c.bf16 %v480_v57, %v476_v56  ;;  %v8325_v38 = vpack.c.bf16 %v467_v36, %v463_v35  ;;  %v462_v39 = vld [vmem:[%s12469_s3 + $0x90] sm:$0xff] }
  0x13   :  { %6164 = vmatprep.subr.bf16.mxu1 %v8140_v32  ;;  %6144 = vmatprep.subr.bf16.mxu0 %v6143_v49  ;;  %v489_v59 = vld [vmem:[%s12469_s3 + $0x168] sm:$0xff]  ;;  %v484_v63 = vld [vmem:[%s12469_s3 + $0x140] sm:$0xff]  ;;  %v471_v41 = vld [vmem:[%s12469_s3 + $0xd8] sm:$0xff] }
  0x14   :  { %6146 = vmatpush1.bf16.msra.mxu0 %v6145_v52  ;;  %v6175_v62 = vpack.c.bf16 %v489_v59, %v485_v58  ;;  %v488_v0 = vld [vmem:[%s12469_s3 + $0x160] sm:$0xff]  ;;  %v493_v1 = vld [vmem:[%s12469_s3 + $0x188] sm:$0xff]  ;;  %v475_v43 = vld [vmem:[%s12469_s3 + $0xf8] sm:$0xff] }
  0x15   :  { %6060 = vmatmul.mubr.msk.f32.gmra.mrb[4].mxu1 %vm87_vm0, %v8162_v40  ;;  %v497_v2 = vld [vmem:[%s12469_s3 + $0x1a8] sm:$0xff]  ;;  %v6177_v5 = vpack.c.bf16 %v488_v0, %v484_v63  ;;  %v492_v7 = vld [vmem:[%s12469_s3 + $0x180] sm:$0xff]  ;;  %v8345_v45 = vpack.c.bf16 %v475_v43, %v471_v41  ;;  %v474_v47 = vld [vmem:[%s12469_s3 + $0xf0] sm:$0xff] }
  0x16   :  { %6166 = vmatpush1.bf16.msra.mxu1 %v8169_v42  ;;  %307 = vmatprep.mubr.f32.mxu1 %v12482_v3  ;;  %v46_v4 = vld [vmem:[%s12470_s0 + $0x28] sm:$0xff]  ;;  %v6179_v6 = vpack.c.bf16 %v497_v2, %v493_v1  ;;  %v496_v8 = vld [vmem:[%s12469_s3 + $0x1a0] sm:$0xff]  ;;  %v479_v48 = vld [vmem:[%s12469_s3 + $0x118] sm:$0xff] }
  0x17   :  { %6168 = vmatprep.subr.bf16.mxu1 %v6167_v46  ;;  %6050 = vmatmul.mubr.msk.f32.vlgmr.msra.gmra.mrb[0].mxu0 %vm87_vm0, %v8100_v20  ;;  %v501_v9 = vld [vmem:[%s12469_s3 + $0x1c8] sm:$0xff]  ;;  %v6181_v12 = vpack.c.bf16 %v496_v8, %v492_v7  ;;  %v500_v14 = vld [vmem:[%s12469_s3 + $0x1c0] sm:$0xff]  ;;  %v470_v46 = vld [vmem:[%s12469_s3 + $0xd0] sm:$0xff] }
  0x18   :  { %182 = vmatprep.mubr.f32.mxu0 %v12482_v3  ;;  %v505_v10 = vld [vmem:[%s12469_s3 + $0x1e8] sm:$0xff]  ;;  %v504_v16 = vld [vmem:[%s12469_s3 + $0x1e0] sm:$0xff]  ;;  %v483_v49 = vld [vmem:[%s12469_s3 + $0x138] sm:$0xff]  ;;  %v8362_v50 = vpack.c.bf16 %v474_v47, %v470_v46 }
  0x19   :  { %6061 = vmatmul.mubr.msk.f32.gmra.mrb[6].mxu1 %vm87_vm0, %v44_v53  ;;  %v6183_v13 = vpack.c.bf16 %v505_v10, %v501_v9  ;;  %v6185_v20 = vpack.c.bf16 %v504_v16, %v500_v14  ;;  %v8298_v29 = vld [vmem:[%s12471_s9] sm:$0xff]  ;;  %v8365_v51 = vpack.c.bf16 %v483_v49, %v479_v48  ;;  %v478_v52 = vld [vmem:[%s12469_s3 + $0x110] sm:$0xff]  ;;  %v503_v2 = vld [vmem:[%s12469_s3 + $0x1d8] sm:$0xff] }
  0x1a   :  { %6170 = vmatpush1.bf16.msra.mxu1 %v6169_v54  ;;  %313 = vmatprep.mubr.f32.mxu1 %v12482_v3  ;;  %v487_v54 = vld [vmem:[%s12469_s3 + $0x158] sm:$0xff]  ;;  %v486_v58 = vld [vmem:[%s12469_s3 + $0x150] sm:$0xff]  ;;  %v673_v10 = vld [vmem:[%s12472_s4 + $0x8] sm:$0xff] }
  0x1b   :  { %6172 = vmatprep.subr.bf16.mxu1 %v6171_v55  ;;  %6051 = vmatmul.mubr.msk.f32.gmra.mrb[2].mxu0 %vm87_vm0, %v8124_v27  ;;  %v459_v27 = vld [vmem:[%s12469_s3 + $0x78] sm:$0xff]  ;;  %v490_v59 = vld [vmem:[%s12469_s3 + $0x170] sm:$0xff]  ;;  %v672_v16 = vld [vmem:[%s12472_s4] sm:$0xff] }
  0x1c   :  { %188 = vmatprep.mubr.f32.mxu0 %v12482_v3  ;;  %v8303_v31 = vpack.c.bf16 %v459_v27, %v455_v26  ;;  %v491_v55 = vld [vmem:[%s12469_s3 + $0x178] sm:$0xff]  ;;  %v494_v0 = vld [vmem:[%s12469_s3 + $0x190] sm:$0xff]  ;;  %v676_v17 = vld [vmem:[%s12472_s4 + $0x20] sm:$0xff] }
  0x1d   :  { %6062 = vmatmul.mubr.msk.f32.gmra.mrb[8].mxu1 %vm87_vm0, %v45_v60  ;;  %v8385_v57 = vpack.c.bf16 %v491_v55, %v487_v54  ;;  %v498_v1 = vld [vmem:[%s12469_s3 + $0x1b0] sm:$0xff]  ;;  %v679_v14 = vld [vmem:[%s12472_s4 + $0x38] sm:$0xff]  ;;  %v681_v26 = vld [vmem:[%s12472_s4 + $0x48] sm:$0xff] }
  0x1e   :  { %6174 = vmatpush1.bf16.msra.mxu1 %v6173_v61  ;;  %319 = vmatprep.mubr.f32.mxu1 %v12482_v3  ;;  %v499_v61 = vld [vmem:[%s12469_s3 + $0x1b8] sm:$0xff]  ;;  %v502_v7 = vld [vmem:[%s12469_s3 + $0x1d0] sm:$0xff]  ;;  %v685_v27 = vld [vmem:[%s12472_s4 + $0x68] sm:$0xff] }
  0x1f   :  { %6176 = vmatprep.subr.bf16.mxu1 %v6175_v62  ;;  %6052 = vmatmul.mubr.msk.f32.gmra.mrb[4].mxu0 %vm87_vm0, %v8162_v40  ;;  %v466_v40 = vld [vmem:[%s12469_s3 + $0xb0] sm:$0xff]  ;;  %v8400_v62 = vpack.c.bf16 %v490_v59, %v486_v58  ;;  %v8481_v33 = vpack.c.bf16 %v685_v27, %v681_v26  ;;  %v687_v34 = vld [vmem:[%s12472_s4 + $0x78] sm:$0xff]  ;;  %v680_v35 = vld [vmem:[%s12472_s4 + $0x40] sm:$0xff] }
  0x20   :  { %194 = vmatprep.mubr.f32.mxu0 %v12482_v3  ;;  %v8342_v44 = vpack.c.bf16 %v466_v40, %v462_v39  ;;  %v506_v8 = vld [vmem:[%s12469_s3 + $0x1f0] sm:$0xff]  ;;  %v684_v36 = vld [vmem:[%s12472_s4 + $0x60] sm:$0xff]  ;;  %v689_v47 = vld [vmem:[%s12472_s4 + $0x88] sm:$0xff] }
  0x21   :  { %6063 = vmatmul.mubr.msk.f32.gmra.mrb[10].mxu1 %vm87_vm0, %v46_v4  ;;  %v8430_v9 = vpack.c.bf16 %v506_v8, %v502_v7  ;;  %v678_v24 = vld [vmem:[%s12472_s4 + $0x30] sm:$0xff]  ;;  %v8494_v40 = vpack.c.bf16 %v684_v36, %v680_v35  ;;  %v693_v48 = vld [vmem:[%s12472_s4 + $0xa8] sm:$0xff]  ;;  %v691_v49 = vld [vmem:[%s12472_s4 + $0x98] sm:$0xff] }
  0x22   :  { %6178 = vmatpush1.bf16.msra.mxu1 %v6177_v5  ;;  %325 = vmatprep.mubr.f32.mxu1 %v12482_v3  ;;  %v8418_v5 = vpack.c.bf16 %v498_v1, %v494_v0  ;;  %v682_v41 = vld [vmem:[%s12472_s4 + $0x50] sm:$0xff]  ;;  %v688_v54 = vld [vmem:[%s12472_s4 + $0x80] sm:$0xff]  ;;  %v697_v1 = vld [vmem:[%s12472_s4 + $0xc8] sm:$0xff] }
  0x23   :  { %6180 = vmatprep.subr.bf16.mxu1 %v6179_v6  ;;  %6053 = vmatmul.mubr.msk.f32.gmra.mrb[6].mxu0 %vm87_vm0, %v44_v53  ;;  %v482_v53 = vld [vmem:[%s12469_s3 + $0x130] sm:$0xff]  ;;  %v692_v55 = vld [vmem:[%s12472_s4 + $0xa0] sm:$0xff]  ;;  %v703_v8 = vld [vmem:[%s12472_s4 + $0xf8] sm:$0xff] }
  0x24   :  { %200 = vmatprep.mubr.f32.mxu0 %v12482_v3  ;;  %v8382_v56 = vpack.c.bf16 %v482_v53, %v478_v52  ;;  %v686_v43 = vld [vmem:[%s12472_s4 + $0x70] sm:$0xff]  ;;  %v8517_v52 = vpack.c.bf16 %v693_v48, %v689_v47  ;;  %v695_v53 = vld [vmem:[%s12472_s4 + $0xb8] sm:$0xff]  ;;  %v8530_v59 = vpack.c.bf16 %v692_v55, %v688_v54  ;;  %v709_v26 = vld [vmem:[%s12472_s4 + $0x128] sm:$0xff] }
  0x25   :  { %6064 = vmatmul.mubr.msk.f32.gmra.mrb[12].mxu1 %vm87_vm0, %v47_v11  ;;  %v8503_v46 = vpack.c.bf16 %v686_v43, %v682_v41  ;;  %v8528_v58 = vpack.c.bf16 %v695_v53, %v691_v49  ;;  %v707_v27 = vld [vmem:[%s12472_s4 + $0x118] sm:$0xff]  ;;  %v704_v35 = vld [vmem:[%s12472_s4 + $0x100] sm:$0xff]  ;;  %v706_v47 = vld [vmem:[%s12472_s4 + $0x110] sm:$0xff] }
  0x26   :  { %6182 = vmatpush1.bf16.msra.mxu1 %v6181_v12  ;;  %331 = vmatprep.mubr.f32.mxu1 %v12482_v3  ;;  %v675_v12 = vld [vmem:[%s12472_s4 + $0x18] sm:$0xff]  ;;  %v708_v36 = vld [vmem:[%s12472_s4 + $0x120] sm:$0xff]  ;;  %v710_v48 = vld [vmem:[%s12472_s4 + $0x130] sm:$0xff] }
  0x27   :  { %6184 = vmatprep.subr.bf16.mxu1 %v6183_v13  ;;  %6054 = vmatmul.mubr.msk.f32.gmra.mrb[8].mxu0 %vm87_vm0, %v45_v60  ;;  %v495_v60 = vld [vmem:[%s12469_s3 + $0x198] sm:$0xff]  ;;  %v8456_v18 = vpack.c.bf16 %v679_v14, %v675_v12  ;;  %v8602_v43 = vpack.c.bf16 %v708_v36, %v704_v35  ;;  %v8611_v49 = vpack.c.bf16 %v710_v48, %v706_v47  ;;  %v713_v53 = vld [vmem:[%s12472_s4 + $0x148] sm:$0xff]  ;;  %v720_v35 = vld [vmem:[%s12472_s4 + $0x180] sm:$0xff] }
  0x28   :  { %206 = vmatprep.mubr.f32.mxu0 %v12482_v3  ;;  %v8403_v63 = vpack.c.bf16 %v499_v61, %v495_v60  ;;  %v690_v60 = vld [vmem:[%s12472_s4 + $0x90] sm:$0xff]  ;;  %v717_v54 = vld [vmem:[%s12472_s4 + $0x168] sm:$0xff]  ;;  %v715_v55 = vld [vmem:[%s12472_s4 + $0x158] sm:$0xff] }
  0x29   :  { %6065 = vmatmul.mubr.msk.f32.gmra.mrb[14].mxu1 %vm87_vm0, %v48_v19  ;;  %v694_v61 = vld [vmem:[%s12472_s4 + $0xb0] sm:$0xff]  ;;  %v724_v36 = vld [vmem:[%s12472_s4 + $0x1a0] sm:$0xff] }
  0x2a   :  { %6186 = vmatpush1.bf16.msra.mxu1 %v6185_v20  ;;  %572 = vmatprep.mubr.f32.mxu1 %v12482_v3  ;;  %v674_v20 = vld [vmem:[%s12472_s4 + $0x10] sm:$0xff]  ;;  %v8539_v0 = vpack.c.bf16 %v694_v61, %v690_v60  ;;  %v8625_v60 = vpack.c.bf16 %v717_v54, %v713_v53  ;;  %v719_v61 = vld [vmem:[%s12472_s4 + $0x178] sm:$0xff]  ;;  %v8674_v48 = vpack.c.bf16 %v724_v36, %v720_v35 }
  0x2b   :  { %6188 = vmatprep.subr.bf16.mxu1 %v8277_v23  ;;  %6055 = vmatmul.mubr.msk.f32.gmra.mrb[10].mxu0 %vm87_vm0, %v46_v4  ;;  %v507_v4 = vld [vmem:[%s12469_s3 + $0x1f8] sm:$0xff]  ;;  %v8467_v25 = vpack.c.bf16 %v678_v24, %v674_v20  ;;  %v705_v24 = vld [vmem:[%s12472_s4 + $0x108] sm:$0xff]  ;;  %v722_v53 = vld [vmem:[%s12472_s4 + $0x190] sm:$0xff] }
  0x2c   :  { %212 = vmatprep.mubr.f32.mxu0 %v12482_v3  ;;  %v8421_v6 = vpack.c.bf16 %v507_v4, %v503_v2  ;;  %v701_v2 = vld [vmem:[%s12472_s4 + $0xe8] sm:$0xff]  ;;  %v699_v4 = vld [vmem:[%s12472_s4 + $0xd8] sm:$0xff]  ;;  %12670 = vst [vmem:[#allocation7_spill] sm:$0xff] %v8674_v48  ;;  %v726_v54 = vld [vmem:[%s12472_s4 + $0x1b0] sm:$0xff] }
  0x2d   :  { %573 = vmatmul.mubr.f32.vlgmr.msra.gmra.mrb[16].mxu1 %v8298_v29  ;;  %v8553_v7 = vpack.c.bf16 %v701_v2, %v697_v1  ;;  %v8564_v12 = vpack.c.bf16 %v703_v8, %v699_v4  ;;  %v712_v1 = vld [vmem:[%s12472_s4 + $0x140] sm:$0xff]  ;;  %v8636_v4 = vpack.c.bf16 %v719_v61, %v715_v55  ;;  %v8683_v55 = vpack.c.bf16 %v726_v54, %v722_v53  ;;  %v729_v61 = vld [vmem:[%s12472_s4 + $0x1c8] sm:$0xff]  ;;  %v730_v35 = vld [vmem:[%s12472_s4 + $0x1d0] sm:$0xff] }
  0x2e   :  { %6190 = vmatpush1.bf16.msra.mxu1 %v8300_v30  ;;  %643 = vmatprep.mubr.f32.mxu1 %v12482_v3  ;;  %v716_v2 = vld [vmem:[%s12472_s4 + $0x160] sm:$0xff]  ;;  %v734_v36 = vld [vmem:[%s12472_s4 + $0x1f0] sm:$0xff]  ;;  %v377_v54 = vld [vmem:[%s12473_s5 + $0x8] sm:$0xff] }
  0x2f   :  { %6192 = vmatprep.subr.bf16.mxu1 %v8303_v31  ;;  %6056 = vmatmul.mubr.msk.f32.gmra.mrb[12].mxu0 %vm87_vm0, %v47_v11  ;;  %v677_v11 = vld [vmem:[%s12472_s4 + $0x28] sm:$0xff]  ;;  %v8638_v8 = vpack.c.bf16 %v716_v2, %v712_v1  ;;  %12671 = vst [vmem:[#allocation8_spill] sm:$0xff] %v8683_v55  ;;  %v731_v2 = vld [vmem:[%s12472_s4 + $0x1d8] sm:$0xff]  ;;  %v8719_v53 = vpack.c.bf16 %v734_v36, %v730_v35 }
  0x30   :  { %218 = vmatprep.mubr.f32.mxu0 %v12482_v3  ;;  %v8445_v13 = vpack.c.bf16 %v677_v11, %v673_v10  ;;  %v696_v10 = vld [vmem:[%s12472_s4 + $0xc0] sm:$0xff]  ;;  %v733_v1 = vld [vmem:[%s12472_s4 + $0x1e8] sm:$0xff] }
  0x31   :  { %v700_v11 = vld [vmem:[%s12472_s4 + $0xe0] sm:$0xff]  ;;  %12675 = vst [vmem:[#allocation12_spill] sm:$0xff] %v8719_v53 }
  0x32   :  { %6194 = vmatpush1.bf16.msra.mxu1 %v8321_v37  ;;  %6220 = vmatprep.subr.bf16.mxu0 %v8445_v13  ;;  %v8566_v14 = vpack.c.bf16 %v700_v11, %v696_v10  ;;  %v714_v10 = vld [vmem:[%s12472_s4 + $0x150] sm:$0xff] }
  0x33   :  { %6196 = vmatprep.subr.bf16.mxu1 %v8325_v38  ;;  %6057 = vmatmul.mubr.msk.f32.gmra.mrb[14].mxu0 %vm87_vm0, %v48_v19  ;;  %v8458_v19 = vpack.c.bf16 %v676_v17, %v672_v16  ;;  %v698_v16 = vld [vmem:[%s12472_s4 + $0xd0] sm:$0xff] }
  0x34   :  { %800 = vmatprep.mubr.f32.mxu0 %v12482_v3  ;;  %v702_v17 = vld [vmem:[%s12472_s4 + $0xf0] sm:$0xff] }
  0x35   :  { %6222 = vmatpush1.bf16.msra.mxu0 %v8458_v19  ;;  %v8575_v20 = vpack.c.bf16 %v702_v17, %v698_v16  ;;  %v718_v11 = vld [vmem:[%s12472_s4 + $0x170] sm:$0xff]  ;;  %v721_v17 = vld [vmem:[%s12472_s4 + $0x188] sm:$0xff] }
  0x36   :  { %6198 = vmatpush1.bf16.msra.mxu1 %v8342_v44  ;;  %6224 = vmatprep.subr.bf16.mxu0 %v8481_v33  ;;  %v8647_v16 = vpack.c.bf16 %v718_v11, %v714_v10  ;;  %v8697_v10 = vpack.c.bf16 %v733_v1, %v729_v61  ;;  %v735_v11 = vld [vmem:[%s12472_s4 + $0x1f8] sm:$0xff]  ;;  %v381_v61 = vld [vmem:[%s12473_s5 + $0x28] sm:$0xff] }
  0x37   :  { %6200 = vmatprep.subr.bf16.mxu1 %v8345_v45  ;;  %v379_v1 = vld [vmem:[%s12473_s5 + $0x18] sm:$0xff] }
  0x38   :  { %12667 = vst [vmem:[#allocation4_spill] sm:$0xff] %v8647_v16  ;;  %12672 = vst [vmem:[#allocation9_spill] sm:$0xff] %v8697_v10 }
  0x39   :  { %6226 = vmatpush1.bf16.msra.mxu0 %v8494_v40 }
  0x3a   :  { %6202 = vmatpush1.bf16.msra.mxu1 %v8362_v50  ;;  %6228 = vmatprep.subr.bf16.mxu0 %v8517_v52 }
  0x3b   :  { %6204 = vmatprep.subr.bf16.mxu1 %v8365_v51 }
  0x3d   :  { %6230 = vmatpush1.bf16.msra.mxu0 %v8530_v59 }
  0x3e   :  { %6206 = vmatpush1.bf16.msra.mxu1 %v8382_v56  ;;  %6232 = vmatprep.subr.bf16.mxu0 %v8553_v7 }
  0x3f   :  { %6208 = vmatprep.subr.bf16.mxu1 %v8385_v57 }
  0x41   :  { %6234 = vmatpush1.bf16.msra.mxu0 %v8566_v14 }
  0x42   :  { %6210 = vmatpush1.bf16.msra.mxu1 %v8400_v62 }
  0x43   :  { %6212 = vmatprep.subr.bf16.mxu1 %v8403_v63 }
  0x46   :  { %6214 = vmatpush1.bf16.msra.mxu1 %v8418_v5 }
  0x47   :  { %6216 = vmatprep.subr.bf16.mxu1 %v8421_v6 }
  0x4a   :  { %6218 = vmatpush1.bf16.msra.mxu1 %v8430_v9 }
  0x4b   :  { %6252 = vmatprep.subr.bf16.mxu1 %v8456_v18 }
  0x4d   :  { %644 = vmatmul.mubr.f32.vlgmr.msra.gmra.mrb[0].mxu1 %v8298_v29  ;;  %v683_v29 = vld [vmem:[%s12472_s4 + $0x58] sm:$0xff] }
  0x4e   :  { %871 = vmatprep.mubr.f32.mxu1 %v12482_v3  ;;  %6254 = vmatpush1.bf16.msra.mxu1 %v8467_v25  ;;  %v8492_v39 = vpack.c.bf16 %v687_v34, %v683_v29  ;;  %v8589_v29 = vpack.c.bf16 %v709_v26, %v705_v24  ;;  %v711_v34 = vld [vmem:[%s12472_s4 + $0x138] sm:$0xff]  ;;  %v725_v24 = vld [vmem:[%s12472_s4 + $0x1a8] sm:$0xff] }
  0x4f   :  { %v8600_v41 = vpack.c.bf16 %v711_v34, %v707_v27  ;;  %v723_v26 = vld [vmem:[%s12472_s4 + $0x198] sm:$0xff]  ;;  %v8661_v27 = vpack.c.bf16 %v725_v24, %v721_v17  ;;  %v728_v17 = vld [vmem:[%s12472_s4 + $0x1c0] sm:$0xff] }
  0x50   :  { %6256 = vmatprep.subr.bf16.mxu1 %v8492_v39  ;;  %6236 = vmatprep.subr.bf16.mxu0 %v8589_v29  ;;  %v727_v34 = vld [vmem:[%s12472_s4 + $0x1b8] sm:$0xff]  ;;  %v732_v24 = vld [vmem:[%s12472_s4 + $0x1e0] sm:$0xff] }
  0x51   :  { %6238 = vmatpush1.bf16.msra.mxu0 %v8602_v43  ;;  %12668 = vst [vmem:[#allocation5_spill] sm:$0xff] %v8661_v27  ;;  %v8672_v47 = vpack.c.bf16 %v727_v34, %v723_v26  ;;  %v8708_v26 = vpack.c.bf16 %v735_v11, %v731_v2  ;;  %v8710_v34 = vpack.c.bf16 %v732_v24, %v728_v17  ;;  %v383_v11 = vld [vmem:[%s12473_s5 + $0x38] sm:$0xff]  ;;  %v67_v24 = vlaneseq }
  0x52   :  { %6258 = vmatpush1.bf16.msra.mxu1 %v8503_v46  ;;  %6240 = vmatprep.subr.bf16.mxu0 %v8625_v60  ;;  %v8733_v2 = vpack.c.bf16 %v381_v61, %v377_v54  ;;  %v8738_v17 = vpack.c.bf16 %v383_v11, %v379_v1  ;;  %v65_v54 = vld [vmem:[%s12474_s2] sm:$0xf] }
  0x53   :  { %6260 = vmatprep.subr.bf16.mxu1 %v8528_v58  ;;  %12669 = vst [vmem:[#allocation6_spill] sm:$0xff] %v8672_v47  ;;  %12673 = vst [vmem:[#allocation10_spill] sm:$0xff] %v8708_v26  ;;  %v68_v3 = vshrl.u32 %v67_v24, 7 }
  0x54   :  { %12674 = vst [vmem:[#allocation11_spill] sm:$0xff] %v8710_v34  ;;  %12676 = vst [vmem:[#allocation13_spill] sm:$0xff] %v8733_v2 }
  0x55   :  { %6242 = vmatpush1.bf16.msra.mxu0 %v8638_v8  ;;  %12677 = vst [vmem:[#allocation14_spill] sm:$0xff] %v8738_v17  ;;  %v8747_v61 = vsub.s32 1, %v68_v3 }
  0x56   :  { %6262 = vmatpush1.bf16.msra.mxu1 %v8539_v0  ;;  %6244 = vmatprep.subr.bf16.mxu0 %v8661_v27  ;;  %v8759_v27 = vsub.s32 3, %v68_v3 }
  0x57   :  { %6264 = vmatprep.subr.bf16.mxu1 %v8564_v12  ;;  %12679 = vst [vmem:[#allocation16_spill] sm:$0xff] %v8747_v61  ;;  %v8753_v1 = vrot.slane %v65_v54, %v8747_v61 }
  0x58   :  { %12683 = vst [vmem:[#allocation20_spill] sm:$0xff] %v8759_v27  ;;  %v8765_v61 = vrot.slane %v65_v54, %v8759_v27 }
  0x59   :  { %6246 = vmatpush1.bf16.msra.mxu0 %v8674_v48  ;;  %12681 = vst [vmem:[#allocation18_spill] sm:$0xff] %v8753_v1 }
  0x5a   :  { %6266 = vmatpush1.bf16.msra.mxu1 %v8575_v20  ;;  %6248 = vmatprep.subr.bf16.mxu0 %v8697_v10  ;;  %12685 = vst [vmem:[#allocation22_spill] sm:$0xff] %v8765_v61 }
  0x5b   :  { %6268 = vmatprep.subr.bf16.mxu1 %v8600_v41 }
  0x5d   :  { %6250 = vmatpush1.bf16.msra.mxu0 %v8710_v34  ;;  %v8742_v34 = vsub.s32 0, %v68_v3 }
  0x5e   :  { %6270 = vmatpush1.bf16.msra.mxu1 %v8611_v49  ;;  %6284 = vmatprep.subr.bf16.mxu0 %v8733_v2 }
  0x5f   :  { %6272 = vmatprep.subr.bf16.mxu1 %v8636_v4  ;;  %12678 = vst [vmem:[#allocation15_spill] sm:$0xff] %v8742_v34 }
  0x62   :  { %6274 = vmatpush1.bf16.msra.mxu1 %v8647_v16 }
  0x63   :  { %6276 = vmatprep.subr.bf16.mxu1 %v8672_v47  ;;  %v8757_v47 = vsub.s32 2, %v68_v3 }
  0x65   :  { %12682 = vst [vmem:[#allocation19_spill] sm:$0xff] %v8757_v47 }
  0x66   :  { %6278 = vmatpush1.bf16.msra.mxu1 %v8683_v55 }
  0x67   :  { %6280 = vmatprep.subr.bf16.mxu1 %v8708_v26 }
  0x6a   :  { %6282 = vmatpush1.bf16.msra.mxu1 %v8719_v53  ;;  %v8750_v53 = vrot.slane %v65_v54, %v8742_v34  ;;  %v8762_v34 = vrot.slane %v65_v54, %v8757_v47 }
  0x6b   :  { %6316 = vmatprep.subr.bf16.mxu1 %v8738_v17 }
  0x6c   :  { %12680 = vst [vmem:[#allocation17_spill] sm:$0xff] %v8750_v53  ;;  %12684 = vst [vmem:[#allocation21_spill] sm:$0xff] %v8762_v34 }
  0xea   :  { %v178_v35 = vpop.f32.mrb[0].mxu0 }
  0xeb   :  { %v180_v36 = vpop.f32.mrb[1].mxu0  ;;  %v179_v11 = vadd.f32 %v178_v35, %v8750_v53 }
  0xec   :  { %v181_v17 = vadd.f32 %v180_v36, %v8753_v1 }
 0x100   :  { %v574_v2 = vpop.f32.mrb[16].mxu1 }
 0x101   :  { %v650_v24 = vadd.f32 %v574_v2, %v179_v11  ;;  %v576_v26 = vpop.f32.mrb[17].mxu1 }
 0x102   :  { %v651_v10 = vadd.f32 %v576_v26, %v181_v17 }
 0x103   :  { %v654_v48 = vmul.f32 0.5, %v650_v24 }
 0x104   :  { %v658_v55 = vmul.f32 0.5, %v651_v10 }
 0x106   :  { %7820 = vtanh.f32 %v658_v55 }
 0x107   :  { %7822 = vtanh.f32 %v654_v48  ;;  %v371_v48 = vld [vmem:[%s12475_s10] sm:$0xff] }
 0x110   :  { %v7821_v10 = vpop.eup %7820 }
 0x111   :  { %v7823_v55 = vpop.eup %7822  ;;  %v660_v17 = vadd.f32 1.0, %v7821_v10  ;;  %v380_v10 = vld [vmem:[%s12473_s5 + $0x20] sm:$0xff] }
 0x112   :  { %v656_v3 = vadd.f32 1.0, %v7823_v55  ;;  %v378_v55 = vld [vmem:[%s12473_s5 + $0x10] sm:$0xff] }
 0x113   :  { %v661_v24 = vmul.f32 0.5, %v660_v17  ;;  %v387_v17 = vld [vmem:[%s12473_s5 + $0x58] sm:$0xff] }
 0x114   :  { %v657_v54 = vmul.f32 0.5, %v656_v3 }
 0x115   :  { %v667_v1 = vmul.f32 %v661_v24, %v371_v48 }
 0x120   :  { %v645_v35 = vpop.f32.mrb[0].mxu1 }
 0x121   :  { %v7741_v36 = vadd.f32 %v645_v35, %v8762_v34  ;;  %v647_v2 = vpop.f32.mrb[1].mxu1 }
 0x122   :  { %v7742_v26 = vadd.f32 %v647_v2, %v8765_v61 }
 0x123   :  { %7824 = vtanh.f32 %v7741_v36 }
 0x124   :  { %v663_v11 = vmul.f32 0.5, %v7742_v26  ;;  %v376_v26 = vld [vmem:[%s12473_s5] sm:$0xff] }
 0x125   :  { %v8799_v48 = vpack.c.bf16 %v380_v10, %v376_v26  ;;  %v390_v26 = vld [vmem:[%s12473_s5 + $0x70] sm:$0xff]  ;;  %v393_v10 = vld [vmem:[%s12473_s5 + $0x88] sm:$0xff] }
 0x126   :  { %7826 = vtanh.f32 %v663_v11  ;;  %v391_v11 = vld [vmem:[%s12473_s5 + $0x78] sm:$0xff] }
 0x127   :  { %12687 = vst [vmem:[#allocation24_spill] sm:$0xff] %v8799_v48  ;;  %v8813_v47 = vpack.c.bf16 %v391_v11, %v387_v17  ;;  %v392_v11 = vld [vmem:[%s12473_s5 + $0x80] sm:$0xff] }
 0x129   :  { %12690 = vst [vmem:[#allocation27_spill] sm:$0xff] %v8813_v47 }
 0x12d   :  { %v7825_v27 = vpop.eup %7824 }
 0x12e   :  { %v668_v53 = vmul.f32 %v7825_v27, %v657_v54  ;;  %v382_v27 = vld [vmem:[%s12473_s5 + $0x30] sm:$0xff] }
 0x12f   :  { %v8801_v54 = vpack.c.bf16 %v382_v27, %v378_v55  ;;  %v397_v55 = vld [vmem:[%s12473_s5 + $0xa8] sm:$0xff]  ;;  %v395_v27 = vld [vmem:[%s12473_s5 + $0x98] sm:$0xff] }
 0x130   :  { %v8772_v35 = vadd.f32 %v668_v53, %v667_v1  ;;  %v7827_v2 = vpop.eup %7826  ;;  %v385_v53 = vld [vmem:[%s12473_s5 + $0x48] sm:$0xff] }
 0x131   :  { %v665_v36 = vadd.f32 1.0, %v7827_v2  ;;  %v389_v1 = vld [vmem:[%s12473_s5 + $0x68] sm:$0xff]  ;;  %12688 = vst [vmem:[#allocation25_spill] sm:$0xff] %v8801_v54  ;;  %v384_v2 = vld [vmem:[%s12473_s5 + $0x40] sm:$0xff] }
 0x132   :  { %12686 = vst [vmem:[#allocation23_spill] sm:$0xff] %v8772_v35  ;;  %7828 = vtanh.f32 %v8772_v35  ;;  %v388_v35 = vld [vmem:[%s12473_s5 + $0x60] sm:$0xff]  ;;  %v8811_v34 = vpack.c.bf16 %v389_v1, %v385_v53  ;;  %v399_v53 = vld [vmem:[%s12473_s5 + $0xb8] sm:$0xff] }
 0x133   :  { %v666_v3 = vmul.f32 0.5, %v665_v36  ;;  %v386_v36 = vld [vmem:[%s12473_s5 + $0x50] sm:$0xff]  ;;  %v8837_v1 = vpack.c.bf16 %v388_v35, %v384_v2 }
 0x134   :  { %12689 = vst [vmem:[#allocation26_spill] sm:$0xff] %v8811_v34  ;;  %v8839_v17 = vpack.c.bf16 %v390_v26, %v386_v36  ;;  %v394_v35 = vld [vmem:[%s12473_s5 + $0x90] sm:$0xff]  ;;  %v401_v36 = vld [vmem:[%s12473_s5 + $0xc8] sm:$0xff] }
 0x135   :  { %12691 = vst [vmem:[#allocation28_spill] sm:$0xff] %v8837_v1  ;;  %v398_v2 = vld [vmem:[%s12473_s5 + $0xb0] sm:$0xff]  ;;  %v405_v26 = vld [vmem:[%s12473_s5 + $0xe8] sm:$0xff] }
 0x136   :  { %12692 = vst [vmem:[#allocation29_spill] sm:$0xff] %v8839_v17  ;;  %v8887_v16 = vpack.c.bf16 %v405_v26, %v401_v36  ;;  %v411_v36 = vld [vmem:[%s12473_s5 + $0x118] sm:$0xff] }
 0x137   :  { %v415_v26 = vld [vmem:[%s12473_s5 + $0x138] sm:$0xff] }
 0x138   :  { %12698 = vst [vmem:[#allocation34_spill] sm:$0xff] %v8887_v16 }
 0x13c   :  { %v7829_v24 = vpop.eup %7828 }
 0x13d   :  { %v8809_v61 = vmul.f32 %v7829_v24, %v666_v3  ;;  %v396_v3 = vld [vmem:[%s12473_s5 + $0xa0] sm:$0xff]  ;;  %v8849_v24 = vpack.c.bf16 %v397_v55, %v393_v10  ;;  %v403_v10 = vld [vmem:[%s12473_s5 + $0xd8] sm:$0xff] }
 0x13e   :  { %v407_v55 = vld [vmem:[%s12473_s5 + $0xf8] sm:$0xff] }
 0x13f   :  { %801 = vmatmul.mubr.f32.vlgmr.msra.gmra.mrb[16].mxu0 %v8809_v61  ;;  %872 = vmatmul.mubr.f32.vlgmr.msra.gmra.mrb[18].mxu1 %v8809_v61  ;;  %12693 = vst [vmem:[#allocation30_spill] sm:$0xff] %v8849_v24 }
 0x140   :  { %6286 = vmatpush1.bf16.msra.mxu0 %v8799_v48  ;;  %6318 = vmatpush1.bf16.msra.mxu1 %v8801_v54  ;;  %v8851_v48 = vpack.c.bf16 %v399_v53, %v395_v27  ;;  %v12695_v27 = vmov 0.0   ;;  %v8875_v53 = vpack.c.bf16 %v396_v3, %v392_v11  ;;  %v404_v54 = vld [vmem:[%s12473_s5 + $0xe0] sm:$0xff]  ;;  %v402_v11 = vld [vmem:[%s12473_s5 + $0xd0] sm:$0xff] }
 0x141   :  { %6288 = vmatprep.subr.bf16.mxu0 %v8811_v34  ;;  %6320 = vmatprep.subr.bf16.mxu1 %v8813_v47  ;;  %v8877_v47 = vpack.c.bf16 %v398_v2, %v394_v35  ;;  %v400_v34 = vld [vmem:[%s12473_s5 + $0xc0] sm:$0xff]  ;;  %v406_v3 = vld [vmem:[%s12473_s5 + $0xf0] sm:$0xff]  ;;  %v409_v35 = vld [vmem:[%s12473_s5 + $0x108] sm:$0xff] }
 0x142   :  { %12694 = vst [vmem:[#allocation31_spill] sm:$0xff] %v8851_v48  ;;  %942 = vmatprep.mubr.f32.mxu0 %v12695_v27  ;;  %1013 = vmatprep.mubr.f32.mxu1 %v12695_v27  ;;  %12696 = vst [vmem:[#allocation32_spill] sm:$0xff] %v8875_v53  ;;  %v413_v2 = vld [vmem:[%s12473_s5 + $0x128] sm:$0xff] }
 0x143   :  { %12697 = vst [vmem:[#allocation33_spill] sm:$0xff] %v8877_v47 }
 0x144   :  { %6290 = vmatpush1.bf16.msra.mxu0 %v8837_v1  ;;  %6322 = vmatpush1.bf16.msra.mxu1 %v8839_v17  ;;  %v8889_v1 = vpack.c.bf16 %v407_v55, %v403_v10  ;;  %v8911_v10 = vpack.c.bf16 %v404_v54, %v400_v34  ;;  %v8913_v55 = vpack.c.bf16 %v406_v3, %v402_v11  ;;  %v410_v34 = vld [vmem:[%s12473_s5 + $0x110] sm:$0xff]  ;;  %v417_v11 = vld [vmem:[%s12473_s5 + $0x148] sm:$0xff] }
 0x145   :  { %6292 = vmatprep.subr.bf16.mxu0 %v8849_v24  ;;  %6324 = vmatprep.subr.bf16.mxu1 %v8851_v48  ;;  %v408_v48 = vld [vmem:[%s12473_s5 + $0x100] sm:$0xff]  ;;  %v8923_v17 = vpack.c.bf16 %v413_v2, %v409_v35  ;;  %v414_v54 = vld [vmem:[%s12473_s5 + $0x130] sm:$0xff]  ;;  %v421_v3 = vld [vmem:[%s12473_s5 + $0x168] sm:$0xff] }
 0x146   :  { %12699 = vst [vmem:[#allocation35_spill] sm:$0xff] %v8889_v1  ;;  %12700 = vst [vmem:[#allocation36_spill] sm:$0xff] %v8911_v10  ;;  %v412_v24 = vld [vmem:[%s12473_s5 + $0x120] sm:$0xff]  ;;  %v419_v35 = vld [vmem:[%s12473_s5 + $0x158] sm:$0xff] }
 0x147   :  { %12701 = vst [vmem:[#allocation37_spill] sm:$0xff] %v8913_v55  ;;  %12702 = vst [vmem:[#allocation38_spill] sm:$0xff] %v8923_v17  ;;  %v423_v2 = vld [vmem:[%s12473_s5 + $0x178] sm:$0xff] }
 0x148   :  { %6294 = vmatpush1.bf16.msra.mxu0 %v8875_v53  ;;  %6326 = vmatpush1.bf16.msra.mxu1 %v8877_v47  ;;  %v8925_v53 = vpack.c.bf16 %v415_v26, %v411_v36  ;;  %v8947_v36 = vpack.c.bf16 %v412_v24, %v408_v48  ;;  %v8949_v26 = vpack.c.bf16 %v414_v54, %v410_v34  ;;  %v418_v48 = vld [vmem:[%s12473_s5 + $0x150] sm:$0xff]  ;;  %v425_v34 = vld [vmem:[%s12473_s5 + $0x188] sm:$0xff] }
 0x149   :  { %6296 = vmatprep.subr.bf16.mxu0 %v8887_v16  ;;  %6328 = vmatprep.subr.bf16.mxu1 %v8889_v1  ;;  %v416_v1 = vld [vmem:[%s12473_s5 + $0x140] sm:$0xff]  ;;  %v8959_v47 = vpack.c.bf16 %v421_v3, %v417_v11  ;;  %v422_v24 = vld [vmem:[%s12473_s5 + $0x170] sm:$0xff]  ;;  %v429_v54 = vld [vmem:[%s12473_s5 + $0x1a8] sm:$0xff] }
 0x14a   :  { %12703 = vst [vmem:[#allocation39_spill] sm:$0xff] %v8925_v53  ;;  %12704 = vst [vmem:[#allocation40_spill] sm:$0xff] %v8947_v36  ;;  %v420_v16 = vld [vmem:[%s12473_s5 + $0x160] sm:$0xff]  ;;  %v427_v11 = vld [vmem:[%s12473_s5 + $0x198] sm:$0xff] }
 0x14b   :  { %12705 = vst [vmem:[#allocation41_spill] sm:$0xff] %v8949_v26  ;;  %12706 = vst [vmem:[#allocation42_spill] sm:$0xff] %v8959_v47  ;;  %v431_v3 = vld [vmem:[%s12473_s5 + $0x1b8] sm:$0xff] }
 0x14c   :  { %6298 = vmatpush1.bf16.msra.mxu0 %v8911_v10  ;;  %6330 = vmatpush1.bf16.msra.mxu1 %v8913_v55  ;;  %v8961_v10 = vpack.c.bf16 %v423_v2, %v419_v35  ;;  %v8983_v35 = vpack.c.bf16 %v420_v16, %v416_v1  ;;  %v8985_v2 = vpack.c.bf16 %v422_v24, %v418_v48  ;;  %v426_v16 = vld [vmem:[%s12473_s5 + $0x190] sm:$0xff]  ;;  %v433_v48 = vld [vmem:[%s12473_s5 + $0x1c8] sm:$0xff] }
 0x14d   :  { %6300 = vmatprep.subr.bf16.mxu0 %v8923_v17  ;;  %6332 = vmatprep.subr.bf16.mxu1 %v8925_v53  ;;  %v424_v53 = vld [vmem:[%s12473_s5 + $0x180] sm:$0xff]  ;;  %v8995_v55 = vpack.c.bf16 %v429_v54, %v425_v34  ;;  %v430_v1 = vld [vmem:[%s12473_s5 + $0x1b0] sm:$0xff]  ;;  %v437_v24 = vld [vmem:[%s12473_s5 + $0x1e8] sm:$0xff] }
 0x14e   :  { %12707 = vst [vmem:[#allocation43_spill] sm:$0xff] %v8961_v10  ;;  %12708 = vst [vmem:[#allocation44_spill] sm:$0xff] %v8985_v2  ;;  %v428_v17 = vld [vmem:[%s12473_s5 + $0x1a0] sm:$0xff]  ;;  %v435_v34 = vld [vmem:[%s12473_s5 + $0x1d8] sm:$0xff] }
 0x14f   :  { %v439_v54 = vld [vmem:[%s12473_s5 + $0x1f8] sm:$0xff] }
 0x150   :  { %6302 = vmatpush1.bf16.msra.mxu0 %v8947_v36  ;;  %6334 = vmatpush1.bf16.msra.mxu1 %v8949_v26  ;;  %v8997_v36 = vpack.c.bf16 %v431_v3, %v427_v11  ;;  %v9019_v11 = vpack.c.bf16 %v428_v17, %v424_v53  ;;  %v9021_v3 = vpack.c.bf16 %v430_v1, %v426_v16  ;;  %v434_v17 = vld [vmem:[%s12473_s5 + $0x1d0] sm:$0xff] }
 0x151   :  { %6304 = vmatprep.subr.bf16.mxu0 %v8959_v47  ;;  %6336 = vmatprep.subr.bf16.mxu1 %v8961_v10  ;;  %v432_v10 = vld [vmem:[%s12473_s5 + $0x1c0] sm:$0xff]  ;;  %v9028_v47 = vpack.c.bf16 %v437_v24, %v433_v48  ;;  %v9030_v26 = vpack.c.bf16 %v439_v54, %v435_v34  ;;  %v438_v53 = vld [vmem:[%s12473_s5 + $0x1f0] sm:$0xff]  ;;  %v6066_v48 = vld [vmem:[%s12471_s9 + $0x8] sm:$0xff] }
 0x152   :  { %v9045_v1 = vpack.c.bf16 %v438_v53, %v434_v17  ;;  %v1173_v24 = vld [vmem:[%s12469_s3 + $0x140] sm:$0xff]  ;;  %v1186_v54 = vld [vmem:[%s12469_s3 + $0x1a8] sm:$0xff] }
 0x153   :  { %v1177_v34 = vld [vmem:[%s12469_s3 + $0x160] sm:$0xff] }
 0x154   :  { %6306 = vmatpush1.bf16.msra.mxu0 %v8983_v35  ;;  %6338 = vmatpush1.bf16.msra.mxu1 %v8985_v2  ;;  %v436_v2 = vld [vmem:[%s12473_s5 + $0x1e0] sm:$0xff] }
 0x155   :  { %6308 = vmatprep.subr.bf16.mxu0 %v8995_v55  ;;  %6340 = vmatprep.subr.bf16.mxu1 %v8997_v36  ;;  %v9043_v16 = vpack.c.bf16 %v436_v2, %v432_v10  ;;  %v1158_v10 = vld [vmem:[%s12469_s3 + $0xc8] sm:$0xff]  ;;  %v1181_v53 = vld [vmem:[%s12469_s3 + $0x180] sm:$0xff] }
 0x158   :  { %6310 = vmatpush1.bf16.msra.mxu0 %v9019_v11  ;;  %6342 = vmatpush1.bf16.msra.mxu1 %v9021_v3 }
 0x159   :  { %6312 = vmatprep.subr.bf16.mxu0 %v9028_v47  ;;  %6344 = vmatprep.subr.bf16.mxu1 %v9030_v26 }
 0x15c   :  { %6314 = vmatpush1.bf16.msra.mxu0 %v9043_v16  ;;  %6346 = vmatpush1.bf16.msra.mxu1 %v9045_v1 }
 0x15d   :  { %6348 = vmatprep.subr.bf16.mxu0 %v8083_v15  ;;  %6380 = vmatprep.subr.bf16.mxu1 %v8277_v23  ;;  %v1162_v15 = vld [vmem:[%s12469_s3 + $0xe8] sm:$0xff]  ;;  %v1161_v23 = vld [vmem:[%s12469_s3 + $0xe0] sm:$0xff] }
 0x15f   :  { %943 = vmatmul.mubr.f32.vlgmr.msra.gmra.mrb[16].mxu0 %v6066_v48  ;;  %1014 = vmatmul.mubr.f32.vlgmr.msra.gmra.mrb[18].mxu1 %v6066_v48  ;;  %v1185_v48 = vld [vmem:[%s12469_s3 + $0x1a0] sm:$0xff] }
 0x160   :  { %6350 = vmatpush1.bf16.msra.mxu0 %v8102_v21  ;;  %6382 = vmatpush1.bf16.msra.mxu1 %v8300_v30  ;;  %v9072_v21 = vpack.c.bf16 %v1162_v15, %v1158_v10  ;;  %v1194_v10 = vld [vmem:[%s12469_s3 + $0x1e8] sm:$0xff] }
 0x161   :  { %6352 = vmatprep.subr.bf16.mxu0 %v8105_v22  ;;  %6384 = vmatprep.subr.bf16.mxu1 %v8303_v31  ;;  %v1157_v22 = vld [vmem:[%s12469_s3 + $0xc0] sm:$0xff] }
 0x162   :  { %1261 = vmatprep.mubr.f32.mxu0 %v12695_v27  ;;  %1332 = vmatprep.mubr.f32.mxu1 %v12695_v27  ;;  %v9088_v30 = vpack.c.bf16 %v1161_v23, %v1157_v22  ;;  %v1189_v22 = vld [vmem:[%s12469_s3 + $0x1c0] sm:$0xff] }
 0x163   :  { %v1193_v23 = vld [vmem:[%s12469_s3 + $0x1e0] sm:$0xff] }
 0x164   :  { %6354 = vmatpush1.bf16.msra.mxu0 %v8128_v28  ;;  %6386 = vmatpush1.bf16.msra.mxu1 %v8321_v37  ;;  %v1166_v28 = vld [vmem:[%s12469_s3 + $0x108] sm:$0xff]  ;;  %v1165_v37 = vld [vmem:[%s12469_s3 + $0x100] sm:$0xff] }
 0x165   :  { %6356 = vmatprep.subr.bf16.mxu0 %v8140_v32  ;;  %6388 = vmatprep.subr.bf16.mxu1 %v8325_v38  ;;  %v1170_v32 = vld [vmem:[%s12469_s3 + $0x128] sm:$0xff]  ;;  %v1169_v38 = vld [vmem:[%s12469_s3 + $0x120] sm:$0xff] }
 0x166   :  { %v9092_v31 = vpack.c.bf16 %v1170_v32, %v1166_v28 }
 0x168   :  { %6358 = vmatpush1.bf16.msra.mxu0 %v8169_v42  ;;  %6390 = vmatpush1.bf16.msra.mxu1 %v8342_v44  ;;  %v1174_v42 = vld [vmem:[%s12469_s3 + $0x148] sm:$0xff] }
 0x169   :  { %6360 = vmatprep.subr.bf16.mxu0 %v9072_v21  ;;  %6392 = vmatprep.subr.bf16.mxu1 %v8345_v45  ;;  %v1178_v44 = vld [vmem:[%s12469_s3 + $0x168] sm:$0xff]  ;;  %v9108_v45 = vpack.c.bf16 %v1169_v38, %v1165_v37 }
 0x16a   :  { %v9112_v2 = vpack.c.bf16 %v1178_v44, %v1174_v42  ;;  %v6067_v42 = vld [vmem:[%s12475_s10 + $0x8] sm:$0xff] }
 0x16c   :  { %6362 = vmatpush1.bf16.msra.mxu0 %v9088_v30  ;;  %6394 = vmatpush1.bf16.msra.mxu1 %v8362_v50  ;;  %v1182_v50 = vld [vmem:[%s12469_s3 + $0x188] sm:$0xff] }
 0x16d   :  { %6364 = vmatprep.subr.bf16.mxu0 %v9092_v31  ;;  %6396 = vmatprep.subr.bf16.mxu1 %v8365_v51  ;;  %v9128_v51 = vpack.c.bf16 %v1177_v34, %v1173_v24  ;;  %v9132_v17 = vpack.c.bf16 %v1186_v54, %v1182_v50 }
 0x170   :  { %6366 = vmatpush1.bf16.msra.mxu0 %v9108_v45  ;;  %6398 = vmatpush1.bf16.msra.mxu1 %v8382_v56  ;;  %v1190_v56 = vld [vmem:[%s12469_s3 + $0x1c8] sm:$0xff] }
 0x171   :  { %6368 = vmatprep.subr.bf16.mxu0 %v9112_v2  ;;  %6400 = vmatprep.subr.bf16.mxu1 %v8385_v57  ;;  %v9148_v57 = vpack.c.bf16 %v1185_v48, %v1181_v53  ;;  %v9152_v15 = vpack.c.bf16 %v1194_v10, %v1190_v56  ;;  %v12723_v56 = vld [vmem:[#allocation17_spill] sm:$0xff] }
 0x174   :  { %6370 = vmatpush1.bf16.msra.mxu0 %v9128_v51  ;;  %6402 = vmatpush1.bf16.msra.mxu1 %v8400_v62  ;;  %v9162_v62 = vpack.c.bf16 %v1193_v23, %v1189_v22 }
 0x175   :  { %6372 = vmatprep.subr.bf16.mxu0 %v9132_v17  ;;  %6404 = vmatprep.subr.bf16.mxu1 %v8403_v63  ;;  %v12709_v63 = vld [vmem:[#allocation4_spill] sm:$0xff] }
 0x178   :  { %6374 = vmatpush1.bf16.msra.mxu0 %v9148_v57  ;;  %6406 = vmatpush1.bf16.msra.mxu1 %v8418_v5  ;;  %v12710_v5 = vld [vmem:[#allocation5_spill] sm:$0xff] }
 0x179   :  { %6376 = vmatprep.subr.bf16.mxu0 %v9152_v15  ;;  %6408 = vmatprep.subr.bf16.mxu1 %v8421_v6  ;;  %v12711_v6 = vld [vmem:[#allocation6_spill] sm:$0xff] }
 0x17c   :  { %6378 = vmatpush1.bf16.msra.mxu0 %v9162_v62  ;;  %6410 = vmatpush1.bf16.msra.mxu1 %v8430_v9  ;;  %v12712_v9 = vld [vmem:[#allocation7_spill] sm:$0xff] }
 0x17d   :  { %6412 = vmatprep.subr.bf16.mxu0 %v8445_v13  ;;  %6444 = vmatprep.subr.bf16.mxu1 %v8456_v18  ;;  %v12713_v13 = vld [vmem:[#allocation8_spill] sm:$0xff]  ;;  %v12714_v18 = vld [vmem:[#allocation9_spill] sm:$0xff] }
 0x17f   :  { %1262 = vmatmul.mubr.f32.vlgmr.msra.gmra.mrb[2].mxu0 %v8809_v61  ;;  %1333 = vmatmul.mubr.f32.vlgmr.msra.gmra.mrb[2].mxu1 %v8809_v61 }
 0x180   :  { %6414 = vmatpush1.bf16.msra.mxu0 %v8458_v19  ;;  %6446 = vmatpush1.bf16.msra.mxu1 %v8467_v25  ;;  %v12715_v19 = vld [vmem:[#allocation10_spill] sm:$0xff]  ;;  %v12716_v25 = vld [vmem:[#allocation11_spill] sm:$0xff] }
 0x181   :  { %6416 = vmatprep.subr.bf16.mxu0 %v8481_v33  ;;  %6448 = vmatprep.subr.bf16.mxu1 %v8492_v39  ;;  %v12717_v33 = vld [vmem:[#allocation12_spill] sm:$0xff]  ;;  %v12718_v39 = vld [vmem:[#allocation13_spill] sm:$0xff] }
 0x182   :  { %1489 = vmatprep.mubr.f32.mxu0 %v12695_v27  ;;  %1560 = vmatprep.mubr.f32.mxu1 %v12695_v27 }
 0x184   :  { %6418 = vmatpush1.bf16.msra.mxu0 %v8494_v40  ;;  %6450 = vmatpush1.bf16.msra.mxu1 %v8503_v46  ;;  %v12719_v40 = vld [vmem:[#allocation14_spill] sm:$0xff]  ;;  %v9209_v46 = vld [vmem:[%s12476_s6] sm:$0xf] }
 0x185   :  { %6420 = vmatprep.subr.bf16.mxu0 %v8517_v52  ;;  %6452 = vmatprep.subr.bf16.mxu1 %v8528_v58  ;;  %v12720_v52 = vld [vmem:[#allocation15_spill] sm:$0xff] }
 0x186   :  { %v1025_v58 = vrot.slane %v9209_v46, %v12720_v52 }
 0x188   :  { %6422 = vmatpush1.bf16.msra.mxu0 %v8530_v59  ;;  %6454 = vmatpush1.bf16.msra.mxu1 %v8539_v0  ;;  %v12721_v59 = vld [vmem:[#allocation16_spill] sm:$0xff] }
 0x189   :  { %6424 = vmatprep.subr.bf16.mxu0 %v8553_v7  ;;  %6456 = vmatprep.subr.bf16.mxu1 %v8564_v12  ;;  %v1029_v0 = vrot.slane %v9209_v46, %v12721_v59 }
 0x18c   :  { %6426 = vmatpush1.bf16.msra.mxu0 %v8566_v14  ;;  %6458 = vmatpush1.bf16.msra.mxu1 %v8575_v20  ;;  %v12722_v20 = vld [vmem:[#allocation19_spill] sm:$0xff] }
 0x18d   :  { %6428 = vmatprep.subr.bf16.mxu0 %v8589_v29  ;;  %6460 = vmatprep.subr.bf16.mxu1 %v8600_v41  ;;  %v1033_v29 = vrot.slane %v9209_v46, %v12722_v20 }
 0x190   :  { %6430 = vmatpush1.bf16.msra.mxu0 %v8602_v43  ;;  %6462 = vmatpush1.bf16.msra.mxu1 %v8611_v49 }
 0x191   :  { %6432 = vmatprep.subr.bf16.mxu0 %v8625_v60  ;;  %6464 = vmatprep.subr.bf16.mxu1 %v8636_v4 }
 0x194   :  { %6434 = vmatpush1.bf16.msra.mxu0 %v8638_v8  ;;  %6466 = vmatpush1.bf16.msra.mxu1 %v12709_v63  ;;  %v12724_v63 = vld [vmem:[#allocation18_spill] sm:$0xff] }
 0x195   :  { %6436 = vmatprep.subr.bf16.mxu0 %v12710_v5  ;;  %6468 = vmatprep.subr.bf16.mxu1 %v12711_v6 }
 0x198   :  { %6438 = vmatpush1.bf16.msra.mxu0 %v12712_v9  ;;  %6470 = vmatpush1.bf16.msra.mxu1 %v12713_v13  ;;  %v12725_v13 = vld [vmem:[#allocation21_spill] sm:$0xff] }
 0x199   :  { %6440 = vmatprep.subr.bf16.mxu0 %v12714_v18  ;;  %6472 = vmatprep.subr.bf16.mxu1 %v12715_v19  ;;  %v12726_v19 = vld [vmem:[#allocation22_spill] sm:$0xff] }
 0x19c   :  { %6442 = vmatpush1.bf16.msra.mxu0 %v12716_v25  ;;  %6474 = vmatpush1.bf16.msra.mxu1 %v12717_v33 }
 0x19d   :  { %6476 = vmatprep.subr.bf16.mxu0 %v12718_v39  ;;  %6508 = vmatprep.subr.bf16.mxu1 %v12719_v40 }
 0x232   :  { %v944_v7 = vpop.f32.mrb[16].mxu0  ;;  %v1015_v12 = vpop.f32.mrb[18].mxu1 }
 0x233   :  { %v1042_v14 = vadd.f32 %v1025_v58, %v944_v7  ;;  %v946_v41 = vpop.f32.mrb[17].mxu0  ;;  %v1017_v43 = vpop.f32.mrb[19].mxu1  ;;  %v1044_v8 = vadd.f32 %v1033_v29, %v1015_v12 }
 0x234   :  { %v1043_v49 = vadd.f32 %v1029_v0, %v946_v41  ;;  %v12727_v41 = vld [vmem:[#allocation23_spill] sm:$0xff] }
 0x235   :  { %v1046_v60 = vmul.f32 0.5, %v1042_v14 }
 0x236   :  { %v1050_v4 = vmul.f32 0.5, %v1043_v49 }
 0x237   :  { %7830 = vtanh.f32 %v1046_v60 }
 0x238   :  { %7832 = vtanh.f32 %v1050_v4 }
 0x239   :  { %7834 = vtanh.f32 %v1044_v8 }
 0x241   :  { %v7831_v61 = vpop.eup %7830 }
 0x242   :  { %v7833_v28 = vpop.eup %7832  ;;  %v1048_v32 = vadd.f32 1.0, %v7831_v61 }
 0x243   :  { %v1052_v37 = vadd.f32 1.0, %v7833_v28  ;;  %v7835_v44 = vpop.eup %7834 }
 0x244   :  { %v1049_v38 = vmul.f32 0.5, %v1048_v32 }
 0x245   :  { %v1053_v24 = vmul.f32 0.5, %v1052_v37  ;;  %v12728_v37 = vld [vmem:[#allocation20_spill] sm:$0xff] }
 0x246   :  { %v1060_v34 = vmul.f32 %v7835_v44, %v1049_v38  ;;  %v1037_v38 = vrot.slane %v9209_v46, %v12728_v37  ;;  %v12730_v44 = vld [vmem:[#allocation25_spill] sm:$0xff] }
 0x247   :  { %v1059_v50 = vmul.f32 %v6067_v42, %v1053_v24  ;;  %v12729_v42 = vld [vmem:[#allocation24_spill] sm:$0xff]  ;;  %v12731_v24 = vld [vmem:[#allocation26_spill] sm:$0xff]  ;;  %v12734_v46 = vld [vmem:[#allocation29_spill] sm:$0xff] }
 0x249   :  { %v9220_v54 = vadd.f32 %v1060_v34, %v1059_v50  ;;  %v12732_v34 = vld [vmem:[#allocation27_spill] sm:$0xff]  ;;  %v1045_v50 = vadd.f32 %v1037_v38, %v1017_v43 }
 0x24a   :  { %v12740_v43 = vld [vmem:[#allocation35_spill] sm:$0xff] }
 0x24b   :  { %v1837_v38 = vld [vmem:[%s12469_s3 + $0x78] sm:$0xff] }
 0x252   :  { %v1263_v53 = vpop.f32.mrb[2].mxu0  ;;  %v1334_v48 = vpop.f32.mrb[2].mxu1 }
 0x253   :  { %v7727_v10 = vadd.f32 %v1263_v53, %v12723_v56  ;;  %v1265_v22 = vpop.f32.mrb[3].mxu0  ;;  %v1336_v23 = vpop.f32.mrb[3].mxu1  ;;  %v7743_v18 = vadd.f32 %v1334_v48, %v12725_v13  ;;  %v12733_v53 = vld [vmem:[#allocation28_spill] sm:$0xff]  ;;  %v12735_v48 = vld [vmem:[#allocation30_spill] sm:$0xff] }
 0x254   :  { %v7728_v5 = vadd.f32 %v1265_v22, %v12724_v63  ;;  %v7744_v25 = vadd.f32 %v1336_v23, %v12726_v19  ;;  %v1055_v22 = vmul.f32 0.5, %v1045_v50  ;;  %v12737_v23 = vld [vmem:[#allocation32_spill] sm:$0xff] }
 0x255   :  { %v1343_v6 = vmul.f32 0.5, %v7727_v10  ;;  %v12736_v10 = vld [vmem:[#allocation31_spill] sm:$0xff]  ;;  %v1834_v50 = vld [vmem:[%s12469_s3 + $0x60] sm:$0xff] }
 0x256   :  { %v1347_v9 = vmul.f32 0.5, %v7728_v5  ;;  %v1352_v33 = vmul.f32 0.5, %v7744_v25  ;;  %v12738_v5 = vld [vmem:[#allocation33_spill] sm:$0xff]  ;;  %v12743_v25 = vld [vmem:[#allocation38_spill] sm:$0xff] }
 0x257   :  { %7836 = vtanh.f32 %v1343_v6  ;;  %v12739_v6 = vld [vmem:[#allocation34_spill] sm:$0xff] }
 0x258   :  { %7838 = vtanh.f32 %v1347_v9  ;;  %v12741_v9 = vld [vmem:[#allocation36_spill] sm:$0xff] }
 0x259   :  { %7840 = vtanh.f32 %v7743_v18  ;;  %v12742_v18 = vld [vmem:[#allocation37_spill] sm:$0xff] }
 0x25a   :  { %7842 = vtanh.f32 %v1352_v33  ;;  %v12744_v33 = vld [vmem:[#allocation39_spill] sm:$0xff] }
 0x261   :  { %v7837_v39 = vpop.eup %7836 }
 0x262   :  { %v7839_v40 = vpop.eup %7838  ;;  %v1345_v58 = vadd.f32 1.0, %v7837_v39  ;;  %v12745_v39 = vld [vmem:[#allocation40_spill] sm:$0xff] }
 0x263   :  { %v1349_v0 = vadd.f32 1.0, %v7839_v40  ;;  %v7841_v12 = vpop.eup %7840  ;;  %v12746_v40 = vld [vmem:[#allocation41_spill] sm:$0xff] }
 0x264   :  { %v1346_v7 = vmul.f32 0.5, %v1345_v58  ;;  %v7843_v4 = vpop.eup %7842  ;;  %v12747_v58 = vld [vmem:[#allocation42_spill] sm:$0xff] }
 0x265   :  { %v1350_v14 = vmul.f32 0.5, %v1349_v0  ;;  %v1354_v8 = vadd.f32 1.0, %v7843_v4  ;;  %v12748_v0 = vld [vmem:[#allocation43_spill] sm:$0xff] }
 0x266   :  { %v1357_v29 = vmul.f32 %v7841_v12, %v1346_v7  ;;  %v12749_v12 = vld [vmem:[#allocation44_spill] sm:$0xff] }
 0x267   :  { %v1356_v49 = vmul.f32 %v1350_v14, %v12727_v41  ;;  %v1355_v61 = vmul.f32 0.5, %v1354_v8  ;;  %v1823_v14 = vld [vmem:[%s12469_s3 + $0x8] sm:$0xff]  ;;  %v1825_v41 = vld [vmem:[%s12469_s3 + $0x18] sm:$0xff] }
 0x269   :  { %v9227_v60 = vadd.f32 %v1357_v29, %v1356_v49  ;;  %v1827_v29 = vld [vmem:[%s12469_s3 + $0x28] sm:$0xff] }
 0x26a   :  { %v9285_v4 = vpack.c.bf16 %v1827_v29, %v1823_v14  ;;  %v1848_v29 = vld [vmem:[%s12469_s3 + $0xd0] sm:$0xff] }
 0x26b   :  { %7844 = vtanh.f32 %v9227_v60 }
 0x26c   :  { %7846 = vtanh.f32 %v1055_v22  ;;  %v1843_v22 = vld [vmem:[%s12469_s3 + $0xa8] sm:$0xff] }
 0x26d   :  { %7848 = vtanh.f32 %v9220_v54 }
 0x275   :  { %v7845_v28 = vpop.eup %7844 }
 0x276   :  { %v9230_v32 = vmul.f32 %v7845_v28, %v1355_v61  ;;  %v7847_v7 = vpop.eup %7846  ;;  %v1831_v61 = vld [vmem:[%s12469_s3 + $0x48] sm:$0xff] }
 0x277   :  { %v1057_v49 = vadd.f32 1.0, %v7847_v7  ;;  %v7849_v28 = vpop.eup %7848 }
 0x278   :  { %1490 = vmatmul.mubr.f32.vlgmr.msra.gmra.mrb[18].mxu0 %v9230_v32  ;;  %1561 = vmatmul.mubr.f32.vlgmr.msra.gmra.mrb[20].mxu1 %v9230_v32 }
 0x279   :  { %6478 = vmatpush1.bf16.msra.mxu0 %v12729_v42  ;;  %6510 = vmatpush1.bf16.msra.mxu1 %v12730_v44  ;;  %v1058_v42 = vmul.f32 0.5, %v1057_v49  ;;  %v1861_v49 = vld [vmem:[%s12469_s3 + $0x138] sm:$0xff] }
 0x27a   :  { %6480 = vmatprep.subr.bf16.mxu0 %v12731_v24  ;;  %6512 = vmatprep.subr.bf16.mxu1 %v12732_v34  ;;  %v1830_v34 = vld [vmem:[%s12469_s3 + $0x40] sm:$0xff] }
 0x27b   :  { %1631 = vmatprep.mubr.f32.mxu0 %v12695_v27  ;;  %1702 = vmatprep.mubr.f32.mxu1 %v12695_v27 }
 0x27d   :  { %6482 = vmatpush1.bf16.msra.mxu0 %v12733_v53  ;;  %6514 = vmatpush1.bf16.msra.mxu1 %v12734_v46  ;;  %v9319_v53 = vmul.f32 %v7849_v28, %v1058_v42  ;;  %v1832_v46 = vld [vmem:[%s12469_s3 + $0x50] sm:$0xff] }
 0x27e   :  { %6484 = vmatprep.subr.bf16.mxu0 %v12735_v48  ;;  %6516 = vmatprep.subr.bf16.mxu1 %v12736_v10  ;;  %v1836_v48 = vld [vmem:[%s12469_s3 + $0x70] sm:$0xff]  ;;  %v1839_v10 = vld [vmem:[%s12469_s3 + $0x88] sm:$0xff] }
 0x27f   :  { %12750 = vst [vmem:[#allocation4_spill] sm:$0xff] %v9319_v53 }
 0x281   :  { %6486 = vmatpush1.bf16.msra.mxu0 %v12737_v23  ;;  %6518 = vmatpush1.bf16.msra.mxu1 %v12738_v5  ;;  %v1841_v23 = vld [vmem:[%s12469_s3 + $0x98] sm:$0xff] }
 0x282   :  { %6488 = vmatprep.subr.bf16.mxu0 %v12739_v6  ;;  %6520 = vmatprep.subr.bf16.mxu1 %v12740_v43  ;;  %v1845_v5 = vld [vmem:[%s12469_s3 + $0xb8] sm:$0xff]  ;;  %v9349_v6 = vpack.c.bf16 %v1834_v50, %v1830_v34  ;;  %v9351_v43 = vpack.c.bf16 %v1836_v48, %v1832_v46  ;;  %v1872_v50 = vld [vmem:[%s12469_s3 + $0x190] sm:$0xff] }
 0x283   :  { %v1876_v46 = vld [vmem:[%s12469_s3 + $0x1b0] sm:$0xff] }
 0x284   :  { %v9463_v48 = vpack.c.bf16 %v1876_v46, %v1872_v50  ;;  %v2067_v50 = vld [vmem:[%s12472_s4 + $0x88] sm:$0xff] }
 0x285   :  { %6490 = vmatpush1.bf16.msra.mxu0 %v12741_v9  ;;  %6522 = vmatpush1.bf16.msra.mxu1 %v12742_v18  ;;  %v1838_v9 = vld [vmem:[%s12469_s3 + $0x80] sm:$0xff]  ;;  %v9358_v18 = vpack.c.bf16 %v1843_v22, %v1839_v10  ;;  %v1880_v22 = vld [vmem:[%s12469_s3 + $0x1d0] sm:$0xff]  ;;  %v2071_v46 = vld [vmem:[%s12472_s4 + $0xa8] sm:$0xff] }
 0x286   :  { %6492 = vmatprep.subr.bf16.mxu0 %v12743_v25  ;;  %6524 = vmatprep.subr.bf16.mxu1 %v12744_v33  ;;  %v9360_v25 = vpack.c.bf16 %v1845_v5, %v1841_v23  ;;  %v1842_v33 = vld [vmem:[%s12469_s3 + $0xa0] sm:$0xff]  ;;  %v1884_v23 = vld [vmem:[%s12469_s3 + $0x1f0] sm:$0xff] }
 0x287   :  { %v9381_v7 = vpack.c.bf16 %v1842_v33, %v1838_v9  ;;  %v2050_v5 = vld [vmem:[%s12472_s4] sm:$0xff] }
 0x288   :  { %v2054_v9 = vld [vmem:[%s12472_s4 + $0x20] sm:$0xff] }
 0x289   :  { %6494 = vmatpush1.bf16.msra.mxu0 %v12745_v39  ;;  %6526 = vmatpush1.bf16.msra.mxu1 %v12746_v40  ;;  %v1840_v39 = vld [vmem:[%s12469_s3 + $0x90] sm:$0xff] }
 0x28a   :  { %6496 = vmatprep.subr.bf16.mxu0 %v12747_v58  ;;  %6528 = vmatprep.subr.bf16.mxu1 %v12748_v0  ;;  %v1844_v40 = vld [vmem:[%s12469_s3 + $0xb0] sm:$0xff]  ;;  %v1849_v58 = vld [vmem:[%s12469_s3 + $0xd8] sm:$0xff] }
 0x28b   :  { %v1853_v0 = vld [vmem:[%s12469_s3 + $0xf8] sm:$0xff] }
 0x28c   :  { %v9387_v14 = vpack.c.bf16 %v1853_v0, %v1849_v58  ;;  %v2056_v58 = vld [vmem:[%s12472_s4 + $0x30] sm:$0xff] }
 0x28d   :  { %6498 = vmatpush1.bf16.msra.mxu0 %v8983_v35  ;;  %6530 = vmatpush1.bf16.msra.mxu1 %v12749_v12  ;;  %v1829_v35 = vld [vmem:[%s12469_s3 + $0x38] sm:$0xff]  ;;  %v9383_v12 = vpack.c.bf16 %v1844_v40, %v1840_v39  ;;  %v9509_v39 = vpack.c.bf16 %v2054_v9, %v2050_v5  ;;  %v2052_v40 = vld [vmem:[%s12472_s4 + $0x10] sm:$0xff] }
 0x28e   :  { %6500 = vmatprep.subr.bf16.mxu0 %v8995_v55  ;;  %6532 = vmatprep.subr.bf16.mxu1 %v8997_v36  ;;  %v1822_v55 = vld [vmem:[%s12469_s3] sm:$0xff]  ;;  %v9287_v8 = vpack.c.bf16 %v1829_v35, %v1825_v41  ;;  %v1852_v41 = vld [vmem:[%s12469_s3 + $0xf0] sm:$0xff]  ;;  %v1857_v35 = vld [vmem:[%s12469_s3 + $0x118] sm:$0xff]  ;;  %v9518_v0 = vpack.c.bf16 %v2056_v58, %v2052_v40 }
 0x28f   :  { %v1826_v36 = vld [vmem:[%s12469_s3 + $0x20] sm:$0xff]  ;;  %v2072_v5 = vld [vmem:[%s12472_s4 + $0xb0] sm:$0xff]  ;;  %v2075_v40 = vld [vmem:[%s12472_s4 + $0xc8] sm:$0xff] }
 0x290   :  { %v9309_v44 = vpack.c.bf16 %v1826_v36, %v1822_v55  ;;  %v9403_v55 = vpack.c.bf16 %v1852_v41, %v1848_v29  ;;  %v9407_v36 = vpack.c.bf16 %v1861_v49, %v1857_v35  ;;  %v2059_v29 = vld [vmem:[%s12472_s4 + $0x48] sm:$0xff]  ;;  %v2061_v35 = vld [vmem:[%s12472_s4 + $0x58] sm:$0xff] }
 0x291   :  { %6502 = vmatpush1.bf16.msra.mxu0 %v9019_v11  ;;  %6534 = vmatpush1.bf16.msra.mxu1 %v9021_v3  ;;  %v1824_v11 = vld [vmem:[%s12469_s3 + $0x10] sm:$0xff]  ;;  %v2063_v41 = vld [vmem:[%s12472_s4 + $0x68] sm:$0xff] }
 0x292   :  { %6504 = vmatprep.subr.bf16.mxu0 %v9028_v47  ;;  %6536 = vmatprep.subr.bf16.mxu1 %v9030_v26  ;;  %v1828_v3 = vld [vmem:[%s12469_s3 + $0x30] sm:$0xff]  ;;  %v1835_v47 = vld [vmem:[%s12469_s3 + $0x68] sm:$0xff]  ;;  %v1833_v26 = vld [vmem:[%s12469_s3 + $0x58] sm:$0xff]  ;;  %v9532_v49 = vpack.c.bf16 %v2063_v41, %v2059_v29 }
 0x293   :  { %v9311_v24 = vpack.c.bf16 %v1828_v3, %v1824_v11  ;;  %v1856_v11 = vld [vmem:[%s12469_s3 + $0x110] sm:$0xff]  ;;  %v2079_v58 = vld [vmem:[%s12472_s4 + $0xe8] sm:$0xff]  ;;  %v2077_v29 = vld [vmem:[%s12472_s4 + $0xd8] sm:$0xff] }
 0x294   :  { %v1860_v3 = vld [vmem:[%s12469_s3 + $0x130] sm:$0xff]  ;;  %v9604_v41 = vpack.c.bf16 %v2079_v58, %v2075_v40  ;;  %v2086_v40 = vld [vmem:[%s12472_s4 + $0x120] sm:$0xff] }
 0x295   :  { %6506 = vmatpush1.bf16.msra.mxu0 %v9043_v16  ;;  %6538 = vmatpush1.bf16.msra.mxu1 %v9045_v1  ;;  %v9323_v16 = vpack.c.bf16 %v1835_v47, %v1831_v61  ;;  %v9325_v1 = vpack.c.bf16 %v1837_v38, %v1833_v26  ;;  %v1865_v61 = vld [vmem:[%s12469_s3 + $0x158] sm:$0xff]  ;;  %v9423_v28 = vpack.c.bf16 %v1860_v3, %v1856_v11  ;;  %v1864_v26 = vld [vmem:[%s12469_s3 + $0x150] sm:$0xff]  ;;  %v2058_v3 = vld [vmem:[%s12472_s4 + $0x40] sm:$0xff] }
 0x296   :  { %6540 = vmatprep.subr.bf16.mxu0 %v9285_v4  ;;  %6572 = vmatprep.subr.bf16.mxu1 %v9287_v8  ;;  %v1868_v38 = vld [vmem:[%s12469_s3 + $0x170] sm:$0xff]  ;;  %v2065_v11 = vld [vmem:[%s12472_s4 + $0x78] sm:$0xff]  ;;  %12751 = vst [vmem:[#allocation5_spill] sm:$0xff] %v9604_v41 }
 0x297   :  { %v9443_v42 = vpack.c.bf16 %v1868_v38, %v1864_v26  ;;  %v2060_v38 = vld [vmem:[%s12472_s4 + $0x50] sm:$0xff] }
 0x298   :  { %1632 = vmatmul.mubr.f32.vlgmr.msra.gmra.mrb[18].mxu0 %v9319_v53  ;;  %1703 = vmatmul.mubr.f32.vlgmr.msra.gmra.mrb[20].mxu1 %v9319_v53  ;;  %v2102_v53 = vld [vmem:[%s12472_s4 + $0x1a0] sm:$0xff] }
 0x299   :  { %6542 = vmatpush1.bf16.msra.mxu0 %v9309_v44  ;;  %6574 = vmatpush1.bf16.msra.mxu1 %v9311_v24 }
 0x29a   :  { %6544 = vmatprep.subr.bf16.mxu0 %v9323_v16  ;;  %6576 = vmatprep.subr.bf16.mxu1 %v9325_v1 }
 0x29b   :  { %1950 = vmatprep.mubr.f32.mxu0 %v12695_v27  ;;  %2021 = vmatprep.mubr.f32.mxu1 %v12695_v27 }
 0x29d   :  { %6546 = vmatpush1.bf16.msra.mxu0 %v9349_v6  ;;  %6578 = vmatpush1.bf16.msra.mxu1 %v9351_v43 }
 0x29e   :  { %6548 = vmatprep.subr.bf16.mxu0 %v9358_v18  ;;  %6580 = vmatprep.subr.bf16.mxu1 %v9360_v25 }
 0x2a1   :  { %6550 = vmatpush1.bf16.msra.mxu0 %v9381_v7  ;;  %6582 = vmatpush1.bf16.msra.mxu1 %v9383_v12 }
 0x2a2   :  { %6552 = vmatprep.subr.bf16.mxu0 %v9072_v21  ;;  %6584 = vmatprep.subr.bf16.mxu1 %v9387_v14  ;;  %v1869_v21 = vld [vmem:[%s12469_s3 + $0x178] sm:$0xff] }
 0x2a3   :  { %v9427_v47 = vpack.c.bf16 %v1869_v21, %v1865_v61  ;;  %v2062_v61 = vld [vmem:[%s12472_s4 + $0x60] sm:$0xff]  ;;  %v9543_v21 = vpack.c.bf16 %v2065_v11, %v2061_v35  ;;  %v2081_v35 = vld [vmem:[%s12472_s4 + $0xf8] sm:$0xff] }
 0x2a4   :  { %v9545_v26 = vpack.c.bf16 %v2062_v61, %v2058_v3  ;;  %v2074_v11 = vld [vmem:[%s12472_s4 + $0xc0] sm:$0xff]  ;;  %v9615_v61 = vpack.c.bf16 %v2081_v35, %v2077_v29  ;;  %v2084_v35 = vld [vmem:[%s12472_s4 + $0x110] sm:$0xff] }
 0x2a5   :  { %6554 = vmatpush1.bf16.msra.mxu0 %v9088_v30  ;;  %6586 = vmatpush1.bf16.msra.mxu1 %v9403_v55  ;;  %v1873_v30 = vld [vmem:[%s12469_s3 + $0x198] sm:$0xff]  ;;  %v2078_v3 = vld [vmem:[%s12472_s4 + $0xe0] sm:$0xff] }
 0x2a6   :  { %6556 = vmatprep.subr.bf16.mxu0 %v9092_v31  ;;  %6588 = vmatprep.subr.bf16.mxu1 %v9407_v36  ;;  %v1877_v31 = vld [vmem:[%s12469_s3 + $0x1b8] sm:$0xff]  ;;  %12752 = vst [vmem:[#allocation6_spill] sm:$0xff] %v9615_v61 }
 0x2a7   :  { %v9447_v34 = vpack.c.bf16 %v1877_v31, %v1873_v30  ;;  %v2064_v30 = vld [vmem:[%s12472_s4 + $0x70] sm:$0xff] }
 0x2a8   :  { %v9554_v31 = vpack.c.bf16 %v2064_v30, %v2060_v38  ;;  %v9617_v38 = vpack.c.bf16 %v2078_v3, %v2074_v11  ;;  %v2076_v30 = vld [vmem:[%s12472_s4 + $0xd0] sm:$0xff] }
 0x2a9   :  { %6558 = vmatpush1.bf16.msra.mxu0 %v9108_v45  ;;  %6590 = vmatpush1.bf16.msra.mxu1 %v9423_v28  ;;  %v1881_v45 = vld [vmem:[%s12469_s3 + $0x1d8] sm:$0xff]  ;;  %v2088_v11 = vld [vmem:[%s12472_s4 + $0x130] sm:$0xff] }
 0x2aa   :  { %6560 = vmatprep.subr.bf16.mxu0 %v9112_v2  ;;  %6592 = vmatprep.subr.bf16.mxu1 %v9427_v47  ;;  %v1885_v2 = vld [vmem:[%s12469_s3 + $0x1f8] sm:$0xff]  ;;  %12753 = vst [vmem:[#allocation7_spill] sm:$0xff] %v9617_v38  ;;  %v9662_v3 = vpack.c.bf16 %v2088_v11, %v2084_v35  ;;  %v2092_v11 = vld [vmem:[%s12472_s4 + $0x150] sm:$0xff] }
 0x2ab   :  { %v9467_v10 = vpack.c.bf16 %v1885_v2, %v1881_v45  ;;  %v2069_v45 = vld [vmem:[%s12472_s4 + $0x98] sm:$0xff]  ;;  %v9568_v2 = vpack.c.bf16 %v2071_v46, %v2067_v50  ;;  %v2080_v50 = vld [vmem:[%s12472_s4 + $0xf0] sm:$0xff] }
 0x2ac   :  { %v9626_v46 = vpack.c.bf16 %v2080_v50, %v2076_v30  ;;  %12758 = vst [vmem:[#allocation12_spill] sm:$0xff] %v9662_v3  ;;  %v2091_v30 = vld [vmem:[%s12472_s4 + $0x148] sm:$0xff] }
 0x2ad   :  { %6562 = vmatpush1.bf16.msra.mxu0 %v9128_v51  ;;  %6594 = vmatpush1.bf16.msra.mxu1 %v9443_v42  ;;  %v9477_v51 = vpack.c.bf16 %v1884_v23, %v1880_v22  ;;  %v2073_v22 = vld [vmem:[%s12472_s4 + $0xb8] sm:$0xff]  ;;  %v2066_v23 = vld [vmem:[%s12472_s4 + $0x80] sm:$0xff]  ;;  %v2095_v50 = vld [vmem:[%s12472_s4 + $0x168] sm:$0xff] }
 0x2ae   :  { %6564 = vmatprep.subr.bf16.mxu0 %v9132_v17  ;;  %6596 = vmatprep.subr.bf16.mxu1 %v9447_v34  ;;  %v2051_v17 = vld [vmem:[%s12472_s4 + $0x8] sm:$0xff]  ;;  %12754 = vst [vmem:[#allocation8_spill] sm:$0xff] %v9626_v46 }
 0x2b1   :  { %6566 = vmatpush1.bf16.msra.mxu0 %v9148_v57  ;;  %6598 = vmatpush1.bf16.msra.mxu1 %v9463_v48  ;;  %v2055_v57 = vld [vmem:[%s12472_s4 + $0x28] sm:$0xff] }
 0x2b2   :  { %6568 = vmatprep.subr.bf16.mxu0 %v9152_v15  ;;  %6600 = vmatprep.subr.bf16.mxu1 %v9467_v10  ;;  %v2053_v15 = vld [vmem:[%s12472_s4 + $0x18] sm:$0xff] }
 0x2b5   :  { %6570 = vmatpush1.bf16.msra.mxu0 %v9162_v62  ;;  %6602 = vmatpush1.bf16.msra.mxu1 %v9477_v51  ;;  %v9496_v62 = vpack.c.bf16 %v2055_v57, %v2051_v17  ;;  %v2070_v17 = vld [vmem:[%s12472_s4 + $0xa0] sm:$0xff]  ;;  %v9579_v57 = vpack.c.bf16 %v2073_v22, %v2069_v45  ;;  %v2083_v45 = vld [vmem:[%s12472_s4 + $0x108] sm:$0xff] }
 0x2b6   :  { %v2087_v22 = vld [vmem:[%s12472_s4 + $0x128] sm:$0xff] }
 0x2b7   :  { %6604 = vmatprep.subr.bf16.mxu0 %v9496_v62 }
 0x2b8   :  { %1951 = vmatmul.mubr.f32.vlgmr.msra.gmra.mrb[4].mxu0 %v9230_v32  ;;  %2022 = vmatmul.mubr.f32.vlgmr.msra.gmra.mrb[4].mxu1 %v9230_v32  ;;  %v2057_v32 = vld [vmem:[%s12472_s4 + $0x38] sm:$0xff] }
 0x2b9   :  { %2178 = vmatprep.mubr.f32.mxu0 %v12695_v27  ;;  %2249 = vmatprep.mubr.f32.mxu1 %v12695_v27  ;;  %v9507_v33 = vpack.c.bf16 %v2057_v32, %v2053_v15  ;;  %v9581_v15 = vpack.c.bf16 %v2070_v17, %v2066_v23  ;;  %v2068_v32 = vld [vmem:[%s12472_s4 + $0x90] sm:$0xff]  ;;  %v2085_v23 = vld [vmem:[%s12472_s4 + $0x118] sm:$0xff]  ;;  %v9640_v17 = vpack.c.bf16 %v2087_v22, %v2083_v45 }
 0x2ba   :  { %6606 = vmatpush1.bf16.msra.mxu0 %v9509_v39  ;;  %v9590_v9 = vpack.c.bf16 %v2072_v5, %v2068_v32  ;;  %v2089_v32 = vld [vmem:[%s12472_s4 + $0x138] sm:$0xff]  ;;  %v2082_v5 = vld [vmem:[%s12472_s4 + $0x100] sm:$0xff]  ;;  %v9676_v22 = vpack.c.bf16 %v2095_v50, %v2091_v30  ;;  %v2096_v30 = vld [vmem:[%s12472_s4 + $0x170] sm:$0xff] }
 0x2bb   :  { %6636 = vmatprep.subr.bf16.mxu1 %v9507_v33  ;;  %6608 = vmatprep.subr.bf16.mxu0 %v9532_v49  ;;  %12755 = vst [vmem:[#allocation9_spill] sm:$0xff] %v9640_v17  ;;  %v9651_v58 = vpack.c.bf16 %v2089_v32, %v2085_v23  ;;  %v9653_v29 = vpack.c.bf16 %v2086_v40, %v2082_v5  ;;  %v2093_v45 = vld [vmem:[%s12472_s4 + $0x158] sm:$0xff]  ;;  %v2090_v32 = vld [vmem:[%s12472_s4 + $0x140] sm:$0xff] }
 0x2bc   :  { %6638 = vmatpush1.bf16.msra.mxu1 %v9518_v0  ;;  %12759 = vst [vmem:[#allocation13_spill] sm:$0xff] %v9676_v22  ;;  %v2097_v23 = vld [vmem:[%s12472_s4 + $0x178] sm:$0xff]  ;;  %v2094_v5 = vld [vmem:[%s12472_s4 + $0x160] sm:$0xff]  ;;  %v9698_v50 = vpack.c.bf16 %v2096_v30, %v2092_v11 }
 0x2bd   :  { %6640 = vmatprep.subr.bf16.mxu1 %v9543_v21  ;;  %12756 = vst [vmem:[#allocation10_spill] sm:$0xff] %v9651_v58  ;;  %12757 = vst [vmem:[#allocation11_spill] sm:$0xff] %v9653_v29  ;;  %v9687_v40 = vpack.c.bf16 %v2097_v23, %v2093_v45  ;;  %v9689_v35 = vpack.c.bf16 %v2094_v5, %v2090_v32  ;;  %v2099_v45 = vld [vmem:[%s12472_s4 + $0x188] sm:$0xff]  ;;  %v2101_v32 = vld [vmem:[%s12472_s4 + $0x198] sm:$0xff] }
 0x2be   :  { %6610 = vmatpush1.bf16.msra.mxu0 %v9545_v26  ;;  %12762 = vst [vmem:[#allocation18_spill] sm:$0xff] %v9698_v50  ;;  %v2103_v23 = vld [vmem:[%s12472_s4 + $0x1a8] sm:$0xff]  ;;  %v2105_v11 = vld [vmem:[%s12472_s4 + $0x1b8] sm:$0xff]  ;;  %v2098_v30 = vld [vmem:[%s12472_s4 + $0x180] sm:$0xff] }
 0x2bf   :  { %6612 = vmatprep.subr.bf16.mxu0 %v9568_v2  ;;  %12760 = vst [vmem:[#allocation14_spill] sm:$0xff] %v9687_v40  ;;  %12761 = vst [vmem:[#allocation17_spill] sm:$0xff] %v9689_v35  ;;  %v9712_v5 = vpack.c.bf16 %v2103_v23, %v2099_v45  ;;  %v2100_v45 = vld [vmem:[%s12472_s4 + $0x190] sm:$0xff] }
 0x2c0   :  { %6642 = vmatpush1.bf16.msra.mxu1 %v9554_v31  ;;  %v2104_v23 = vld [vmem:[%s12472_s4 + $0x1b0] sm:$0xff] }
 0x2c1   :  { %6644 = vmatprep.subr.bf16.mxu1 %v9579_v57  ;;  %12763 = vst [vmem:[#allocation21_spill] sm:$0xff] %v9712_v5 }
 0x2c2   :  { %6614 = vmatpush1.bf16.msra.mxu0 %v9581_v15 }
 0x2c3   :  { %6616 = vmatprep.subr.bf16.mxu0 %v9604_v41 }
 0x2c4   :  { %6646 = vmatpush1.bf16.msra.mxu1 %v9590_v9 }
 0x2c5   :  { %6648 = vmatprep.subr.bf16.mxu1 %v9615_v61 }
 0x2c6   :  { %6618 = vmatpush1.bf16.msra.mxu0 %v9617_v38 }
 0x2c7   :  { %6620 = vmatprep.subr.bf16.mxu0 %v9640_v17 }
 0x2c8   :  { %6650 = vmatpush1.bf16.msra.mxu1 %v9626_v46 }
 0x2c9   :  { %6652 = vmatprep.subr.bf16.mxu1 %v9651_v58 }
 0x2ca   :  { %6622 = vmatpush1.bf16.msra.mxu0 %v9653_v29 }
 0x2cb   :  { %6624 = vmatprep.subr.bf16.mxu0 %v9676_v22 }
 0x2cc   :  { %6654 = vmatpush1.bf16.msra.mxu1 %v9662_v3 }
 0x2cd   :  { %6656 = vmatprep.subr.bf16.mxu1 %v9687_v40  ;;  %v9725_v40 = vpack.c.bf16 %v2102_v53, %v2098_v30  ;;  %v2107_v53 = vld [vmem:[%s12472_s4 + $0x1c8] sm:$0xff] }
 0x2ce   :  { %6626 = vmatpush1.bf16.msra.mxu0 %v9689_v35  ;;  %v9723_v35 = vpack.c.bf16 %v2105_v11, %v2101_v32  ;;  %v2111_v32 = vld [vmem:[%s12472_s4 + $0x1e8] sm:$0xff]  ;;  %v2109_v11 = vld [vmem:[%s12472_s4 + $0x1d8] sm:$0xff] }
 0x2cf   :  { %12765 = vst [vmem:[#allocation23_spill] sm:$0xff] %v9725_v40  ;;  %6628 = vmatprep.subr.bf16.mxu0 %v9712_v5  ;;  %v9748_v30 = vpack.c.bf16 %v2111_v32, %v2107_v53  ;;  %v2108_v53 = vld [vmem:[%s12472_s4 + $0x1d0] sm:$0xff] }
 0x2d0   :  { %6658 = vmatpush1.bf16.msra.mxu1 %v9698_v50  ;;  %12764 = vst [vmem:[#allocation22_spill] sm:$0xff] %v9723_v35  ;;  %v9734_v50 = vpack.c.bf16 %v2104_v23, %v2100_v45  ;;  %v2113_v45 = vld [vmem:[%s12472_s4 + $0x1f8] sm:$0xff]  ;;  %v2106_v23 = vld [vmem:[%s12472_s4 + $0x1c0] sm:$0xff]  ;;  %v2112_v32 = vld [vmem:[%s12472_s4 + $0x1f0] sm:$0xff] }
 0x2d1   :  { %6660 = vmatprep.subr.bf16.mxu1 %v9723_v35  ;;  %12767 = vst [vmem:[#allocation24_spill] sm:$0xff] %v9748_v30  ;;  %v9759_v35 = vpack.c.bf16 %v2113_v45, %v2109_v11  ;;  %v1759_v11 = vld [vmem:[%s12473_s5 + $0x28] sm:$0xff]  ;;  %v1757_v45 = vld [vmem:[%s12473_s5 + $0x18] sm:$0xff] }
 0x2d2   :  { %12766 = vst [vmem:[#allocation20_spill] sm:$0xff] %v9734_v50  ;;  %6630 = vmatpush1.bf16.msra.mxu0 %v9725_v40  ;;  %v2110_v40 = vld [vmem:[%s12472_s4 + $0x1e0] sm:$0xff] }
 0x2d3   :  { %12768 = vst [vmem:[#allocation25_spill] sm:$0xff] %v9759_v35  ;;  %v9761_v5 = vpack.c.bf16 %v2110_v40, %v2106_v23  ;;  %6632 = vmatprep.subr.bf16.mxu0 %v9748_v30  ;;  %v1755_v40 = vld [vmem:[%s12473_s5 + $0x8] sm:$0xff] }
 0x2d4   :  { %6662 = vmatpush1.bf16.msra.mxu1 %v9734_v50  ;;  %v9770_v50 = vpack.c.bf16 %v2112_v32, %v2108_v53  ;;  %v9784_v23 = vpack.c.bf16 %v1759_v11, %v1755_v40  ;;  %v1761_v53 = vld [vmem:[%s12473_s5 + $0x38] sm:$0xff] }
 0x2d5   :  { %12769 = vst [vmem:[#allocation26_spill] sm:$0xff] %v9761_v5  ;;  %6664 = vmatprep.subr.bf16.mxu1 %v9759_v35  ;;  %v9789_v32 = vpack.c.bf16 %v1761_v53, %v1757_v45 }
 0x2d6   :  { %12770 = vst [vmem:[#allocation27_spill] sm:$0xff] %v9770_v50  ;;  %6634 = vmatpush1.bf16.msra.mxu0 %v9761_v5  ;;  %12771 = vst [vmem:[#allocation28_spill] sm:$0xff] %v9784_v23  ;;  %v9796_v5 = vld [vmem:[%s12476_s6] sm:$0xf] }
 0x2d7   :  { %12772 = vst [vmem:[#allocation29_spill] sm:$0xff] %v9789_v32  ;;  %6668 = vmatprep.subr.bf16.mxu0 %v9784_v23  ;;  %v1718_v40 = vrot.slane %v9796_v5, %v12721_v59  ;;  %v1722_v45 = vrot.slane %v9796_v5, %v12722_v20 }
 0x2d8   :  { %6666 = vmatpush1.bf16.msra.mxu1 %v9770_v50  ;;  %v1714_v50 = vrot.slane %v9796_v5, %v12720_v52 }
 0x2d9   :  { %6700 = vmatprep.subr.bf16.mxu1 %v9789_v32 }
 0x36b   :  { %v1633_v11 = vpop.f32.mrb[18].mxu0  ;;  %v1704_v35 = vpop.f32.mrb[20].mxu1 }
 0x36c   :  { %v1731_v30 = vadd.f32 %v1714_v50, %v1633_v11  ;;  %v1635_v53 = vpop.f32.mrb[19].mxu0  ;;  %v9804_v23 = vpop.f32.mrb[21].mxu1  ;;  %v1733_v29 = vadd.f32 %v1722_v45, %v1704_v35 }
 0x36d   :  { %v1732_v32 = vadd.f32 %v1718_v40, %v1635_v53 }
 0x36e   :  { %v1735_v22 = vmul.f32 0.5, %v1731_v30 }
 0x36f   :  { %v1739_v3 = vmul.f32 0.5, %v1732_v32 }
 0x370   :  { %7850 = vtanh.f32 %v1735_v22 }
 0x371   :  { %7852 = vtanh.f32 %v1739_v3 }
 0x372   :  { %7854 = vtanh.f32 %v1733_v29 }
 0x37a   :  { %v7851_v52 = vpop.eup %7850 }
 0x37b   :  { %v7853_v58 = vpop.eup %7852  ;;  %v1737_v17 = vadd.f32 1.0, %v7851_v52 }
 0x37c   :  { %v1741_v59 = vadd.f32 1.0, %v7853_v58  ;;  %v7855_v38 = vpop.eup %7854 }
 0x37d   :  { %v1738_v46 = vmul.f32 0.5, %v1737_v17 }
 0x37e   :  { %v1742_v50 = vmul.f32 0.5, %v1741_v59 }
 0x37f   :  { %v1749_v11 = vmul.f32 %v7855_v38, %v1738_v46 }
 0x380   :  { %v1748_v20 = vmul.f32 %v1742_v50, %v9220_v54 }
 0x382   :  { %v9807_v61 = vadd.f32 %v1749_v11, %v1748_v20 }
 0x38b   :  { %v1952_v41 = vpop.f32.mrb[4].mxu0  ;;  %v2023_v40 = vpop.f32.mrb[4].mxu1 }
 0x38c   :  { %v7729_v30 = vadd.f32 %v1952_v41, %v12723_v56  ;;  %v1954_v22 = vpop.f32.mrb[5].mxu0  ;;  %v2025_v35 = vpop.f32.mrb[5].mxu1  ;;  %v7745_v52 = vadd.f32 %v2023_v40, %v12725_v13 }
 0x38d   :  { %v7730_v29 = vadd.f32 %v1954_v22, %v12724_v63  ;;  %v7746_v59 = vadd.f32 %v2025_v35, %v12726_v19  ;;  %v1754_v22 = vld [vmem:[%s12473_s5] sm:$0xff] }
 0x38e   :  { %v2032_v3 = vmul.f32 0.5, %v7729_v30  ;;  %v1758_v35 = vld [vmem:[%s12473_s5 + $0x20] sm:$0xff] }
 0x38f   :  { %v2036_v32 = vmul.f32 0.5, %v7730_v29  ;;  %v2041_v54 = vmul.f32 0.5, %v7746_v59  ;;  %v1756_v29 = vld [vmem:[%s12473_s5 + $0x10] sm:$0xff]  ;;  %v1769_v59 = vld [vmem:[%s12473_s5 + $0x78] sm:$0xff] }
 0x390   :  { %7856 = vtanh.f32 %v2032_v3  ;;  %v1763_v3 = vld [vmem:[%s12473_s5 + $0x48] sm:$0xff] }
 0x391   :  { %7858 = vtanh.f32 %v2036_v32  ;;  %v1767_v32 = vld [vmem:[%s12473_s5 + $0x68] sm:$0xff] }
 0x392   :  { %7860 = vtanh.f32 %v7745_v52  ;;  %v1765_v52 = vld [vmem:[%s12473_s5 + $0x58] sm:$0xff] }
 0x393   :  { %7862 = vtanh.f32 %v2041_v54 }
 0x39a   :  { %v7857_v20 = vpop.eup %7856 }
 0x39b   :  { %v7859_v38 = vpop.eup %7858  ;;  %v2034_v46 = vadd.f32 1.0, %v7857_v20 }
 0x39c   :  { %v2038_v17 = vadd.f32 1.0, %v7859_v38  ;;  %v7861_v58 = vpop.eup %7860  ;;  %v9841_v38 = vpack.c.bf16 %v1758_v35, %v1754_v22  ;;  %v1726_v22 = vrot.slane %v9796_v5, %v12728_v37  ;;  %v1775_v35 = vld [vmem:[%s12473_s5 + $0xa8] sm:$0xff] }
 0x39d   :  { %v2035_v41 = vmul.f32 0.5, %v2034_v46  ;;  %v7863_v40 = vpop.eup %7862 }
 0x39e   :  { %v2039_v45 = vmul.f32 0.5, %v2038_v17  ;;  %v2043_v30 = vadd.f32 1.0, %v7863_v40  ;;  %v1762_v17 = vld [vmem:[%s12473_s5 + $0x40] sm:$0xff]  ;;  %v1768_v40 = vld [vmem:[%s12473_s5 + $0x70] sm:$0xff] }
 0x39f   :  { %v2046_v53 = vmul.f32 %v7861_v58, %v2035_v41  ;;  %v1766_v41 = vld [vmem:[%s12473_s5 + $0x60] sm:$0xff] }
 0x3a0   :  { %v2045_v50 = vmul.f32 %v2039_v45, %v9227_v60  ;;  %v1760_v60 = vld [vmem:[%s12473_s5 + $0x30] sm:$0xff]  ;;  %v2044_v54 = vmul.f32 0.5, %v2043_v30  ;;  %v9853_v45 = vpack.c.bf16 %v1767_v32, %v1763_v3  ;;  %v1771_v30 = vld [vmem:[%s12473_s5 + $0x88] sm:$0xff]  ;;  %v9881_v5 = vpack.c.bf16 %v1766_v41, %v1762_v17  ;;  %v1770_v32 = vld [vmem:[%s12473_s5 + $0x80] sm:$0xff] }
 0x3a1   :  { %v9843_v46 = vpack.c.bf16 %v1760_v60, %v1756_v29  ;;  %v1773_v29 = vld [vmem:[%s12473_s5 + $0x98] sm:$0xff]  ;;  %v1776_v17 = vld [vmem:[%s12473_s5 + $0xb0] sm:$0xff]  ;;  %v1779_v41 = vld [vmem:[%s12473_s5 + $0xc8] sm:$0xff] }
 0x3a2   :  { %v9814_v11 = vadd.f32 %v2046_v53, %v2045_v50  ;;  %v9855_v53 = vpack.c.bf16 %v1769_v59, %v1765_v52  ;;  %v1764_v50 = vld [vmem:[%s12473_s5 + $0x50] sm:$0xff]  ;;  %v1777_v60 = vld [vmem:[%s12473_s5 + $0xb8] sm:$0xff]  ;;  %12774 = vst [vmem:[#allocation31_spill] sm:$0xff] %v9881_v5  ;;  %v1774_v52 = vld [vmem:[%s12473_s5 + $0xa0] sm:$0xff]  ;;  %v9893_v59 = vpack.c.bf16 %v1775_v35, %v1771_v30 }
 0x3a3   :  { %v9883_v3 = vpack.c.bf16 %v1768_v40, %v1764_v50  ;;  %v1734_v50 = vadd.f32 %v1726_v22, %v9804_v23  ;;  %v1783_v40 = vld [vmem:[%s12473_s5 + $0xe8] sm:$0xff]  ;;  %v1781_v30 = vld [vmem:[%s12473_s5 + $0xd8] sm:$0xff]  ;;  %v9920_v23 = vpack.c.bf16 %v1774_v52, %v1770_v32  ;;  %v1780_v32 = vld [vmem:[%s12473_s5 + $0xd0] sm:$0xff] }
 0x3a4   :  { %7864 = vtanh.f32 %v9814_v11  ;;  %12773 = vst [vmem:[#allocation30_spill] sm:$0xff] %v9855_v53  ;;  %12776 = vst [vmem:[#allocation33_spill] sm:$0xff] %v9893_v59  ;;  %v1785_v35 = vld [vmem:[%s12473_s5 + $0xf8] sm:$0xff]  ;;  %v1784_v52 = vld [vmem:[%s12473_s5 + $0xf0] sm:$0xff] }
 0x3a5   :  { %12775 = vst [vmem:[#allocation32_spill] sm:$0xff] %v9883_v3  ;;  %12778 = vst [vmem:[#allocation35_spill] sm:$0xff] %v9920_v23 }
 0x3ae   :  { %v7865_v20 = vpop.eup %7864 }
 0x3af   :  { %v9851_v58 = vmul.f32 %v7865_v20, %v2044_v54  ;;  %v9895_v54 = vpack.c.bf16 %v1777_v60, %v1773_v29  ;;  %v1772_v20 = vld [vmem:[%s12473_s5 + $0x90] sm:$0xff]  ;;  %v1778_v29 = vld [vmem:[%s12473_s5 + $0xc0] sm:$0xff] }
 0x3b0   :  { %v9922_v22 = vpack.c.bf16 %v1776_v17, %v1772_v20  ;;  %v1782_v60 = vld [vmem:[%s12473_s5 + $0xe0] sm:$0xff]  ;;  %v1787_v20 = vld [vmem:[%s12473_s5 + $0x108] sm:$0xff]  ;;  %v1744_v17 = vmul.f32 0.5, %v1734_v50 }
 0x3b1   :  { %2179 = vmatmul.mubr.f32.vlgmr.msra.gmra.mrb[20].mxu0 %v9851_v58  ;;  %2250 = vmatmul.mubr.f32.vlgmr.msra.gmra.mrb[22].mxu1 %v9851_v58  ;;  %12777 = vst [vmem:[#allocation34_spill] sm:$0xff] %v9895_v54  ;;  %v1786_v50 = vld [vmem:[%s12473_s5 + $0x100] sm:$0xff] }
 0x3b2   :  { %6670 = vmatpush1.bf16.msra.mxu0 %v9841_v38  ;;  %6702 = vmatpush1.bf16.msra.mxu1 %v9843_v46  ;;  %12779 = vst [vmem:[#allocation36_spill] sm:$0xff] %v9922_v22  ;;  %7866 = vtanh.f32 %v1744_v17  ;;  %v1794_v17 = vld [vmem:[%s12473_s5 + $0x140] sm:$0xff] }
 0x3b3   :  { %6672 = vmatprep.subr.bf16.mxu0 %v9853_v45  ;;  %6704 = vmatprep.subr.bf16.mxu1 %v9855_v53  ;;  %v9932_v53 = vpack.c.bf16 %v1783_v40, %v1779_v41  ;;  %v1791_v41 = vld [vmem:[%s12473_s5 + $0x128] sm:$0xff]  ;;  %v1789_v40 = vld [vmem:[%s12473_s5 + $0x118] sm:$0xff]  ;;  %7868 = vtanh.f32 %v9807_v61 }
 0x3b4   :  { %2320 = vmatprep.mubr.f32.mxu0 %v12695_v27  ;;  %2391 = vmatprep.mubr.f32.mxu1 %v12695_v27 }
 0x3b5   :  { %12780 = vst [vmem:[#allocation37_spill] sm:$0xff] %v9932_v53 }
 0x3b6   :  { %6674 = vmatpush1.bf16.msra.mxu0 %v9881_v5  ;;  %6706 = vmatpush1.bf16.msra.mxu1 %v9883_v3  ;;  %v9934_v5 = vpack.c.bf16 %v1785_v35, %v1781_v30  ;;  %v1793_v30 = vld [vmem:[%s12473_s5 + $0x138] sm:$0xff]  ;;  %v9956_v35 = vpack.c.bf16 %v1782_v60, %v1778_v29  ;;  %v9968_v3 = vpack.c.bf16 %v1791_v41, %v1787_v20  ;;  %v1788_v29 = vld [vmem:[%s12473_s5 + $0x110] sm:$0xff] }
 0x3b7   :  { %6676 = vmatprep.subr.bf16.mxu0 %v9893_v59  ;;  %6708 = vmatprep.subr.bf16.mxu1 %v9895_v54  ;;  %v9958_v54 = vpack.c.bf16 %v1784_v52, %v1780_v32  ;;  %v1790_v59 = vld [vmem:[%s12473_s5 + $0x120] sm:$0xff]  ;;  %v1792_v60 = vld [vmem:[%s12473_s5 + $0x130] sm:$0xff]  ;;  %v1795_v32 = vld [vmem:[%s12473_s5 + $0x148] sm:$0xff] }
 0x3b8   :  { %12781 = vst [vmem:[#allocation38_spill] sm:$0xff] %v9934_v5  ;;  %12782 = vst [vmem:[#allocation39_spill] sm:$0xff] %v9956_v35  ;;  %v1799_v52 = vld [vmem:[%s12473_s5 + $0x168] sm:$0xff]  ;;  %v1797_v20 = vld [vmem:[%s12473_s5 + $0x158] sm:$0xff] }
 0x3b9   :  { %12783 = vst [vmem:[#allocation40_spill] sm:$0xff] %v9958_v54  ;;  %12784 = vst [vmem:[#allocation41_spill] sm:$0xff] %v9968_v3  ;;  %v1801_v41 = vld [vmem:[%s12473_s5 + $0x178] sm:$0xff] }
 0x3ba   :  { %6678 = vmatpush1.bf16.msra.mxu0 %v9920_v23  ;;  %6710 = vmatpush1.bf16.msra.mxu1 %v9922_v22  ;;  %v9970_v23 = vpack.c.bf16 %v1793_v30, %v1789_v40  ;;  %v9992_v40 = vpack.c.bf16 %v1790_v59, %v1786_v50  ;;  %v9994_v30 = vpack.c.bf16 %v1792_v60, %v1788_v29  ;;  %v1796_v59 = vld [vmem:[%s12473_s5 + $0x150] sm:$0xff]  ;;  %v1803_v29 = vld [vmem:[%s12473_s5 + $0x188] sm:$0xff] }
 0x3bb   :  { %6680 = vmatprep.subr.bf16.mxu0 %v9932_v53  ;;  %6712 = vmatprep.subr.bf16.mxu1 %v9934_v5  ;;  %v1798_v5 = vld [vmem:[%s12473_s5 + $0x160] sm:$0xff]  ;;  %v10004_v53 = vpack.c.bf16 %v1799_v52, %v1795_v32  ;;  %v1800_v50 = vld [vmem:[%s12473_s5 + $0x170] sm:$0xff]  ;;  %v1807_v60 = vld [vmem:[%s12473_s5 + $0x1a8] sm:$0xff] }
 0x3bc   :  { %12785 = vst [vmem:[#allocation42_spill] sm:$0xff] %v9970_v23  ;;  %12786 = vst [vmem:[#allocation43_spill] sm:$0xff] %v9992_v40  ;;  %v1805_v32 = vld [vmem:[%s12473_s5 + $0x198] sm:$0xff] }
 0x3bd   :  { %12787 = vst [vmem:[#allocation44_spill] sm:$0xff] %v9994_v30  ;;  %12788 = vst [vmem:[#allocation45_spill] sm:$0xff] %v10004_v53  ;;  %v1809_v52 = vld [vmem:[%s12473_s5 + $0x1b8] sm:$0xff] }
 0x3be   :  { %6682 = vmatpush1.bf16.msra.mxu0 %v9956_v35  ;;  %6714 = vmatpush1.bf16.msra.mxu1 %v9958_v54  ;;  %v10006_v35 = vpack.c.bf16 %v1801_v41, %v1797_v20  ;;  %v10029_v20 = vpack.c.bf16 %v1798_v5, %v1794_v17  ;;  %v10031_v41 = vpack.c.bf16 %v1800_v50, %v1796_v59  ;;  %v1804_v5 = vld [vmem:[%s12473_s5 + $0x190] sm:$0xff]  ;;  %v1811_v59 = vld [vmem:[%s12473_s5 + $0x1c8] sm:$0xff] }
 0x3bf   :  { %6684 = vmatprep.subr.bf16.mxu0 %v9968_v3  ;;  %6716 = vmatprep.subr.bf16.mxu1 %v9970_v23  ;;  %v1802_v23 = vld [vmem:[%s12473_s5 + $0x180] sm:$0xff]  ;;  %v10041_v54 = vpack.c.bf16 %v1807_v60, %v1803_v29  ;;  %v1808_v17 = vld [vmem:[%s12473_s5 + $0x1b0] sm:$0xff]  ;;  %v1815_v50 = vld [vmem:[%s12473_s5 + $0x1e8] sm:$0xff] }
 0x3c0   :  { %12789 = vst [vmem:[#allocation46_spill] sm:$0xff] %v10006_v35  ;;  %12790 = vst [vmem:[#allocation47_spill] sm:$0xff] %v10031_v41  ;;  %v1806_v3 = vld [vmem:[%s12473_s5 + $0x1a0] sm:$0xff]  ;;  %v1813_v29 = vld [vmem:[%s12473_s5 + $0x1d8] sm:$0xff] }
 0x3c1   :  { %v1817_v60 = vld [vmem:[%s12473_s5 + $0x1f8] sm:$0xff] }
 0x3c2   :  { %6686 = vmatpush1.bf16.msra.mxu0 %v9992_v40  ;;  %6718 = vmatpush1.bf16.msra.mxu1 %v9994_v30  ;;  %v10043_v40 = vpack.c.bf16 %v1809_v52, %v1805_v32  ;;  %v7867_v32 = vpop.eup %7866  ;;  %v10065_v52 = vpack.c.bf16 %v1806_v3, %v1802_v23  ;;  %v10074_v30 = vpack.c.bf16 %v1815_v50, %v1811_v59  ;;  %v1812_v3 = vld [vmem:[%s12473_s5 + $0x1d0] sm:$0xff] }
 0x3c3   :  { %6688 = vmatprep.subr.bf16.mxu0 %v10004_v53  ;;  %6720 = vmatprep.subr.bf16.mxu1 %v10006_v35  ;;  %v10067_v35 = vpack.c.bf16 %v1808_v17, %v1804_v5  ;;  %v1810_v53 = vld [vmem:[%s12473_s5 + $0x1c0] sm:$0xff]  ;;  %v10076_v22 = vpack.c.bf16 %v1817_v60, %v1813_v29  ;;  %v1816_v23 = vld [vmem:[%s12473_s5 + $0x1f0] sm:$0xff]  ;;  %v1746_v5 = vadd.f32 1.0, %v7867_v32  ;;  %v7869_v50 = vpop.eup %7868 }
 0x3c4   :  { %v10091_v59 = vpack.c.bf16 %v1816_v23, %v1812_v3  ;;  %v2551_v32 = vld [vmem:[%s12469_s3 + $0x140] sm:$0xff]  ;;  %v2564_v23 = vld [vmem:[%s12469_s3 + $0x1a8] sm:$0xff] }
 0x3c5   :  { %v1747_v29 = vmul.f32 0.5, %v1746_v5  ;;  %v2555_v3 = vld [vmem:[%s12469_s3 + $0x160] sm:$0xff] }
 0x3c6   :  { %6690 = vmatpush1.bf16.msra.mxu0 %v10029_v20  ;;  %6722 = vmatpush1.bf16.msra.mxu1 %v10031_v41  ;;  %v1814_v41 = vld [vmem:[%s12473_s5 + $0x1e0] sm:$0xff] }
 0x3c7   :  { %6692 = vmatprep.subr.bf16.mxu0 %v10041_v54  ;;  %6724 = vmatprep.subr.bf16.mxu1 %v10043_v40  ;;  %v10089_v17 = vpack.c.bf16 %v1814_v41, %v1810_v53  ;;  %v10097_v60 = vmul.f32 %v7869_v50, %v1747_v29  ;;  %v2536_v53 = vld [vmem:[%s12469_s3 + $0xc8] sm:$0xff]  ;;  %v2559_v50 = vld [vmem:[%s12469_s3 + $0x180] sm:$0xff] }
 0x3c8   :  { %v2563_v29 = vld [vmem:[%s12469_s3 + $0x1a0] sm:$0xff] }
 0x3c9   :  { %12791 = vst [vmem:[#allocation48_spill] sm:$0xff] %v10097_v60 }
 0x3ca   :  { %6694 = vmatpush1.bf16.msra.mxu0 %v10065_v52  ;;  %6726 = vmatpush1.bf16.msra.mxu1 %v10067_v35 }
 0x3cb   :  { %6696 = vmatprep.subr.bf16.mxu0 %v10074_v30  ;;  %6728 = vmatprep.subr.bf16.mxu1 %v10076_v22 }
 0x3ce   :  { %6698 = vmatpush1.bf16.msra.mxu0 %v10089_v17  ;;  %6730 = vmatpush1.bf16.msra.mxu1 %v10091_v59 }
 0x3cf   :  { %6732 = vmatprep.subr.bf16.mxu0 %v9285_v4  ;;  %6764 = vmatprep.subr.bf16.mxu1 %v9287_v8  ;;  %v2540_v4 = vld [vmem:[%s12469_s3 + $0xe8] sm:$0xff] }
 0x3d0   :  { %v10119_v8 = vpack.c.bf16 %v2540_v4, %v2536_v53  ;;  %v2572_v53 = vld [vmem:[%s12469_s3 + $0x1e8] sm:$0xff] }
 0x3d1   :  { %2321 = vmatmul.mubr.f32.vlgmr.msra.gmra.mrb[20].mxu0 %v10097_v60  ;;  %2392 = vmatmul.mubr.f32.vlgmr.msra.gmra.mrb[22].mxu1 %v10097_v60  ;;  %v3480_v60 = vld [vmem:[%s12472_s4 + $0x1a0] sm:$0xff] }
 0x3d2   :  { %6734 = vmatpush1.bf16.msra.mxu0 %v9309_v44  ;;  %6766 = vmatpush1.bf16.msra.mxu1 %v9311_v24  ;;  %v2535_v44 = vld [vmem:[%s12469_s3 + $0xc0] sm:$0xff] }
 0x3d3   :  { %6736 = vmatprep.subr.bf16.mxu0 %v9323_v16  ;;  %6768 = vmatprep.subr.bf16.mxu1 %v9325_v1  ;;  %v2539_v24 = vld [vmem:[%s12469_s3 + $0xe0] sm:$0xff]  ;;  %v2544_v16 = vld [vmem:[%s12469_s3 + $0x108] sm:$0xff] }
 0x3d4   :  { %2639 = vmatprep.mubr.f32.mxu0 %v12695_v27  ;;  %2710 = vmatprep.mubr.f32.mxu1 %v12695_v27  ;;  %v2548_v1 = vld [vmem:[%s12469_s3 + $0x128] sm:$0xff] }
 0x3d6   :  { %6738 = vmatpush1.bf16.msra.mxu0 %v9349_v6  ;;  %6770 = vmatpush1.bf16.msra.mxu1 %v9351_v43  ;;  %v10135_v6 = vpack.c.bf16 %v2539_v24, %v2535_v44  ;;  %v10139_v43 = vpack.c.bf16 %v2548_v1, %v2544_v16  ;;  %v2567_v44 = vld [vmem:[%s12469_s3 + $0x1c0] sm:$0xff]  ;;  %v12809_v16 = vld [vmem:[#allocation25_spill] sm:$0xff]  ;;  %v12810_v1 = vld [vmem:[#allocation26_spill] sm:$0xff] }
 0x3d7   :  { %6740 = vmatprep.subr.bf16.mxu0 %v9358_v18  ;;  %6772 = vmatprep.subr.bf16.mxu1 %v9360_v25  ;;  %v2543_v18 = vld [vmem:[%s12469_s3 + $0x100] sm:$0xff] }
 0x3d8   :  { %v2547_v25 = vld [vmem:[%s12469_s3 + $0x120] sm:$0xff] }
 0x3d9   :  { %v2571_v24 = vld [vmem:[%s12469_s3 + $0x1e0] sm:$0xff] }
 0x3da   :  { %6742 = vmatpush1.bf16.msra.mxu0 %v9381_v7  ;;  %6774 = vmatpush1.bf16.msra.mxu1 %v9383_v12  ;;  %v2552_v7 = vld [vmem:[%s12469_s3 + $0x148] sm:$0xff] }
 0x3db   :  { %6744 = vmatprep.subr.bf16.mxu0 %v10119_v8  ;;  %6776 = vmatprep.subr.bf16.mxu1 %v9387_v14  ;;  %v2556_v12 = vld [vmem:[%s12469_s3 + $0x168] sm:$0xff]  ;;  %v10155_v14 = vpack.c.bf16 %v2547_v25, %v2543_v18  ;;  %v12811_v18 = vld [vmem:[#allocation27_spill] sm:$0xff]  ;;  %v12812_v25 = vld [vmem:[#allocation28_spill] sm:$0xff] }
 0x3dc   :  { %v10159_v41 = vpack.c.bf16 %v2556_v12, %v2552_v7  ;;  %v12813_v7 = vld [vmem:[#allocation29_spill] sm:$0xff]  ;;  %v10256_v12 = vld [vmem:[%s12476_s6] sm:$0xf] }
 0x3de   :  { %6746 = vmatpush1.bf16.msra.mxu0 %v10135_v6  ;;  %6778 = vmatpush1.bf16.msra.mxu1 %v9403_v55  ;;  %v2560_v55 = vld [vmem:[%s12469_s3 + $0x188] sm:$0xff] }
 0x3df   :  { %6748 = vmatprep.subr.bf16.mxu0 %v10139_v43  ;;  %6780 = vmatprep.subr.bf16.mxu1 %v9407_v36  ;;  %v10175_v36 = vpack.c.bf16 %v2555_v3, %v2551_v32  ;;  %v10179_v5 = vpack.c.bf16 %v2564_v23, %v2560_v55  ;;  %v12814_v32 = vld [vmem:[#allocation15_spill] sm:$0xff]  ;;  %v12815_v55 = vld [vmem:[#allocation16_spill] sm:$0xff] }
 0x3e0   :  { %v2403_v3 = vrot.slane %v10256_v12, %v12814_v32  ;;  %v2407_v23 = vrot.slane %v10256_v12, %v12815_v55 }
 0x3e2   :  { %6750 = vmatpush1.bf16.msra.mxu0 %v10155_v14  ;;  %6782 = vmatpush1.bf16.msra.mxu1 %v9423_v28  ;;  %v2568_v28 = vld [vmem:[%s12469_s3 + $0x1c8] sm:$0xff] }
 0x3e3   :  { %6752 = vmatprep.subr.bf16.mxu0 %v10159_v41  ;;  %6784 = vmatprep.subr.bf16.mxu1 %v9427_v47  ;;  %v10195_v47 = vpack.c.bf16 %v2563_v29, %v2559_v50  ;;  %v10199_v4 = vpack.c.bf16 %v2572_v53, %v2568_v28  ;;  %v12816_v53 = vld [vmem:[#allocation19_spill] sm:$0xff] }
 0x3e6   :  { %6754 = vmatpush1.bf16.msra.mxu0 %v10175_v36  ;;  %6786 = vmatpush1.bf16.msra.mxu1 %v9443_v42  ;;  %v10209_v42 = vpack.c.bf16 %v2571_v24, %v2567_v44  ;;  %v2411_v44 = vrot.slane %v10256_v12, %v12816_v53 }
 0x3e7   :  { %6756 = vmatprep.subr.bf16.mxu0 %v10179_v5  ;;  %6788 = vmatprep.subr.bf16.mxu1 %v9447_v34  ;;  %v12792_v34 = vld [vmem:[#allocation5_spill] sm:$0xff] }
 0x3ea   :  { %6758 = vmatpush1.bf16.msra.mxu0 %v10195_v47  ;;  %6790 = vmatpush1.bf16.msra.mxu1 %v9463_v48  ;;  %v12793_v48 = vld [vmem:[#allocation6_spill] sm:$0xff] }
 0x3eb   :  { %6760 = vmatprep.subr.bf16.mxu0 %v10199_v4  ;;  %6792 = vmatprep.subr.bf16.mxu1 %v9467_v10  ;;  %v12794_v10 = vld [vmem:[#allocation7_spill] sm:$0xff] }
 0x3ee   :  { %6762 = vmatpush1.bf16.msra.mxu0 %v10209_v42  ;;  %6794 = vmatpush1.bf16.msra.mxu1 %v9477_v51  ;;  %v12795_v51 = vld [vmem:[#allocation8_spill] sm:$0xff] }
 0x3ef   :  { %6796 = vmatprep.subr.bf16.mxu0 %v9496_v62  ;;  %6828 = vmatprep.subr.bf16.mxu1 %v9507_v33  ;;  %v12796_v62 = vld [vmem:[#allocation9_spill] sm:$0xff]  ;;  %v12797_v33 = vld [vmem:[#allocation10_spill] sm:$0xff] }
 0x3f1   :  { %2640 = vmatmul.mubr.f32.vlgmr.msra.gmra.mrb[6].mxu0 %v9851_v58  ;;  %2711 = vmatmul.mubr.f32.vlgmr.msra.gmra.mrb[6].mxu1 %v9851_v58  ;;  %v12808_v58 = vld [vmem:[#allocation24_spill] sm:$0xff] }
 0x3f2   :  { %6798 = vmatpush1.bf16.msra.mxu0 %v9509_v39  ;;  %6830 = vmatpush1.bf16.msra.mxu1 %v9518_v0  ;;  %v12798_v39 = vld [vmem:[#allocation11_spill] sm:$0xff]  ;;  %v12799_v0 = vld [vmem:[#allocation12_spill] sm:$0xff] }
 0x3f3   :  { %6800 = vmatprep.subr.bf16.mxu0 %v9532_v49  ;;  %6832 = vmatprep.subr.bf16.mxu1 %v9543_v21  ;;  %v12800_v49 = vld [vmem:[#allocation13_spill] sm:$0xff]  ;;  %v12801_v21 = vld [vmem:[#allocation14_spill] sm:$0xff] }
 0x3f4   :  { %2867 = vmatprep.mubr.f32.mxu0 %v12695_v27  ;;  %2938 = vmatprep.mubr.f32.mxu1 %v12695_v27 }
 0x3f6   :  { %6802 = vmatpush1.bf16.msra.mxu0 %v9545_v26  ;;  %6834 = vmatpush1.bf16.msra.mxu1 %v9554_v31  ;;  %v12802_v26 = vld [vmem:[#allocation17_spill] sm:$0xff]  ;;  %v12803_v31 = vld [vmem:[#allocation18_spill] sm:$0xff] }
 0x3f7   :  { %6804 = vmatprep.subr.bf16.mxu0 %v9568_v2  ;;  %6836 = vmatprep.subr.bf16.mxu1 %v9579_v57  ;;  %v12804_v2 = vld [vmem:[#allocation21_spill] sm:$0xff]  ;;  %v12805_v57 = vld [vmem:[#allocation22_spill] sm:$0xff] }
 0x3fa   :  { %6806 = vmatpush1.bf16.msra.mxu0 %v9581_v15  ;;  %6838 = vmatpush1.bf16.msra.mxu1 %v9590_v9  ;;  %v12806_v15 = vld [vmem:[#allocation23_spill] sm:$0xff]  ;;  %v12807_v9 = vld [vmem:[#allocation20_spill] sm:$0xff] }
 0x3fb   :  { %6808 = vmatprep.subr.bf16.mxu0 %v12792_v34  ;;  %6840 = vmatprep.subr.bf16.mxu1 %v12793_v48 }
 0x3fe   :  { %6810 = vmatpush1.bf16.msra.mxu0 %v12794_v10  ;;  %6842 = vmatpush1.bf16.msra.mxu1 %v12795_v51 }
 0x3ff   :  { %6812 = vmatprep.subr.bf16.mxu0 %v12796_v62  ;;  %6844 = vmatprep.subr.bf16.mxu1 %v12797_v33 }
 0x402   :  { %6814 = vmatpush1.bf16.msra.mxu0 %v12798_v39  ;;  %6846 = vmatpush1.bf16.msra.mxu1 %v12799_v0 }
 0x403   :  { %6816 = vmatprep.subr.bf16.mxu0 %v12800_v49  ;;  %6848 = vmatprep.subr.bf16.mxu1 %v12801_v21 }
 0x406   :  { %6818 = vmatpush1.bf16.msra.mxu0 %v12802_v26  ;;  %6850 = vmatpush1.bf16.msra.mxu1 %v12803_v31 }
 0x407   :  { %6820 = vmatprep.subr.bf16.mxu0 %v12804_v2  ;;  %6852 = vmatprep.subr.bf16.mxu1 %v12805_v57 }
 0x40a   :  { %6822 = vmatpush1.bf16.msra.mxu0 %v12806_v15  ;;  %6854 = vmatpush1.bf16.msra.mxu1 %v12807_v9 }
 0x40b   :  { %6824 = vmatprep.subr.bf16.mxu0 %v12808_v58  ;;  %6856 = vmatprep.subr.bf16.mxu1 %v12809_v16 }
 0x40e   :  { %6826 = vmatpush1.bf16.msra.mxu0 %v12810_v1  ;;  %6858 = vmatpush1.bf16.msra.mxu1 %v12811_v18 }
 0x40f   :  { %6860 = vmatprep.subr.bf16.mxu0 %v12812_v25  ;;  %6892 = vmatprep.subr.bf16.mxu1 %v12813_v7 }
 0x4a4   :  { %v2322_v50 = vpop.f32.mrb[20].mxu0  ;;  %v2393_v29 = vpop.f32.mrb[22].mxu1 }
 0x4a5   :  { %v2420_v28 = vadd.f32 %v2403_v3, %v2322_v50  ;;  %v2324_v24 = vpop.f32.mrb[21].mxu0  ;;  %v2395_v34 = vpop.f32.mrb[23].mxu1  ;;  %v2422_v62 = vadd.f32 %v2411_v44, %v2393_v29 }
 0x4a6   :  { %v2421_v48 = vadd.f32 %v2407_v23, %v2324_v24 }
 0x4a7   :  { %v2424_v10 = vmul.f32 0.5, %v2420_v28 }
 0x4a8   :  { %v2428_v51 = vmul.f32 0.5, %v2421_v48 }
 0x4a9   :  { %7870 = vtanh.f32 %v2424_v10 }
 0x4aa   :  { %7872 = vtanh.f32 %v2428_v51 }
 0x4ab   :  { %7874 = vtanh.f32 %v2422_v62 }
 0x4b3   :  { %v7871_v33 = vpop.eup %7870 }
 0x4b4   :  { %v7873_v39 = vpop.eup %7872  ;;  %v2426_v0 = vadd.f32 1.0, %v7871_v33 }
 0x4b5   :  { %v2430_v49 = vadd.f32 1.0, %v7873_v39  ;;  %v7875_v26 = vpop.eup %7874 }
 0x4b6   :  { %v2427_v21 = vmul.f32 0.5, %v2426_v0 }
 0x4b7   :  { %v2431_v31 = vmul.f32 0.5, %v2430_v49 }
 0x4b8   :  { %v2438_v2 = vmul.f32 %v7875_v26, %v2427_v21 }
 0x4b9   :  { %v2437_v57 = vmul.f32 %v2431_v31, %v9807_v61 }
 0x4bb   :  { %v10265_v15 = vadd.f32 %v2438_v2, %v2437_v57  ;;  %v2415_v2 = vrot.slane %v10256_v12, %v12728_v37  ;;  %v12819_v12 = vld [vmem:[#allocation32_spill] sm:$0xff] }
 0x4bd   :  { %v2423_v57 = vadd.f32 %v2415_v2, %v2395_v34  ;;  %v12825_v34 = vld [vmem:[#allocation38_spill] sm:$0xff] }
 0x4c4   :  { %v2641_v9 = vpop.f32.mrb[6].mxu0  ;;  %v2712_v58 = vpop.f32.mrb[6].mxu1 }
 0x4c5   :  { %v7731_v16 = vadd.f32 %v2641_v9, %v12723_v56  ;;  %v2643_v1 = vpop.f32.mrb[7].mxu0  ;;  %v2714_v18 = vpop.f32.mrb[7].mxu1  ;;  %v7747_v23 = vadd.f32 %v2712_v58, %v12725_v13  ;;  %v12818_v9 = vld [vmem:[#allocation31_spill] sm:$0xff]  ;;  %v12820_v58 = vld [vmem:[#allocation33_spill] sm:$0xff] }
 0x4c6   :  { %v7732_v25 = vadd.f32 %v2643_v1, %v12724_v63  ;;  %v7748_v50 = vadd.f32 %v2714_v18, %v12726_v19  ;;  %v12822_v1 = vld [vmem:[#allocation35_spill] sm:$0xff] }
 0x4c7   :  { %v2721_v7 = vmul.f32 0.5, %v7731_v16  ;;  %v12821_v16 = vld [vmem:[#allocation34_spill] sm:$0xff]  ;;  %v12826_v18 = vld [vmem:[#allocation39_spill] sm:$0xff] }
 0x4c8   :  { %v2725_v3 = vmul.f32 0.5, %v7732_v25  ;;  %v2730_v61 = vmul.f32 0.5, %v7748_v50  ;;  %v12827_v25 = vld [vmem:[#allocation40_spill] sm:$0xff] }
 0x4c9   :  { %7876 = vtanh.f32 %v2721_v7  ;;  %v12828_v7 = vld [vmem:[#allocation41_spill] sm:$0xff]  ;;  %v12831_v50 = vld [vmem:[#allocation44_spill] sm:$0xff] }
 0x4ca   :  { %7878 = vtanh.f32 %v2725_v3  ;;  %v12829_v3 = vld [vmem:[#allocation42_spill] sm:$0xff] }
 0x4cb   :  { %7880 = vtanh.f32 %v7747_v23  ;;  %v12830_v23 = vld [vmem:[#allocation43_spill] sm:$0xff] }
 0x4cc   :  { %7882 = vtanh.f32 %v2730_v61  ;;  %v12832_v61 = vld [vmem:[#allocation45_spill] sm:$0xff] }
 0x4d3   :  { %v7877_v29 = vpop.eup %7876 }
 0x4d4   :  { %v7879_v28 = vpop.eup %7878  ;;  %v2723_v44 = vadd.f32 1.0, %v7877_v29  ;;  %v12833_v29 = vld [vmem:[#allocation46_spill] sm:$0xff] }
 0x4d5   :  { %v2727_v24 = vadd.f32 1.0, %v7879_v28  ;;  %v7881_v10 = vpop.eup %7880 }
 0x4d6   :  { %v2724_v48 = vmul.f32 0.5, %v2723_v44  ;;  %v7883_v0 = vpop.eup %7882  ;;  %v12834_v44 = vld [vmem:[#allocation47_spill] sm:$0xff] }
 0x4d7   :  { %v2728_v51 = vmul.f32 0.5, %v2727_v24  ;;  %v2732_v49 = vadd.f32 1.0, %v7883_v0  ;;  %v3201_v24 = vld [vmem:[%s12469_s3 + $0x8] sm:$0xff] }
 0x4d8   :  { %v2735_v62 = vmul.f32 %v7881_v10, %v2724_v48  ;;  %v3205_v48 = vld [vmem:[%s12469_s3 + $0x28] sm:$0xff]  ;;  %v3203_v10 = vld [vmem:[%s12469_s3 + $0x18] sm:$0xff] }
 0x4d9   :  { %v2734_v33 = vmul.f32 %v2728_v51, %v9814_v11  ;;  %v2733_v21 = vmul.f32 0.5, %v2732_v49  ;;  %v12817_v11 = vld [vmem:[#allocation30_spill] sm:$0xff]  ;;  %v3209_v0 = vld [vmem:[%s12469_s3 + $0x48] sm:$0xff] }
 0x4db   :  { %v10272_v39 = vadd.f32 %v2735_v62, %v2734_v33  ;;  %v10330_v62 = vpack.c.bf16 %v3205_v48, %v3201_v24 }
 0x4dd   :  { %7884 = vtanh.f32 %v10272_v39 }
 0x4e7   :  { %v7885_v26 = vpop.eup %7884 }
 0x4e8   :  { %v10275_v31 = vmul.f32 %v7885_v26, %v2733_v21  ;;  %v3215_v21 = vld [vmem:[%s12469_s3 + $0x78] sm:$0xff] }
 0x4ea   :  { %2868 = vmatmul.mubr.f32.vlgmr.msra.gmra.mrb[22].mxu0 %v10275_v31  ;;  %2939 = vmatmul.mubr.f32.vlgmr.msra.gmra.mrb[24].mxu1 %v10275_v31 }
 0x4eb   :  { %6862 = vmatpush1.bf16.msra.mxu0 %v9841_v38  ;;  %6894 = vmatpush1.bf16.msra.mxu1 %v9843_v46  ;;  %v2433_v38 = vmul.f32 0.5, %v2423_v57  ;;  %v12823_v46 = vld [vmem:[#allocation36_spill] sm:$0xff] }
 0x4ec   :  { %6864 = vmatprep.subr.bf16.mxu0 %v9853_v45  ;;  %6896 = vmatprep.subr.bf16.mxu1 %v12817_v11  ;;  %v12824_v45 = vld [vmem:[#allocation37_spill] sm:$0xff]  ;;  %v3208_v57 = vld [vmem:[%s12469_s3 + $0x40] sm:$0xff] }
 0x4ed   :  { %3009 = vmatprep.mubr.f32.mxu0 %v12695_v27  ;;  %3080 = vmatprep.mubr.f32.mxu1 %v12695_v27  ;;  %7886 = vtanh.f32 %v2433_v38  ;;  %v3217_v38 = vld [vmem:[%s12469_s3 + $0x88] sm:$0xff] }
 0x4ee   :  { %7888 = vtanh.f32 %v10265_v15 }
 0x4ef   :  { %6866 = vmatpush1.bf16.msra.mxu0 %v12818_v9  ;;  %6898 = vmatpush1.bf16.msra.mxu1 %v12819_v12  ;;  %v3212_v9 = vld [vmem:[%s12469_s3 + $0x60] sm:$0xff] }
 0x4f0   :  { %6868 = vmatprep.subr.bf16.mxu0 %v12820_v58  ;;  %6900 = vmatprep.subr.bf16.mxu1 %v12821_v16  ;;  %v3210_v58 = vld [vmem:[%s12469_s3 + $0x50] sm:$0xff] }
 0x4f1   :  { %v3214_v16 = vld [vmem:[%s12469_s3 + $0x70] sm:$0xff] }
 0x4f3   :  { %6870 = vmatpush1.bf16.msra.mxu0 %v12822_v1  ;;  %6902 = vmatpush1.bf16.msra.mxu1 %v12823_v46  ;;  %v3221_v1 = vld [vmem:[%s12469_s3 + $0xa8] sm:$0xff]  ;;  %v3219_v46 = vld [vmem:[%s12469_s3 + $0x98] sm:$0xff] }
 0x4f4   :  { %6872 = vmatprep.subr.bf16.mxu0 %v12824_v45  ;;  %6904 = vmatprep.subr.bf16.mxu1 %v12825_v34  ;;  %v3223_v45 = vld [vmem:[%s12469_s3 + $0xb8] sm:$0xff]  ;;  %v10394_v34 = vpack.c.bf16 %v3212_v9, %v3208_v57 }
 0x4f7   :  { %6874 = vmatpush1.bf16.msra.mxu0 %v12826_v18  ;;  %6906 = vmatpush1.bf16.msra.mxu1 %v12827_v25  ;;  %v7887_v28 = vpop.eup %7886  ;;  %v10396_v18 = vpack.c.bf16 %v3214_v16, %v3210_v58  ;;  %v3216_v25 = vld [vmem:[%s12469_s3 + $0x80] sm:$0xff]  ;;  %v3250_v58 = vld [vmem:[%s12469_s3 + $0x190] sm:$0xff] }
 0x4f8   :  { %6876 = vmatprep.subr.bf16.mxu0 %v12828_v7  ;;  %6908 = vmatprep.subr.bf16.mxu1 %v12829_v3  ;;  %v2435_v51 = vadd.f32 1.0, %v7887_v28  ;;  %v7889_v49 = vpop.eup %7888  ;;  %v10403_v7 = vpack.c.bf16 %v3221_v1, %v3217_v38  ;;  %v10405_v3 = vpack.c.bf16 %v3223_v45, %v3219_v46  ;;  %v3231_v28 = vld [vmem:[%s12469_s3 + $0xf8] sm:$0xff]  ;;  %v3254_v16 = vld [vmem:[%s12469_s3 + $0x1b0] sm:$0xff] }
 0x4f9   :  { %v10508_v38 = vpack.c.bf16 %v3254_v16, %v3250_v58  ;;  %v3258_v46 = vld [vmem:[%s12469_s3 + $0x1d0] sm:$0xff]  ;;  %v3445_v16 = vld [vmem:[%s12472_s4 + $0x88] sm:$0xff] }
 0x4fa   :  { %v2436_v26 = vmul.f32 0.5, %v2435_v51  ;;  %v3235_v51 = vld [vmem:[%s12469_s3 + $0x118] sm:$0xff]  ;;  %v3262_v45 = vld [vmem:[%s12469_s3 + $0x1f0] sm:$0xff] }
 0x4fb   :  { %6878 = vmatpush1.bf16.msra.mxu0 %v12830_v23  ;;  %6910 = vmatpush1.bf16.msra.mxu1 %v12831_v50  ;;  %v3220_v23 = vld [vmem:[%s12469_s3 + $0xa0] sm:$0xff]  ;;  %v3218_v50 = vld [vmem:[%s12469_s3 + $0x90] sm:$0xff] }
 0x4fc   :  { %6880 = vmatprep.subr.bf16.mxu0 %v12832_v61  ;;  %6912 = vmatprep.subr.bf16.mxu1 %v12833_v29  ;;  %v10364_v12 = vmul.f32 %v7889_v49, %v2436_v26  ;;  %v3222_v61 = vld [vmem:[%s12469_s3 + $0xb0] sm:$0xff]  ;;  %v3227_v29 = vld [vmem:[%s12469_s3 + $0xd8] sm:$0xff] }
 0x4fd   :  { %v10428_v24 = vpack.c.bf16 %v3222_v61, %v3218_v50  ;;  %v10432_v48 = vpack.c.bf16 %v3231_v28, %v3227_v29  ;;  %v3243_v49 = vld [vmem:[%s12469_s3 + $0x158] sm:$0xff]  ;;  %v3246_v26 = vld [vmem:[%s12469_s3 + $0x170] sm:$0xff] }
 0x4fe   :  { %12835 = vst [vmem:[#allocation5_spill] sm:$0xff] %v10364_v12  ;;  %v3430_v29 = vld [vmem:[%s12472_s4 + $0x10] sm:$0xff] }
 0x4ff   :  { %6882 = vmatpush1.bf16.msra.mxu0 %v10029_v20  ;;  %6914 = vmatpush1.bf16.msra.mxu1 %v12834_v44  ;;  %v3207_v20 = vld [vmem:[%s12469_s3 + $0x38] sm:$0xff]  ;;  %v10426_v44 = vpack.c.bf16 %v3220_v23, %v3216_v25  ;;  %v3428_v25 = vld [vmem:[%s12472_s4] sm:$0xff]  ;;  %v3434_v28 = vld [vmem:[%s12472_s4 + $0x30] sm:$0xff] }
 0x500   :  { %6884 = vmatprep.subr.bf16.mxu0 %v10041_v54  ;;  %6916 = vmatprep.subr.bf16.mxu1 %v10043_v40  ;;  %v3200_v54 = vld [vmem:[%s12469_s3] sm:$0xff]  ;;  %v10332_v33 = vpack.c.bf16 %v3207_v20, %v3203_v10  ;;  %v3226_v10 = vld [vmem:[%s12469_s3 + $0xd0] sm:$0xff] }
 0x501   :  { %v3204_v40 = vld [vmem:[%s12469_s3 + $0x20] sm:$0xff]  ;;  %v3230_v20 = vld [vmem:[%s12469_s3 + $0xf0] sm:$0xff] }
 0x502   :  { %v10354_v2 = vpack.c.bf16 %v3204_v40, %v3200_v54  ;;  %v3239_v54 = vld [vmem:[%s12469_s3 + $0x138] sm:$0xff]  ;;  %v10448_v40 = vpack.c.bf16 %v3230_v20, %v3226_v10  ;;  %v3432_v23 = vld [vmem:[%s12472_s4 + $0x20] sm:$0xff]  ;;  %v10563_v10 = vpack.c.bf16 %v3434_v28, %v3430_v29  ;;  %v3437_v20 = vld [vmem:[%s12472_s4 + $0x48] sm:$0xff] }
 0x503   :  { %6886 = vmatpush1.bf16.msra.mxu0 %v10065_v52  ;;  %6918 = vmatpush1.bf16.msra.mxu1 %v10067_v35  ;;  %v3202_v35 = vld [vmem:[%s12469_s3 + $0x10] sm:$0xff]  ;;  %v10554_v61 = vpack.c.bf16 %v3432_v23, %v3428_v25  ;;  %v3453_v28 = vld [vmem:[%s12472_s4 + $0xc8] sm:$0xff] }
 0x504   :  { %6888 = vmatprep.subr.bf16.mxu0 %v10074_v30  ;;  %6920 = vmatprep.subr.bf16.mxu1 %v10076_v22  ;;  %v3206_v52 = vld [vmem:[%s12469_s3 + $0x30] sm:$0xff]  ;;  %v3213_v22 = vld [vmem:[%s12469_s3 + $0x68] sm:$0xff]  ;;  %v3211_v30 = vld [vmem:[%s12469_s3 + $0x58] sm:$0xff] }
 0x505   :  { %v10356_v11 = vpack.c.bf16 %v3206_v52, %v3202_v35  ;;  %v10452_v35 = vpack.c.bf16 %v3239_v54, %v3235_v51  ;;  %v3234_v52 = vld [vmem:[%s12469_s3 + $0x110] sm:$0xff]  ;;  %v3441_v51 = vld [vmem:[%s12472_s4 + $0x68] sm:$0xff]  ;;  %v3439_v54 = vld [vmem:[%s12472_s4 + $0x58] sm:$0xff] }
 0x506   :  { %v3446_v25 = vld [vmem:[%s12472_s4 + $0x90] sm:$0xff] }
 0x507   :  { %6890 = vmatpush1.bf16.msra.mxu0 %v10089_v17  ;;  %6922 = vmatpush1.bf16.msra.mxu1 %v10091_v59  ;;  %v10368_v17 = vpack.c.bf16 %v3213_v22, %v3209_v0  ;;  %v10370_v59 = vpack.c.bf16 %v3215_v21, %v3211_v30  ;;  %v3238_v0 = vld [vmem:[%s12469_s3 + $0x130] sm:$0xff] }
 0x508   :  { %6924 = vmatprep.subr.bf16.mxu0 %v10330_v62  ;;  %6956 = vmatprep.subr.bf16.mxu1 %v10332_v33  ;;  %v10468_v22 = vpack.c.bf16 %v3238_v0, %v3234_v52  ;;  %v3242_v21 = vld [vmem:[%s12469_s3 + $0x150] sm:$0xff]  ;;  %v10577_v52 = vpack.c.bf16 %v3441_v51, %v3437_v20  ;;  %v3443_v0 = vld [vmem:[%s12472_s4 + $0x78] sm:$0xff]  ;;  %v3457_v20 = vld [vmem:[%s12472_s4 + $0xe8] sm:$0xff] }
 0x509   :  { %v10488_v57 = vpack.c.bf16 %v3246_v26, %v3242_v21  ;;  %v10588_v21 = vpack.c.bf16 %v3443_v0, %v3439_v54  ;;  %v3450_v23 = vld [vmem:[%s12472_s4 + $0xb0] sm:$0xff]  ;;  %v3455_v51 = vld [vmem:[%s12472_s4 + $0xd8] sm:$0xff]  ;;  %v10649_v54 = vpack.c.bf16 %v3457_v20, %v3453_v28  ;;  %v3460_v28 = vld [vmem:[%s12472_s4 + $0x100] sm:$0xff] }
 0x50a   :  { %3010 = vmatmul.mubr.f32.vlgmr.msra.gmra.mrb[22].mxu0 %v10364_v12  ;;  %3081 = vmatmul.mubr.f32.vlgmr.msra.gmra.mrb[24].mxu1 %v10364_v12  ;;  %v10635_v29 = vpack.c.bf16 %v3450_v23, %v3446_v25  ;;  %v3459_v0 = vld [vmem:[%s12472_s4 + $0xf8] sm:$0xff]  ;;  %v3464_v20 = vld [vmem:[%s12472_s4 + $0x120] sm:$0xff] }
 0x50b   :  { %6926 = vmatpush1.bf16.msra.mxu0 %v10354_v2  ;;  %6958 = vmatpush1.bf16.msra.mxu1 %v10356_v11  ;;  %12836 = vst [vmem:[#allocation6_spill] sm:$0xff] %v10649_v54  ;;  %v3467_v23 = vld [vmem:[%s12472_s4 + $0x138] sm:$0xff] }
 0x50c   :  { %6928 = vmatprep.subr.bf16.mxu0 %v10368_v17  ;;  %6960 = vmatprep.subr.bf16.mxu1 %v10370_v59 }
 0x50d   :  { %3328 = vmatprep.mubr.f32.mxu0 %v12695_v27  ;;  %3399 = vmatprep.mubr.f32.mxu1 %v12695_v27 }
 0x50f   :  { %6930 = vmatpush1.bf16.msra.mxu0 %v10394_v34  ;;  %6962 = vmatpush1.bf16.msra.mxu1 %v10396_v18 }
 0x510   :  { %6932 = vmatprep.subr.bf16.mxu0 %v10403_v7  ;;  %6964 = vmatprep.subr.bf16.mxu1 %v10405_v3 }
 0x513   :  { %6934 = vmatpush1.bf16.msra.mxu0 %v10426_v44  ;;  %6966 = vmatpush1.bf16.msra.mxu1 %v10428_v24 }
 0x514   :  { %6936 = vmatprep.subr.bf16.mxu0 %v10119_v8  ;;  %6968 = vmatprep.subr.bf16.mxu1 %v10432_v48  ;;  %v3247_v8 = vld [vmem:[%s12469_s3 + $0x178] sm:$0xff] }
 0x515   :  { %v10472_v30 = vpack.c.bf16 %v3247_v8, %v3243_v49  ;;  %v3436_v49 = vld [vmem:[%s12472_s4 + $0x40] sm:$0xff] }
 0x516   :  { %v3440_v8 = vld [vmem:[%s12472_s4 + $0x60] sm:$0xff] }
 0x517   :  { %6938 = vmatpush1.bf16.msra.mxu0 %v10135_v6  ;;  %6970 = vmatpush1.bf16.msra.mxu1 %v10448_v40  ;;  %v3251_v6 = vld [vmem:[%s12469_s3 + $0x198] sm:$0xff]  ;;  %v10590_v26 = vpack.c.bf16 %v3440_v8, %v3436_v49  ;;  %v3452_v49 = vld [vmem:[%s12472_s4 + $0xc0] sm:$0xff] }
 0x518   :  { %6940 = vmatprep.subr.bf16.mxu0 %v10139_v43  ;;  %6972 = vmatprep.subr.bf16.mxu1 %v10452_v35  ;;  %v3255_v43 = vld [vmem:[%s12469_s3 + $0x1b8] sm:$0xff]  ;;  %v3456_v8 = vld [vmem:[%s12472_s4 + $0xe0] sm:$0xff] }
 0x519   :  { %v10492_v9 = vpack.c.bf16 %v3255_v43, %v3251_v6  ;;  %v3438_v6 = vld [vmem:[%s12472_s4 + $0x50] sm:$0xff] }
 0x51a   :  { %v3442_v43 = vld [vmem:[%s12472_s4 + $0x70] sm:$0xff] }
 0x51b   :  { %6942 = vmatpush1.bf16.msra.mxu0 %v10155_v14  ;;  %6974 = vmatpush1.bf16.msra.mxu1 %v10468_v22  ;;  %v3259_v14 = vld [vmem:[%s12469_s3 + $0x1d8] sm:$0xff]  ;;  %v10599_v58 = vpack.c.bf16 %v3442_v43, %v3438_v6  ;;  %v10660_v6 = vpack.c.bf16 %v3459_v0, %v3455_v51  ;;  %v10662_v43 = vpack.c.bf16 %v3456_v8, %v3452_v49  ;;  %v3462_v49 = vld [vmem:[%s12472_s4 + $0x110] sm:$0xff] }
 0x51c   :  { %6944 = vmatprep.subr.bf16.mxu0 %v10159_v41  ;;  %6976 = vmatprep.subr.bf16.mxu1 %v10472_v30  ;;  %v3263_v41 = vld [vmem:[%s12469_s3 + $0x1f8] sm:$0xff]  ;;  %v10698_v0 = vpack.c.bf16 %v3464_v20, %v3460_v28  ;;  %v3466_v8 = vld [vmem:[%s12472_s4 + $0x130] sm:$0xff]  ;;  %v3468_v28 = vld [vmem:[%s12472_s4 + $0x140] sm:$0xff] }
 0x51d   :  { %v10512_v1 = vpack.c.bf16 %v3263_v41, %v3259_v14  ;;  %v3449_v14 = vld [vmem:[%s12472_s4 + $0xa8] sm:$0xff]  ;;  %v3447_v41 = vld [vmem:[%s12472_s4 + $0x98] sm:$0xff]  ;;  %12837 = vst [vmem:[#allocation7_spill] sm:$0xff] %v10660_v6  ;;  %12838 = vst [vmem:[#allocation8_spill] sm:$0xff] %v10662_v43 }
 0x51e   :  { %12842 = vst [vmem:[#allocation12_spill] sm:$0xff] %v10698_v0  ;;  %v3472_v20 = vld [vmem:[%s12472_s4 + $0x160] sm:$0xff] }
 0x51f   :  { %6946 = vmatpush1.bf16.msra.mxu0 %v10175_v36  ;;  %6978 = vmatpush1.bf16.msra.mxu1 %v10488_v57  ;;  %v10522_v36 = vpack.c.bf16 %v3262_v45, %v3258_v46  ;;  %v10613_v46 = vpack.c.bf16 %v3449_v14, %v3445_v16  ;;  %v3451_v45 = vld [vmem:[%s12472_s4 + $0xb8] sm:$0xff]  ;;  %v3454_v16 = vld [vmem:[%s12472_s4 + $0xd0] sm:$0xff] }
 0x520   :  { %6948 = vmatprep.subr.bf16.mxu0 %v10179_v5  ;;  %6980 = vmatprep.subr.bf16.mxu1 %v10492_v9  ;;  %v3429_v5 = vld [vmem:[%s12472_s4 + $0x8] sm:$0xff]  ;;  %v3458_v14 = vld [vmem:[%s12472_s4 + $0xf0] sm:$0xff] }
 0x523   :  { %6950 = vmatpush1.bf16.msra.mxu0 %v10195_v47  ;;  %6982 = vmatpush1.bf16.msra.mxu1 %v10508_v38  ;;  %v3433_v47 = vld [vmem:[%s12472_s4 + $0x28] sm:$0xff] }
 0x524   :  { %6952 = vmatprep.subr.bf16.mxu0 %v10199_v4  ;;  %6984 = vmatprep.subr.bf16.mxu1 %v10512_v1  ;;  %v3431_v4 = vld [vmem:[%s12472_s4 + $0x18] sm:$0xff] }
 0x527   :  { %6954 = vmatpush1.bf16.msra.mxu0 %v10209_v42  ;;  %6986 = vmatpush1.bf16.msra.mxu1 %v10522_v36  ;;  %v10541_v42 = vpack.c.bf16 %v3433_v47, %v3429_v5  ;;  %v3444_v5 = vld [vmem:[%s12472_s4 + $0x80] sm:$0xff] }
 0x528   :  { %v3448_v47 = vld [vmem:[%s12472_s4 + $0xa0] sm:$0xff] }
 0x529   :  { %6988 = vmatprep.subr.bf16.mxu0 %v10541_v42 }
 0x52a   :  { %3329 = vmatmul.mubr.f32.vlgmr.msra.gmra.mrb[8].mxu0 %v10275_v31  ;;  %3400 = vmatmul.mubr.f32.vlgmr.msra.gmra.mrb[8].mxu1 %v10275_v31  ;;  %v3435_v31 = vld [vmem:[%s12472_s4 + $0x38] sm:$0xff] }
 0x52b   :  { %3556 = vmatprep.mubr.f32.mxu0 %v12695_v27  ;;  %3627 = vmatprep.mubr.f32.mxu1 %v12695_v27  ;;  %v10552_v50 = vpack.c.bf16 %v3435_v31, %v3431_v4  ;;  %v10624_v4 = vpack.c.bf16 %v3451_v45, %v3447_v41  ;;  %v10626_v31 = vpack.c.bf16 %v3448_v47, %v3444_v5  ;;  %v3461_v45 = vld [vmem:[%s12472_s4 + $0x108] sm:$0xff]  ;;  %v3463_v47 = vld [vmem:[%s12472_s4 + $0x118] sm:$0xff] }
 0x52c   :  { %6990 = vmatpush1.bf16.msra.mxu0 %v10554_v61  ;;  %v10671_v41 = vpack.c.bf16 %v3458_v14, %v3454_v16  ;;  %v3465_v5 = vld [vmem:[%s12472_s4 + $0x128] sm:$0xff]  ;;  %v10696_v51 = vpack.c.bf16 %v3467_v23, %v3463_v47  ;;  %v10707_v16 = vpack.c.bf16 %v3466_v8, %v3462_v49  ;;  %v3475_v23 = vld [vmem:[%s12472_s4 + $0x178] sm:$0xff]  ;;  %v10734_v8 = vpack.c.bf16 %v3472_v20, %v3468_v28 }
 0x52d   :  { %7020 = vmatprep.subr.bf16.mxu1 %v10552_v50  ;;  %6992 = vmatprep.subr.bf16.mxu0 %v10577_v52  ;;  %v10685_v25 = vpack.c.bf16 %v3465_v5, %v3461_v45  ;;  %v3469_v14 = vld [vmem:[%s12472_s4 + $0x148] sm:$0xff]  ;;  %v3471_v5 = vld [vmem:[%s12472_s4 + $0x158] sm:$0xff] }
 0x52e   :  { %7022 = vmatpush1.bf16.msra.mxu1 %v10563_v10  ;;  %12839 = vst [vmem:[#allocation9_spill] sm:$0xff] %v10671_v41  ;;  %12841 = vst [vmem:[#allocation11_spill] sm:$0xff] %v10696_v51  ;;  %v3473_v45 = vld [vmem:[%s12472_s4 + $0x168] sm:$0xff]  ;;  %v10732_v49 = vpack.c.bf16 %v3475_v23, %v3471_v5  ;;  %v3479_v28 = vld [vmem:[%s12472_s4 + $0x198] sm:$0xff] }
 0x52f   :  { %7024 = vmatprep.subr.bf16.mxu1 %v10588_v21  ;;  %12840 = vst [vmem:[#allocation10_spill] sm:$0xff] %v10685_v25  ;;  %12843 = vst [vmem:[#allocation13_spill] sm:$0xff] %v10707_v16  ;;  %v10721_v47 = vpack.c.bf16 %v3473_v45, %v3469_v14  ;;  %v3470_v14 = vld [vmem:[%s12472_s4 + $0x150] sm:$0xff]  ;;  %v3477_v5 = vld [vmem:[%s12472_s4 + $0x188] sm:$0xff] }
 0x530   :  { %6994 = vmatpush1.bf16.msra.mxu0 %v10590_v26  ;;  %12845 = vst [vmem:[#allocation17_spill] sm:$0xff] %v10732_v49  ;;  %12846 = vst [vmem:[#allocation18_spill] sm:$0xff] %v10734_v8  ;;  %v3474_v45 = vld [vmem:[%s12472_s4 + $0x170] sm:$0xff]  ;;  %v3481_v23 = vld [vmem:[%s12472_s4 + $0x1a8] sm:$0xff] }
 0x531   :  { %6996 = vmatprep.subr.bf16.mxu0 %v10613_v46  ;;  %12844 = vst [vmem:[#allocation14_spill] sm:$0xff] %v10721_v47  ;;  %v10743_v12 = vpack.c.bf16 %v3474_v45, %v3470_v14  ;;  %v10757_v20 = vpack.c.bf16 %v3481_v23, %v3477_v5  ;;  %v3483_v14 = vld [vmem:[%s12472_s4 + $0x1b8] sm:$0xff]  ;;  %v3476_v45 = vld [vmem:[%s12472_s4 + $0x180] sm:$0xff]  ;;  %v3478_v5 = vld [vmem:[%s12472_s4 + $0x190] sm:$0xff] }
 0x532   :  { %7026 = vmatpush1.bf16.msra.mxu1 %v10599_v58  ;;  %v3482_v23 = vld [vmem:[%s12472_s4 + $0x1b0] sm:$0xff] }
 0x533   :  { %7028 = vmatprep.subr.bf16.mxu1 %v10624_v4  ;;  %12847 = vst [vmem:[#allocation21_spill] sm:$0xff] %v10743_v12  ;;  %12848 = vst [vmem:[#allocation22_spill] sm:$0xff] %v10757_v20 }
 0x534   :  { %6998 = vmatpush1.bf16.msra.mxu0 %v10626_v31 }
 0x535   :  { %7000 = vmatprep.subr.bf16.mxu0 %v10649_v54 }
 0x536   :  { %7030 = vmatpush1.bf16.msra.mxu1 %v10635_v29 }
 0x537   :  { %7032 = vmatprep.subr.bf16.mxu1 %v10660_v6 }
 0x538   :  { %7002 = vmatpush1.bf16.msra.mxu0 %v10662_v43 }
 0x539   :  { %7004 = vmatprep.subr.bf16.mxu0 %v10685_v25 }
 0x53a   :  { %7034 = vmatpush1.bf16.msra.mxu1 %v10671_v41 }
 0x53b   :  { %7036 = vmatprep.subr.bf16.mxu1 %v10696_v51 }
 0x53c   :  { %7006 = vmatpush1.bf16.msra.mxu0 %v10698_v0 }
 0x53d   :  { %7008 = vmatprep.subr.bf16.mxu0 %v10721_v47 }
 0x53e   :  { %7038 = vmatpush1.bf16.msra.mxu1 %v10707_v16 }
 0x53f   :  { %7040 = vmatprep.subr.bf16.mxu1 %v10732_v49  ;;  %v10770_v49 = vpack.c.bf16 %v3480_v60, %v3476_v45  ;;  %v3485_v60 = vld [vmem:[%s12472_s4 + $0x1c8] sm:$0xff] }
 0x540   :  { %7010 = vmatpush1.bf16.msra.mxu0 %v10734_v8  ;;  %v10768_v8 = vpack.c.bf16 %v3483_v14, %v3479_v28  ;;  %v3489_v28 = vld [vmem:[%s12472_s4 + $0x1e8] sm:$0xff]  ;;  %v3487_v14 = vld [vmem:[%s12472_s4 + $0x1d8] sm:$0xff] }
 0x541   :  { %12850 = vst [vmem:[#allocation20_spill] sm:$0xff] %v10770_v49  ;;  %7012 = vmatprep.subr.bf16.mxu0 %v10757_v20  ;;  %v10793_v45 = vpack.c.bf16 %v3489_v28, %v3485_v60  ;;  %v3486_v60 = vld [vmem:[%s12472_s4 + $0x1d0] sm:$0xff] }
 0x542   :  { %7042 = vmatpush1.bf16.msra.mxu1 %v10743_v12  ;;  %12849 = vst [vmem:[#allocation23_spill] sm:$0xff] %v10768_v8  ;;  %v10779_v12 = vpack.c.bf16 %v3482_v23, %v3478_v5  ;;  %v3491_v5 = vld [vmem:[%s12472_s4 + $0x1f8] sm:$0xff]  ;;  %v3484_v23 = vld [vmem:[%s12472_s4 + $0x1c0] sm:$0xff]  ;;  %v3490_v28 = vld [vmem:[%s12472_s4 + $0x1f0] sm:$0xff] }
 0x543   :  { %7044 = vmatprep.subr.bf16.mxu1 %v10768_v8  ;;  %12852 = vst [vmem:[#allocation25_spill] sm:$0xff] %v10793_v45  ;;  %v10804_v8 = vpack.c.bf16 %v3491_v5, %v3487_v14  ;;  %v3137_v14 = vld [vmem:[%s12473_s5 + $0x28] sm:$0xff]  ;;  %v3135_v5 = vld [vmem:[%s12473_s5 + $0x18] sm:$0xff] }
 0x544   :  { %12851 = vst [vmem:[#allocation24_spill] sm:$0xff] %v10779_v12  ;;  %7014 = vmatpush1.bf16.msra.mxu0 %v10770_v49  ;;  %v3488_v49 = vld [vmem:[%s12472_s4 + $0x1e0] sm:$0xff] }
 0x545   :  { %12853 = vst [vmem:[#allocation26_spill] sm:$0xff] %v10804_v8  ;;  %v10806_v20 = vpack.c.bf16 %v3488_v49, %v3484_v23  ;;  %7016 = vmatprep.subr.bf16.mxu0 %v10793_v45  ;;  %v3133_v49 = vld [vmem:[%s12473_s5 + $0x8] sm:$0xff] }
 0x546   :  { %7046 = vmatpush1.bf16.msra.mxu1 %v10779_v12  ;;  %v10815_v12 = vpack.c.bf16 %v3490_v28, %v3486_v60  ;;  %v10829_v23 = vpack.c.bf16 %v3137_v14, %v3133_v49  ;;  %v3139_v60 = vld [vmem:[%s12473_s5 + $0x38] sm:$0xff] }
 0x547   :  { %12854 = vst [vmem:[#allocation27_spill] sm:$0xff] %v10806_v20  ;;  %7048 = vmatprep.subr.bf16.mxu1 %v10804_v8  ;;  %v10834_v28 = vpack.c.bf16 %v3139_v60, %v3135_v5 }
 0x548   :  { %12855 = vst [vmem:[#allocation28_spill] sm:$0xff] %v10815_v12  ;;  %7018 = vmatpush1.bf16.msra.mxu0 %v10806_v20  ;;  %12856 = vst [vmem:[#allocation29_spill] sm:$0xff] %v10829_v23  ;;  %v10841_v20 = vld [vmem:[%s12476_s6] sm:$0xf] }
 0x549   :  { %12857 = vst [vmem:[#allocation30_spill] sm:$0xff] %v10834_v28  ;;  %7052 = vmatprep.subr.bf16.mxu0 %v10829_v23  ;;  %v3096_v49 = vrot.slane %v10841_v20, %v12815_v55  ;;  %v3100_v5 = vrot.slane %v10841_v20, %v12816_v53 }
 0x54a   :  { %7050 = vmatpush1.bf16.msra.mxu1 %v10815_v12  ;;  %v3092_v12 = vrot.slane %v10841_v20, %v12814_v32 }
 0x54b   :  { %7084 = vmatprep.subr.bf16.mxu1 %v10834_v28 }
 0x5dd   :  { %v3011_v14 = vpop.f32.mrb[22].mxu0  ;;  %v3082_v8 = vpop.f32.mrb[24].mxu1 }
 0x5de   :  { %v3109_v45 = vadd.f32 %v3092_v12, %v3011_v14  ;;  %v3013_v60 = vpop.f32.mrb[23].mxu0  ;;  %v10849_v23 = vpop.f32.mrb[25].mxu1  ;;  %v3111_v0 = vadd.f32 %v3100_v5, %v3082_v8 }
 0x5df   :  { %v3110_v28 = vadd.f32 %v3096_v49, %v3013_v60 }
 0x5e0   :  { %v3113_v47 = vmul.f32 0.5, %v3109_v45 }
 0x5e1   :  { %v3117_v16 = vmul.f32 0.5, %v3110_v28 }
 0x5e2   :  { %7890 = vtanh.f32 %v3113_v47 }
 0x5e3   :  { %7892 = vtanh.f32 %v3117_v16 }
 0x5e4   :  { %7894 = vtanh.f32 %v3111_v0 }
 0x5ec   :  { %v7891_v32 = vpop.eup %7890 }
 0x5ed   :  { %v7893_v51 = vpop.eup %7892  ;;  %v3115_v25 = vadd.f32 1.0, %v7891_v32 }
 0x5ee   :  { %v3119_v55 = vadd.f32 1.0, %v7893_v51  ;;  %v7895_v43 = vpop.eup %7894 }
 0x5ef   :  { %v3116_v41 = vmul.f32 0.5, %v3115_v25 }
 0x5f0   :  { %v3120_v12 = vmul.f32 0.5, %v3119_v55 }
 0x5f1   :  { %v3127_v14 = vmul.f32 %v7895_v43, %v3116_v41 }
 0x5f2   :  { %v3126_v53 = vmul.f32 %v3120_v12, %v10265_v15 }
 0x5f4   :  { %v10852_v6 = vadd.f32 %v3127_v14, %v3126_v53 }
 0x5fd   :  { %v3330_v54 = vpop.f32.mrb[8].mxu0  ;;  %v3401_v49 = vpop.f32.mrb[8].mxu1 }
 0x5fe   :  { %v7733_v45 = vadd.f32 %v3330_v54, %v12723_v56  ;;  %v3332_v47 = vpop.f32.mrb[9].mxu0  ;;  %v3403_v8 = vpop.f32.mrb[9].mxu1  ;;  %v7749_v32 = vadd.f32 %v3401_v49, %v12725_v13 }
 0x5ff   :  { %v7734_v0 = vadd.f32 %v3332_v47, %v12724_v63  ;;  %v7750_v55 = vadd.f32 %v3403_v8, %v12726_v19  ;;  %v3132_v47 = vld [vmem:[%s12473_s5] sm:$0xff] }
 0x600   :  { %v3410_v16 = vmul.f32 0.5, %v7733_v45  ;;  %v3136_v8 = vld [vmem:[%s12473_s5 + $0x20] sm:$0xff] }
 0x601   :  { %v3414_v28 = vmul.f32 0.5, %v7734_v0  ;;  %v3419_v15 = vmul.f32 0.5, %v7750_v55  ;;  %v3134_v0 = vld [vmem:[%s12473_s5 + $0x10] sm:$0xff]  ;;  %v3147_v55 = vld [vmem:[%s12473_s5 + $0x78] sm:$0xff] }
 0x602   :  { %7896 = vtanh.f32 %v3410_v16  ;;  %v3141_v16 = vld [vmem:[%s12473_s5 + $0x48] sm:$0xff] }
 0x603   :  { %7898 = vtanh.f32 %v3414_v28  ;;  %v3145_v28 = vld [vmem:[%s12473_s5 + $0x68] sm:$0xff] }
 0x604   :  { %7900 = vtanh.f32 %v7749_v32  ;;  %v3143_v32 = vld [vmem:[%s12473_s5 + $0x58] sm:$0xff] }
 0x605   :  { %7902 = vtanh.f32 %v3419_v15 }
 0x60c   :  { %v7897_v53 = vpop.eup %7896 }
 0x60d   :  { %v7899_v43 = vpop.eup %7898  ;;  %v3412_v41 = vadd.f32 1.0, %v7897_v53 }
 0x60e   :  { %v3416_v25 = vadd.f32 1.0, %v7899_v43  ;;  %v7901_v51 = vpop.eup %7900  ;;  %v10886_v43 = vpack.c.bf16 %v3136_v8, %v3132_v47  ;;  %v3104_v47 = vrot.slane %v10841_v20, %v12728_v37  ;;  %v3153_v8 = vld [vmem:[%s12473_s5 + $0xa8] sm:$0xff] }
 0x60f   :  { %v3413_v54 = vmul.f32 0.5, %v3412_v41  ;;  %v7903_v49 = vpop.eup %7902 }
 0x610   :  { %v3417_v5 = vmul.f32 0.5, %v3416_v25  ;;  %v3421_v45 = vadd.f32 1.0, %v7903_v49  ;;  %v3140_v25 = vld [vmem:[%s12473_s5 + $0x40] sm:$0xff]  ;;  %v3146_v49 = vld [vmem:[%s12473_s5 + $0x70] sm:$0xff] }
 0x611   :  { %v3424_v60 = vmul.f32 %v7901_v51, %v3413_v54  ;;  %v3144_v54 = vld [vmem:[%s12473_s5 + $0x60] sm:$0xff] }
 0x612   :  { %v3423_v12 = vmul.f32 %v3417_v5, %v10272_v39  ;;  %v3138_v39 = vld [vmem:[%s12473_s5 + $0x30] sm:$0xff]  ;;  %v3422_v15 = vmul.f32 0.5, %v3421_v45  ;;  %v10898_v5 = vpack.c.bf16 %v3145_v28, %v3141_v16  ;;  %v3149_v45 = vld [vmem:[%s12473_s5 + $0x88] sm:$0xff]  ;;  %v10926_v20 = vpack.c.bf16 %v3144_v54, %v3140_v25  ;;  %v3148_v28 = vld [vmem:[%s12473_s5 + $0x80] sm:$0xff] }
 0x613   :  { %v10888_v41 = vpack.c.bf16 %v3138_v39, %v3134_v0  ;;  %v3151_v0 = vld [vmem:[%s12473_s5 + $0x98] sm:$0xff]  ;;  %v3154_v25 = vld [vmem:[%s12473_s5 + $0xb0] sm:$0xff]  ;;  %v3157_v54 = vld [vmem:[%s12473_s5 + $0xc8] sm:$0xff] }
 0x614   :  { %v10859_v14 = vadd.f32 %v3424_v60, %v3423_v12  ;;  %v10900_v60 = vpack.c.bf16 %v3147_v55, %v3143_v32  ;;  %v3142_v12 = vld [vmem:[%s12473_s5 + $0x50] sm:$0xff]  ;;  %v3155_v39 = vld [vmem:[%s12473_s5 + $0xb8] sm:$0xff]  ;;  %12859 = vst [vmem:[#allocation32_spill] sm:$0xff] %v10926_v20  ;;  %v3152_v32 = vld [vmem:[%s12473_s5 + $0xa0] sm:$0xff]  ;;  %v10938_v55 = vpack.c.bf16 %v3153_v8, %v3149_v45 }
 0x615   :  { %v10928_v16 = vpack.c.bf16 %v3146_v49, %v3142_v12  ;;  %v3112_v12 = vadd.f32 %v3104_v47, %v10849_v23  ;;  %v3161_v49 = vld [vmem:[%s12473_s5 + $0xe8] sm:$0xff]  ;;  %v3159_v45 = vld [vmem:[%s12473_s5 + $0xd8] sm:$0xff]  ;;  %v10965_v23 = vpack.c.bf16 %v3152_v32, %v3148_v28  ;;  %v3158_v28 = vld [vmem:[%s12473_s5 + $0xd0] sm:$0xff] }
 0x616   :  { %7904 = vtanh.f32 %v10859_v14  ;;  %12858 = vst [vmem:[#allocation31_spill] sm:$0xff] %v10900_v60  ;;  %12861 = vst [vmem:[#allocation34_spill] sm:$0xff] %v10938_v55  ;;  %v3163_v8 = vld [vmem:[%s12473_s5 + $0xf8] sm:$0xff]  ;;  %v3162_v32 = vld [vmem:[%s12473_s5 + $0xf0] sm:$0xff] }
 0x617   :  { %12860 = vst [vmem:[#allocation33_spill] sm:$0xff] %v10928_v16  ;;  %12863 = vst [vmem:[#allocation36_spill] sm:$0xff] %v10965_v23 }
 0x620   :  { %v7905_v53 = vpop.eup %7904 }
 0x621   :  { %v10896_v51 = vmul.f32 %v7905_v53, %v3422_v15  ;;  %v10940_v15 = vpack.c.bf16 %v3155_v39, %v3151_v0  ;;  %v3150_v53 = vld [vmem:[%s12473_s5 + $0x90] sm:$0xff]  ;;  %v3156_v0 = vld [vmem:[%s12473_s5 + $0xc0] sm:$0xff] }
 0x622   :  { %v10967_v47 = vpack.c.bf16 %v3154_v25, %v3150_v53  ;;  %v3160_v39 = vld [vmem:[%s12473_s5 + $0xe0] sm:$0xff]  ;;  %v3165_v53 = vld [vmem:[%s12473_s5 + $0x108] sm:$0xff]  ;;  %v3122_v25 = vmul.f32 0.5, %v3112_v12 }
 0x623   :  { %3557 = vmatmul.mubr.f32.vlgmr.msra.gmra.mrb[24].mxu0 %v10896_v51  ;;  %3628 = vmatmul.mubr.f32.vlgmr.msra.gmra.mrb[26].mxu1 %v10896_v51  ;;  %12862 = vst [vmem:[#allocation35_spill] sm:$0xff] %v10940_v15  ;;  %v3164_v12 = vld [vmem:[%s12473_s5 + $0x100] sm:$0xff] }
 0x624   :  { %7054 = vmatpush1.bf16.msra.mxu0 %v10886_v43  ;;  %7086 = vmatpush1.bf16.msra.mxu1 %v10888_v41  ;;  %12864 = vst [vmem:[#allocation37_spill] sm:$0xff] %v10967_v47  ;;  %7906 = vtanh.f32 %v3122_v25  ;;  %v3172_v25 = vld [vmem:[%s12473_s5 + $0x140] sm:$0xff] }
 0x625   :  { %7056 = vmatprep.subr.bf16.mxu0 %v10898_v5  ;;  %7088 = vmatprep.subr.bf16.mxu1 %v10900_v60  ;;  %v10977_v60 = vpack.c.bf16 %v3161_v49, %v3157_v54  ;;  %v3169_v54 = vld [vmem:[%s12473_s5 + $0x128] sm:$0xff]  ;;  %v3167_v49 = vld [vmem:[%s12473_s5 + $0x118] sm:$0xff]  ;;  %7908 = vtanh.f32 %v10852_v6 }
 0x626   :  { %3698 = vmatprep.mubr.f32.mxu0 %v12695_v27  ;;  %3769 = vmatprep.mubr.f32.mxu1 %v12695_v27 }
 0x627   :  { %12865 = vst [vmem:[#allocation38_spill] sm:$0xff] %v10977_v60 }
 0x628   :  { %7058 = vmatpush1.bf16.msra.mxu0 %v10926_v20  ;;  %7090 = vmatpush1.bf16.msra.mxu1 %v10928_v16  ;;  %v10979_v20 = vpack.c.bf16 %v3163_v8, %v3159_v45  ;;  %v3171_v45 = vld [vmem:[%s12473_s5 + $0x138] sm:$0xff]  ;;  %v11001_v8 = vpack.c.bf16 %v3160_v39, %v3156_v0  ;;  %v11013_v16 = vpack.c.bf16 %v3169_v54, %v3165_v53  ;;  %v3166_v0 = vld [vmem:[%s12473_s5 + $0x110] sm:$0xff] }
 0x629   :  { %7060 = vmatprep.subr.bf16.mxu0 %v10938_v55  ;;  %7092 = vmatprep.subr.bf16.mxu1 %v10940_v15  ;;  %v11003_v15 = vpack.c.bf16 %v3162_v32, %v3158_v28  ;;  %v3168_v55 = vld [vmem:[%s12473_s5 + $0x120] sm:$0xff]  ;;  %v3170_v39 = vld [vmem:[%s12473_s5 + $0x130] sm:$0xff]  ;;  %v3173_v28 = vld [vmem:[%s12473_s5 + $0x148] sm:$0xff] }
 0x62a   :  { %12866 = vst [vmem:[#allocation39_spill] sm:$0xff] %v10979_v20  ;;  %12867 = vst [vmem:[#allocation40_spill] sm:$0xff] %v11001_v8  ;;  %v3177_v32 = vld [vmem:[%s12473_s5 + $0x168] sm:$0xff]  ;;  %v3175_v53 = vld [vmem:[%s12473_s5 + $0x158] sm:$0xff] }
 0x62b   :  { %12868 = vst [vmem:[#allocation41_spill] sm:$0xff] %v11003_v15  ;;  %12869 = vst [vmem:[#allocation42_spill] sm:$0xff] %v11013_v16  ;;  %v3179_v54 = vld [vmem:[%s12473_s5 + $0x178] sm:$0xff] }
 0x62c   :  { %7062 = vmatpush1.bf16.msra.mxu0 %v10965_v23  ;;  %7094 = vmatpush1.bf16.msra.mxu1 %v10967_v47  ;;  %v11015_v23 = vpack.c.bf16 %v3171_v45, %v3167_v49  ;;  %v11037_v49 = vpack.c.bf16 %v3168_v55, %v3164_v12  ;;  %v11039_v45 = vpack.c.bf16 %v3170_v39, %v3166_v0  ;;  %v3174_v55 = vld [vmem:[%s12473_s5 + $0x150] sm:$0xff]  ;;  %v3181_v0 = vld [vmem:[%s12473_s5 + $0x188] sm:$0xff] }
 0x62d   :  { %7064 = vmatprep.subr.bf16.mxu0 %v10977_v60  ;;  %7096 = vmatprep.subr.bf16.mxu1 %v10979_v20  ;;  %v3176_v20 = vld [vmem:[%s12473_s5 + $0x160] sm:$0xff]  ;;  %v11049_v60 = vpack.c.bf16 %v3177_v32, %v3173_v28  ;;  %v3178_v12 = vld [vmem:[%s12473_s5 + $0x170] sm:$0xff]  ;;  %v3185_v39 = vld [vmem:[%s12473_s5 + $0x1a8] sm:$0xff] }
 0x62e   :  { %12870 = vst [vmem:[#allocation43_spill] sm:$0xff] %v11015_v23  ;;  %12871 = vst [vmem:[#allocation44_spill] sm:$0xff] %v11037_v49  ;;  %v3183_v28 = vld [vmem:[%s12473_s5 + $0x198] sm:$0xff] }
 0x62f   :  { %12872 = vst [vmem:[#allocation45_spill] sm:$0xff] %v11039_v45  ;;  %12873 = vst [vmem:[#allocation46_spill] sm:$0xff] %v11049_v60  ;;  %v3187_v32 = vld [vmem:[%s12473_s5 + $0x1b8] sm:$0xff] }
 0x630   :  { %7066 = vmatpush1.bf16.msra.mxu0 %v11001_v8  ;;  %7098 = vmatpush1.bf16.msra.mxu1 %v11003_v15  ;;  %v11051_v8 = vpack.c.bf16 %v3179_v54, %v3175_v53  ;;  %v11074_v53 = vpack.c.bf16 %v3176_v20, %v3172_v25  ;;  %v11076_v54 = vpack.c.bf16 %v3178_v12, %v3174_v55  ;;  %v3182_v20 = vld [vmem:[%s12473_s5 + $0x190] sm:$0xff]  ;;  %v3189_v55 = vld [vmem:[%s12473_s5 + $0x1c8] sm:$0xff] }
 0x631   :  { %7068 = vmatprep.subr.bf16.mxu0 %v11013_v16  ;;  %7100 = vmatprep.subr.bf16.mxu1 %v11015_v23  ;;  %v3180_v23 = vld [vmem:[%s12473_s5 + $0x180] sm:$0xff]  ;;  %v11086_v15 = vpack.c.bf16 %v3185_v39, %v3181_v0  ;;  %v3186_v25 = vld [vmem:[%s12473_s5 + $0x1b0] sm:$0xff]  ;;  %v3193_v12 = vld [vmem:[%s12473_s5 + $0x1e8] sm:$0xff] }
 0x632   :  { %12874 = vst [vmem:[#allocation47_spill] sm:$0xff] %v11051_v8  ;;  %12875 = vst [vmem:[#allocation49_spill] sm:$0xff] %v11076_v54  ;;  %v3184_v16 = vld [vmem:[%s12473_s5 + $0x1a0] sm:$0xff]  ;;  %v3191_v0 = vld [vmem:[%s12473_s5 + $0x1d8] sm:$0xff] }
 0x633   :  { %v3195_v39 = vld [vmem:[%s12473_s5 + $0x1f8] sm:$0xff] }
 0x634   :  { %7070 = vmatpush1.bf16.msra.mxu0 %v11037_v49  ;;  %7102 = vmatpush1.bf16.msra.mxu1 %v11039_v45  ;;  %v11088_v49 = vpack.c.bf16 %v3187_v32, %v3183_v28  ;;  %v7907_v28 = vpop.eup %7906  ;;  %v11110_v32 = vpack.c.bf16 %v3184_v16, %v3180_v23  ;;  %v11119_v45 = vpack.c.bf16 %v3193_v12, %v3189_v55  ;;  %v3190_v16 = vld [vmem:[%s12473_s5 + $0x1d0] sm:$0xff] }
 0x635   :  { %7072 = vmatprep.subr.bf16.mxu0 %v11049_v60  ;;  %7104 = vmatprep.subr.bf16.mxu1 %v11051_v8  ;;  %v11112_v8 = vpack.c.bf16 %v3186_v25, %v3182_v20  ;;  %v3188_v60 = vld [vmem:[%s12473_s5 + $0x1c0] sm:$0xff]  ;;  %v11121_v47 = vpack.c.bf16 %v3195_v39, %v3191_v0  ;;  %v3194_v23 = vld [vmem:[%s12473_s5 + $0x1f0] sm:$0xff]  ;;  %v3124_v20 = vadd.f32 1.0, %v7907_v28  ;;  %v7909_v12 = vpop.eup %7908 }
 0x636   :  { %v11136_v55 = vpack.c.bf16 %v3194_v23, %v3190_v16  ;;  %v3929_v28 = vld [vmem:[%s12469_s3 + $0x140] sm:$0xff]  ;;  %v3942_v23 = vld [vmem:[%s12469_s3 + $0x1a8] sm:$0xff] }
 0x637   :  { %v3125_v0 = vmul.f32 0.5, %v3124_v20  ;;  %v3933_v16 = vld [vmem:[%s12469_s3 + $0x160] sm:$0xff] }
 0x638   :  { %7074 = vmatpush1.bf16.msra.mxu0 %v11074_v53  ;;  %7106 = vmatpush1.bf16.msra.mxu1 %v11076_v54  ;;  %v3192_v54 = vld [vmem:[%s12473_s5 + $0x1e0] sm:$0xff] }
 0x639   :  { %7076 = vmatprep.subr.bf16.mxu0 %v11086_v15  ;;  %7108 = vmatprep.subr.bf16.mxu1 %v11088_v49  ;;  %v11134_v25 = vpack.c.bf16 %v3192_v54, %v3188_v60  ;;  %v11142_v39 = vmul.f32 %v7909_v12, %v3125_v0  ;;  %v3914_v60 = vld [vmem:[%s12469_s3 + $0xc8] sm:$0xff]  ;;  %v3937_v12 = vld [vmem:[%s12469_s3 + $0x180] sm:$0xff] }
 0x63a   :  { %v3941_v0 = vld [vmem:[%s12469_s3 + $0x1a0] sm:$0xff] }
 0x63b   :  { %12876 = vst [vmem:[#allocation50_spill] sm:$0xff] %v11142_v39 }
 0x63c   :  { %7078 = vmatpush1.bf16.msra.mxu0 %v11110_v32  ;;  %7110 = vmatpush1.bf16.msra.mxu1 %v11112_v8 }
 0x63d   :  { %7080 = vmatprep.subr.bf16.mxu0 %v11119_v45  ;;  %7112 = vmatprep.subr.bf16.mxu1 %v11121_v47 }
 0x640   :  { %7082 = vmatpush1.bf16.msra.mxu0 %v11134_v25  ;;  %7114 = vmatpush1.bf16.msra.mxu1 %v11136_v55 }
 0x641   :  { %7116 = vmatprep.subr.bf16.mxu0 %v10330_v62  ;;  %7148 = vmatprep.subr.bf16.mxu1 %v10332_v33  ;;  %v3918_v62 = vld [vmem:[%s12469_s3 + $0xe8] sm:$0xff] }
 0x642   :  { %v11164_v33 = vpack.c.bf16 %v3918_v62, %v3914_v60  ;;  %v3950_v60 = vld [vmem:[%s12469_s3 + $0x1e8] sm:$0xff] }
 0x643   :  { %3699 = vmatmul.mubr.f32.vlgmr.msra.gmra.mrb[24].mxu0 %v11142_v39  ;;  %3770 = vmatmul.mubr.f32.vlgmr.msra.gmra.mrb[26].mxu1 %v11142_v39  ;;  %v4858_v39 = vld [vmem:[%s12472_s4 + $0x1a0] sm:$0xff] }
 0x644   :  { %7118 = vmatpush1.bf16.msra.mxu0 %v10354_v2  ;;  %7150 = vmatpush1.bf16.msra.mxu1 %v10356_v11  ;;  %v3913_v2 = vld [vmem:[%s12469_s3 + $0xc0] sm:$0xff] }
 0x645   :  { %7120 = vmatprep.subr.bf16.mxu0 %v10368_v17  ;;  %7152 = vmatprep.subr.bf16.mxu1 %v10370_v59  ;;  %v3917_v11 = vld [vmem:[%s12469_s3 + $0xe0] sm:$0xff]  ;;  %v3922_v17 = vld [vmem:[%s12469_s3 + $0x108] sm:$0xff] }
 0x646   :  { %4017 = vmatprep.mubr.f32.mxu0 %v12695_v27  ;;  %4088 = vmatprep.mubr.f32.mxu1 %v12695_v27  ;;  %v3926_v59 = vld [vmem:[%s12469_s3 + $0x128] sm:$0xff] }
 0x648   :  { %7122 = vmatpush1.bf16.msra.mxu0 %v10394_v34  ;;  %7154 = vmatpush1.bf16.msra.mxu1 %v10396_v18  ;;  %v11180_v34 = vpack.c.bf16 %v3917_v11, %v3913_v2  ;;  %v11184_v18 = vpack.c.bf16 %v3926_v59, %v3922_v17  ;;  %v3945_v2 = vld [vmem:[%s12469_s3 + $0x1c0] sm:$0xff]  ;;  %v12894_v17 = vld [vmem:[#allocation26_spill] sm:$0xff]  ;;  %v12895_v59 = vld [vmem:[#allocation27_spill] sm:$0xff] }
 0x649   :  { %7124 = vmatprep.subr.bf16.mxu0 %v10403_v7  ;;  %7156 = vmatprep.subr.bf16.mxu1 %v10405_v3  ;;  %v3921_v7 = vld [vmem:[%s12469_s3 + $0x100] sm:$0xff] }
 0x64a   :  { %v3925_v3 = vld [vmem:[%s12469_s3 + $0x120] sm:$0xff] }
 0x64b   :  { %v3949_v11 = vld [vmem:[%s12469_s3 + $0x1e0] sm:$0xff] }
 0x64c   :  { %7126 = vmatpush1.bf16.msra.mxu0 %v10426_v44  ;;  %7158 = vmatpush1.bf16.msra.mxu1 %v10428_v24  ;;  %v3930_v44 = vld [vmem:[%s12469_s3 + $0x148] sm:$0xff] }
 0x64d   :  { %7128 = vmatprep.subr.bf16.mxu0 %v11164_v33  ;;  %7160 = vmatprep.subr.bf16.mxu1 %v10432_v48  ;;  %v3934_v24 = vld [vmem:[%s12469_s3 + $0x168] sm:$0xff]  ;;  %v11200_v48 = vpack.c.bf16 %v3925_v3, %v3921_v7  ;;  %v12896_v7 = vld [vmem:[#allocation28_spill] sm:$0xff] }
 0x64e   :  { %v11204_v54 = vpack.c.bf16 %v3934_v24, %v3930_v44  ;;  %v12897_v3 = vld [vmem:[#allocation29_spill] sm:$0xff]  ;;  %v12898_v44 = vld [vmem:[#allocation30_spill] sm:$0xff]  ;;  %v11301_v24 = vld [vmem:[%s12476_s6] sm:$0xf] }
 0x650   :  { %7130 = vmatpush1.bf16.msra.mxu0 %v11180_v34  ;;  %7162 = vmatpush1.bf16.msra.mxu1 %v10448_v40  ;;  %v3938_v40 = vld [vmem:[%s12469_s3 + $0x188] sm:$0xff] }
 0x651   :  { %7132 = vmatprep.subr.bf16.mxu0 %v11184_v18  ;;  %7164 = vmatprep.subr.bf16.mxu1 %v10452_v35  ;;  %v11220_v35 = vpack.c.bf16 %v3933_v16, %v3929_v28  ;;  %v11224_v20 = vpack.c.bf16 %v3942_v23, %v3938_v40  ;;  %v12899_v28 = vld [vmem:[#allocation15_spill] sm:$0xff]  ;;  %v12900_v40 = vld [vmem:[#allocation16_spill] sm:$0xff] }
 0x652   :  { %v3781_v16 = vrot.slane %v11301_v24, %v12899_v28  ;;  %v3785_v23 = vrot.slane %v11301_v24, %v12900_v40 }
 0x654   :  { %7134 = vmatpush1.bf16.msra.mxu0 %v11200_v48  ;;  %7166 = vmatpush1.bf16.msra.mxu1 %v10468_v22  ;;  %v3946_v22 = vld [vmem:[%s12469_s3 + $0x1c8] sm:$0xff] }
 0x655   :  { %7136 = vmatprep.subr.bf16.mxu0 %v11204_v54  ;;  %7168 = vmatprep.subr.bf16.mxu1 %v10472_v30  ;;  %v11240_v30 = vpack.c.bf16 %v3941_v0, %v3937_v12  ;;  %v11244_v62 = vpack.c.bf16 %v3950_v60, %v3946_v22  ;;  %v12901_v60 = vld [vmem:[#allocation19_spill] sm:$0xff] }
 0x658   :  { %7138 = vmatpush1.bf16.msra.mxu0 %v11220_v35  ;;  %7170 = vmatpush1.bf16.msra.mxu1 %v10488_v57  ;;  %v11254_v57 = vpack.c.bf16 %v3949_v11, %v3945_v2  ;;  %v3789_v2 = vrot.slane %v11301_v24, %v12901_v60 }
 0x659   :  { %7140 = vmatprep.subr.bf16.mxu0 %v11224_v20  ;;  %7172 = vmatprep.subr.bf16.mxu1 %v10492_v9  ;;  %v12877_v9 = vld [vmem:[#allocation6_spill] sm:$0xff] }
 0x65c   :  { %7142 = vmatpush1.bf16.msra.mxu0 %v11240_v30  ;;  %7174 = vmatpush1.bf16.msra.mxu1 %v10508_v38  ;;  %v12878_v38 = vld [vmem:[#allocation7_spill] sm:$0xff] }
 0x65d   :  { %7144 = vmatprep.subr.bf16.mxu0 %v11244_v62  ;;  %7176 = vmatprep.subr.bf16.mxu1 %v10512_v1  ;;  %v12879_v1 = vld [vmem:[#allocation8_spill] sm:$0xff] }
 0x660   :  { %7146 = vmatpush1.bf16.msra.mxu0 %v11254_v57  ;;  %7178 = vmatpush1.bf16.msra.mxu1 %v10522_v36  ;;  %v12880_v36 = vld [vmem:[#allocation9_spill] sm:$0xff] }
 0x661   :  { %7180 = vmatprep.subr.bf16.mxu0 %v10541_v42  ;;  %7212 = vmatprep.subr.bf16.mxu1 %v10552_v50  ;;  %v12881_v42 = vld [vmem:[#allocation10_spill] sm:$0xff]  ;;  %v12882_v50 = vld [vmem:[#allocation11_spill] sm:$0xff] }
 0x663   :  { %4018 = vmatmul.mubr.f32.vlgmr.msra.gmra.mrb[10].mxu0 %v10896_v51  ;;  %4089 = vmatmul.mubr.f32.vlgmr.msra.gmra.mrb[10].mxu1 %v10896_v51  ;;  %v12893_v51 = vld [vmem:[#allocation25_spill] sm:$0xff] }
 0x664   :  { %7182 = vmatpush1.bf16.msra.mxu0 %v10554_v61  ;;  %7214 = vmatpush1.bf16.msra.mxu1 %v10563_v10  ;;  %v12883_v61 = vld [vmem:[#allocation12_spill] sm:$0xff]  ;;  %v12884_v10 = vld [vmem:[#allocation13_spill] sm:$0xff] }
 0x665   :  { %7184 = vmatprep.subr.bf16.mxu0 %v10577_v52  ;;  %7216 = vmatprep.subr.bf16.mxu1 %v10588_v21  ;;  %v12885_v52 = vld [vmem:[#allocation14_spill] sm:$0xff]  ;;  %v12886_v21 = vld [vmem:[#allocation17_spill] sm:$0xff] }
 0x666   :  { %4245 = vmatprep.mubr.f32.mxu0 %v12695_v27  ;;  %4316 = vmatprep.mubr.f32.mxu1 %v12695_v27 }
 0x668   :  { %7186 = vmatpush1.bf16.msra.mxu0 %v10590_v26  ;;  %7218 = vmatpush1.bf16.msra.mxu1 %v10599_v58  ;;  %v12887_v26 = vld [vmem:[#allocation18_spill] sm:$0xff]  ;;  %v12888_v58 = vld [vmem:[#allocation21_spill] sm:$0xff] }
 0x669   :  { %7188 = vmatprep.subr.bf16.mxu0 %v10613_v46  ;;  %7220 = vmatprep.subr.bf16.mxu1 %v10624_v4  ;;  %v12889_v46 = vld [vmem:[#allocation22_spill] sm:$0xff]  ;;  %v12890_v4 = vld [vmem:[#allocation23_spill] sm:$0xff] }
 0x66c   :  { %7190 = vmatpush1.bf16.msra.mxu0 %v10626_v31  ;;  %7222 = vmatpush1.bf16.msra.mxu1 %v10635_v29  ;;  %v12891_v31 = vld [vmem:[#allocation20_spill] sm:$0xff] }
 0x66d   :  { %7192 = vmatprep.subr.bf16.mxu0 %v12877_v9  ;;  %7224 = vmatprep.subr.bf16.mxu1 %v12878_v38  ;;  %v12892_v29 = vld [vmem:[#allocation24_spill] sm:$0xff] }
 0x670   :  { %7194 = vmatpush1.bf16.msra.mxu0 %v12879_v1  ;;  %7226 = vmatpush1.bf16.msra.mxu1 %v12880_v36 }
 0x671   :  { %7196 = vmatprep.subr.bf16.mxu0 %v12881_v42  ;;  %7228 = vmatprep.subr.bf16.mxu1 %v12882_v50 }
 0x674   :  { %7198 = vmatpush1.bf16.msra.mxu0 %v12883_v61  ;;  %7230 = vmatpush1.bf16.msra.mxu1 %v12884_v10 }
 0x675   :  { %7200 = vmatprep.subr.bf16.mxu0 %v12885_v52  ;;  %7232 = vmatprep.subr.bf16.mxu1 %v12886_v21 }
 0x678   :  { %7202 = vmatpush1.bf16.msra.mxu0 %v12887_v26  ;;  %7234 = vmatpush1.bf16.msra.mxu1 %v12888_v58 }
 0x679   :  { %7204 = vmatprep.subr.bf16.mxu0 %v12889_v46  ;;  %7236 = vmatprep.subr.bf16.mxu1 %v12890_v4 }
 0x67c   :  { %7206 = vmatpush1.bf16.msra.mxu0 %v12891_v31  ;;  %7238 = vmatpush1.bf16.msra.mxu1 %v12892_v29 }
 0x67d   :  { %7208 = vmatprep.subr.bf16.mxu0 %v12893_v51  ;;  %7240 = vmatprep.subr.bf16.mxu1 %v12894_v17 }
 0x680   :  { %7210 = vmatpush1.bf16.msra.mxu0 %v12895_v59  ;;  %7242 = vmatpush1.bf16.msra.mxu1 %v12896_v7 }
 0x681   :  { %7244 = vmatprep.subr.bf16.mxu0 %v12897_v3  ;;  %7276 = vmatprep.subr.bf16.mxu1 %v12898_v44 }
 0x716   :  { %v3700_v12 = vpop.f32.mrb[24].mxu0  ;;  %v3771_v0 = vpop.f32.mrb[26].mxu1 }
 0x717   :  { %v3798_v22 = vadd.f32 %v3781_v16, %v3700_v12  ;;  %v3702_v11 = vpop.f32.mrb[25].mxu0  ;;  %v3773_v9 = vpop.f32.mrb[27].mxu1  ;;  %v3800_v42 = vadd.f32 %v3789_v2, %v3771_v0 }
 0x718   :  { %v3799_v38 = vadd.f32 %v3785_v23, %v3702_v11 }
 0x719   :  { %v3802_v1 = vmul.f32 0.5, %v3798_v22 }
 0x71a   :  { %v3806_v36 = vmul.f32 0.5, %v3799_v38 }
 0x71b   :  { %7910 = vtanh.f32 %v3802_v1 }
 0x71c   :  { %7912 = vtanh.f32 %v3806_v36 }
 0x71d   :  { %7914 = vtanh.f32 %v3800_v42 }
 0x725   :  { %v7911_v50 = vpop.eup %7910 }
 0x726   :  { %v7913_v61 = vpop.eup %7912  ;;  %v3804_v10 = vadd.f32 1.0, %v7911_v50 }
 0x727   :  { %v3808_v52 = vadd.f32 1.0, %v7913_v61  ;;  %v7915_v26 = vpop.eup %7914 }
 0x728   :  { %v3805_v21 = vmul.f32 0.5, %v3804_v10 }
 0x729   :  { %v3809_v58 = vmul.f32 0.5, %v3808_v52 }
 0x72a   :  { %v3816_v46 = vmul.f32 %v7915_v26, %v3805_v21 }
 0x72b   :  { %v3815_v4 = vmul.f32 %v3809_v58, %v10852_v6 }
 0x72d   :  { %v11310_v31 = vadd.f32 %v3816_v46, %v3815_v4  ;;  %v3793_v46 = vrot.slane %v11301_v24, %v12728_v37  ;;  %v12904_v24 = vld [vmem:[#allocation33_spill] sm:$0xff] }
 0x72f   :  { %v3801_v4 = vadd.f32 %v3793_v46, %v3773_v9  ;;  %v12910_v9 = vld [vmem:[#allocation39_spill] sm:$0xff] }
 0x736   :  { %v4019_v29 = vpop.f32.mrb[10].mxu0  ;;  %v4090_v51 = vpop.f32.mrb[10].mxu1 }
 0x737   :  { %v7735_v17 = vadd.f32 %v4019_v29, %v12723_v56  ;;  %v4021_v59 = vpop.f32.mrb[11].mxu0  ;;  %v4092_v7 = vpop.f32.mrb[11].mxu1  ;;  %v7751_v23 = vadd.f32 %v4090_v51, %v12725_v13  ;;  %v12903_v29 = vld [vmem:[#allocation32_spill] sm:$0xff]  ;;  %v12905_v51 = vld [vmem:[#allocation34_spill] sm:$0xff] }
 0x738   :  { %v7736_v3 = vadd.f32 %v4021_v59, %v12724_v63  ;;  %v7752_v12 = vadd.f32 %v4092_v7, %v12726_v19  ;;  %v12907_v59 = vld [vmem:[#allocation36_spill] sm:$0xff] }
 0x739   :  { %v4099_v44 = vmul.f32 0.5, %v7735_v17  ;;  %v12906_v17 = vld [vmem:[#allocation35_spill] sm:$0xff]  ;;  %v12911_v7 = vld [vmem:[#allocation40_spill] sm:$0xff] }
 0x73a   :  { %v4103_v16 = vmul.f32 0.5, %v7736_v3  ;;  %v4108_v6 = vmul.f32 0.5, %v7752_v12  ;;  %v12912_v3 = vld [vmem:[#allocation41_spill] sm:$0xff] }
 0x73b   :  { %7916 = vtanh.f32 %v4099_v44  ;;  %v12913_v44 = vld [vmem:[#allocation42_spill] sm:$0xff]  ;;  %v12916_v12 = vld [vmem:[#allocation45_spill] sm:$0xff] }
 0x73c   :  { %7918 = vtanh.f32 %v4103_v16  ;;  %v12914_v16 = vld [vmem:[#allocation43_spill] sm:$0xff] }
 0x73d   :  { %7920 = vtanh.f32 %v7751_v23  ;;  %v12915_v23 = vld [vmem:[#allocation44_spill] sm:$0xff] }
 0x73e   :  { %7922 = vtanh.f32 %v4108_v6  ;;  %v12917_v6 = vld [vmem:[#allocation46_spill] sm:$0xff] }
 0x745   :  { %v7917_v0 = vpop.eup %7916 }
 0x746   :  { %v7919_v22 = vpop.eup %7918  ;;  %v4101_v2 = vadd.f32 1.0, %v7917_v0  ;;  %v12918_v0 = vld [vmem:[#allocation47_spill] sm:$0xff] }
 0x747   :  { %v4105_v11 = vadd.f32 1.0, %v7919_v22  ;;  %v7921_v1 = vpop.eup %7920 }
 0x748   :  { %v4102_v38 = vmul.f32 0.5, %v4101_v2  ;;  %v7923_v10 = vpop.eup %7922  ;;  %v12919_v2 = vld [vmem:[#allocation49_spill] sm:$0xff] }
 0x749   :  { %v4106_v36 = vmul.f32 0.5, %v4105_v11  ;;  %v4110_v52 = vadd.f32 1.0, %v7923_v10  ;;  %v4579_v11 = vld [vmem:[%s12469_s3 + $0x8] sm:$0xff] }
 0x74a   :  { %v4113_v42 = vmul.f32 %v7921_v1, %v4102_v38  ;;  %v4583_v38 = vld [vmem:[%s12469_s3 + $0x28] sm:$0xff]  ;;  %v4581_v1 = vld [vmem:[%s12469_s3 + $0x18] sm:$0xff] }
 0x74b   :  { %v4112_v50 = vmul.f32 %v4106_v36, %v10859_v14  ;;  %v4111_v21 = vmul.f32 0.5, %v4110_v52  ;;  %v12902_v14 = vld [vmem:[#allocation31_spill] sm:$0xff]  ;;  %v4587_v10 = vld [vmem:[%s12469_s3 + $0x48] sm:$0xff] }
 0x74d   :  { %v11317_v61 = vadd.f32 %v4113_v42, %v4112_v50  ;;  %v11375_v42 = vpack.c.bf16 %v4583_v38, %v4579_v11 }
 0x74f   :  { %7924 = vtanh.f32 %v11317_v61 }
 0x759   :  { %v7925_v26 = vpop.eup %7924 }
 0x75a   :  { %v11320_v58 = vmul.f32 %v7925_v26, %v4111_v21  ;;  %v4593_v21 = vld [vmem:[%s12469_s3 + $0x78] sm:$0xff] }
 0x75c   :  { %4246 = vmatmul.mubr.f32.vlgmr.msra.gmra.mrb[26].mxu0 %v11320_v58  ;;  %4317 = vmatmul.mubr.f32.vlgmr.msra.gmra.mrb[28].mxu1 %v11320_v58 }
 0x75d   :  { %7246 = vmatpush1.bf16.msra.mxu0 %v10886_v43  ;;  %7278 = vmatpush1.bf16.msra.mxu1 %v10888_v41  ;;  %v3811_v43 = vmul.f32 0.5, %v3801_v4  ;;  %v12908_v41 = vld [vmem:[#allocation37_spill] sm:$0xff]  ;;  %v4586_v4 = vld [vmem:[%s12469_s3 + $0x40] sm:$0xff] }
 0x75e   :  { %7248 = vmatprep.subr.bf16.mxu0 %v10898_v5  ;;  %7280 = vmatprep.subr.bf16.mxu1 %v12902_v14  ;;  %v12909_v5 = vld [vmem:[#allocation38_spill] sm:$0xff] }
 0x75f   :  { %4387 = vmatprep.mubr.f32.mxu0 %v12695_v27  ;;  %4458 = vmatprep.mubr.f32.mxu1 %v12695_v27  ;;  %7926 = vtanh.f32 %v3811_v43  ;;  %v4595_v43 = vld [vmem:[%s12469_s3 + $0x88] sm:$0xff] }
 0x760   :  { %7928 = vtanh.f32 %v11310_v31 }
 0x761   :  { %7250 = vmatpush1.bf16.msra.mxu0 %v12903_v29  ;;  %7282 = vmatpush1.bf16.msra.mxu1 %v12904_v24  ;;  %v4590_v29 = vld [vmem:[%s12469_s3 + $0x60] sm:$0xff] }
 0x762   :  { %7252 = vmatprep.subr.bf16.mxu0 %v12905_v51  ;;  %7284 = vmatprep.subr.bf16.mxu1 %v12906_v17  ;;  %v4588_v51 = vld [vmem:[%s12469_s3 + $0x50] sm:$0xff] }
 0x763   :  { %v4592_v17 = vld [vmem:[%s12469_s3 + $0x70] sm:$0xff] }
 0x765   :  { %7254 = vmatpush1.bf16.msra.mxu0 %v12907_v59  ;;  %7286 = vmatpush1.bf16.msra.mxu1 %v12908_v41  ;;  %v4599_v59 = vld [vmem:[%s12469_s3 + $0xa8] sm:$0xff]  ;;  %v4597_v41 = vld [vmem:[%s12469_s3 + $0x98] sm:$0xff] }
 0x766   :  { %7256 = vmatprep.subr.bf16.mxu0 %v12909_v5  ;;  %7288 = vmatprep.subr.bf16.mxu1 %v12910_v9  ;;  %v4601_v5 = vld [vmem:[%s12469_s3 + $0xb8] sm:$0xff]  ;;  %v11439_v9 = vpack.c.bf16 %v4590_v29, %v4586_v4 }
 0x769   :  { %7258 = vmatpush1.bf16.msra.mxu0 %v12911_v7  ;;  %7290 = vmatpush1.bf16.msra.mxu1 %v12912_v3  ;;  %v7927_v22 = vpop.eup %7926  ;;  %v11441_v7 = vpack.c.bf16 %v4592_v17, %v4588_v51  ;;  %v4594_v3 = vld [vmem:[%s12469_s3 + $0x80] sm:$0xff]  ;;  %v4628_v51 = vld [vmem:[%s12469_s3 + $0x190] sm:$0xff] }
 0x76a   :  { %7260 = vmatprep.subr.bf16.mxu0 %v12913_v44  ;;  %7292 = vmatprep.subr.bf16.mxu1 %v12914_v16  ;;  %v3813_v36 = vadd.f32 1.0, %v7927_v22  ;;  %v7929_v52 = vpop.eup %7928  ;;  %v11448_v44 = vpack.c.bf16 %v4599_v59, %v4595_v43  ;;  %v11450_v16 = vpack.c.bf16 %v4601_v5, %v4597_v41  ;;  %v4609_v22 = vld [vmem:[%s12469_s3 + $0xf8] sm:$0xff]  ;;  %v4632_v17 = vld [vmem:[%s12469_s3 + $0x1b0] sm:$0xff] }
 0x76b   :  { %v11553_v43 = vpack.c.bf16 %v4632_v17, %v4628_v51  ;;  %v4636_v41 = vld [vmem:[%s12469_s3 + $0x1d0] sm:$0xff]  ;;  %v4823_v17 = vld [vmem:[%s12472_s4 + $0x88] sm:$0xff] }
 0x76c   :  { %v3814_v26 = vmul.f32 0.5, %v3813_v36  ;;  %v4613_v36 = vld [vmem:[%s12469_s3 + $0x118] sm:$0xff]  ;;  %v4640_v5 = vld [vmem:[%s12469_s3 + $0x1f0] sm:$0xff] }
 0x76d   :  { %7262 = vmatpush1.bf16.msra.mxu0 %v12915_v23  ;;  %7294 = vmatpush1.bf16.msra.mxu1 %v12916_v12  ;;  %v4598_v23 = vld [vmem:[%s12469_s3 + $0xa0] sm:$0xff]  ;;  %v4596_v12 = vld [vmem:[%s12469_s3 + $0x90] sm:$0xff] }
 0x76e   :  { %7264 = vmatprep.subr.bf16.mxu0 %v12917_v6  ;;  %7296 = vmatprep.subr.bf16.mxu1 %v12918_v0  ;;  %v11409_v24 = vmul.f32 %v7929_v52, %v3814_v26  ;;  %v4600_v6 = vld [vmem:[%s12469_s3 + $0xb0] sm:$0xff]  ;;  %v4605_v0 = vld [vmem:[%s12469_s3 + $0xd8] sm:$0xff] }
 0x76f   :  { %v11473_v11 = vpack.c.bf16 %v4600_v6, %v4596_v12  ;;  %v11477_v38 = vpack.c.bf16 %v4609_v22, %v4605_v0  ;;  %v4621_v52 = vld [vmem:[%s12469_s3 + $0x158] sm:$0xff]  ;;  %v4624_v26 = vld [vmem:[%s12469_s3 + $0x170] sm:$0xff] }
 0x770   :  { %12920 = vst [vmem:[#allocation6_spill] sm:$0xff] %v11409_v24  ;;  %v4808_v0 = vld [vmem:[%s12472_s4 + $0x10] sm:$0xff] }
 0x771   :  { %7266 = vmatpush1.bf16.msra.mxu0 %v11074_v53  ;;  %7298 = vmatpush1.bf16.msra.mxu1 %v12919_v2  ;;  %v4585_v53 = vld [vmem:[%s12469_s3 + $0x38] sm:$0xff]  ;;  %v11471_v2 = vpack.c.bf16 %v4598_v23, %v4594_v3  ;;  %v4806_v3 = vld [vmem:[%s12472_s4] sm:$0xff]  ;;  %v4812_v22 = vld [vmem:[%s12472_s4 + $0x30] sm:$0xff] }
 0x772   :  { %7268 = vmatprep.subr.bf16.mxu0 %v11086_v15  ;;  %7300 = vmatprep.subr.bf16.mxu1 %v11088_v49  ;;  %v4578_v15 = vld [vmem:[%s12469_s3] sm:$0xff]  ;;  %v11377_v50 = vpack.c.bf16 %v4585_v53, %v4581_v1  ;;  %v4604_v1 = vld [vmem:[%s12469_s3 + $0xd0] sm:$0xff] }
 0x773   :  { %v4582_v49 = vld [vmem:[%s12469_s3 + $0x20] sm:$0xff]  ;;  %v4608_v53 = vld [vmem:[%s12469_s3 + $0xf0] sm:$0xff] }
 0x774   :  { %v11399_v46 = vpack.c.bf16 %v4582_v49, %v4578_v15  ;;  %v4617_v15 = vld [vmem:[%s12469_s3 + $0x138] sm:$0xff]  ;;  %v11493_v49 = vpack.c.bf16 %v4608_v53, %v4604_v1  ;;  %v4810_v23 = vld [vmem:[%s12472_s4 + $0x20] sm:$0xff]  ;;  %v11608_v1 = vpack.c.bf16 %v4812_v22, %v4808_v0  ;;  %v4815_v53 = vld [vmem:[%s12472_s4 + $0x48] sm:$0xff] }
 0x775   :  { %7270 = vmatpush1.bf16.msra.mxu0 %v11110_v32  ;;  %7302 = vmatpush1.bf16.msra.mxu1 %v11112_v8  ;;  %v4580_v8 = vld [vmem:[%s12469_s3 + $0x10] sm:$0xff]  ;;  %v11599_v6 = vpack.c.bf16 %v4810_v23, %v4806_v3  ;;  %v4831_v22 = vld [vmem:[%s12472_s4 + $0xc8] sm:$0xff] }
 0x776   :  { %7272 = vmatprep.subr.bf16.mxu0 %v11119_v45  ;;  %7304 = vmatprep.subr.bf16.mxu1 %v11121_v47  ;;  %v4584_v32 = vld [vmem:[%s12469_s3 + $0x30] sm:$0xff]  ;;  %v4591_v47 = vld [vmem:[%s12469_s3 + $0x68] sm:$0xff]  ;;  %v4589_v45 = vld [vmem:[%s12469_s3 + $0x58] sm:$0xff] }
 0x777   :  { %v11401_v14 = vpack.c.bf16 %v4584_v32, %v4580_v8  ;;  %v11497_v8 = vpack.c.bf16 %v4617_v15, %v4613_v36  ;;  %v4612_v32 = vld [vmem:[%s12469_s3 + $0x110] sm:$0xff]  ;;  %v4819_v36 = vld [vmem:[%s12472_s4 + $0x68] sm:$0xff]  ;;  %v4817_v15 = vld [vmem:[%s12472_s4 + $0x58] sm:$0xff] }
 0x778   :  { %v4824_v3 = vld [vmem:[%s12472_s4 + $0x90] sm:$0xff] }
 0x779   :  { %7274 = vmatpush1.bf16.msra.mxu0 %v11134_v25  ;;  %7306 = vmatpush1.bf16.msra.mxu1 %v11136_v55  ;;  %v11413_v25 = vpack.c.bf16 %v4591_v47, %v4587_v10  ;;  %v11415_v55 = vpack.c.bf16 %v4593_v21, %v4589_v45  ;;  %v4616_v10 = vld [vmem:[%s12469_s3 + $0x130] sm:$0xff] }
 0x77a   :  { %7308 = vmatprep.subr.bf16.mxu0 %v11375_v42  ;;  %7340 = vmatprep.subr.bf16.mxu1 %v11377_v50  ;;  %v11513_v47 = vpack.c.bf16 %v4616_v10, %v4612_v32  ;;  %v4620_v21 = vld [vmem:[%s12469_s3 + $0x150] sm:$0xff]  ;;  %v11622_v32 = vpack.c.bf16 %v4819_v36, %v4815_v53  ;;  %v4821_v10 = vld [vmem:[%s12472_s4 + $0x78] sm:$0xff]  ;;  %v4835_v53 = vld [vmem:[%s12472_s4 + $0xe8] sm:$0xff] }
 0x77b   :  { %v11533_v4 = vpack.c.bf16 %v4624_v26, %v4620_v21  ;;  %v11633_v21 = vpack.c.bf16 %v4821_v10, %v4817_v15  ;;  %v4828_v23 = vld [vmem:[%s12472_s4 + $0xb0] sm:$0xff]  ;;  %v4833_v36 = vld [vmem:[%s12472_s4 + $0xd8] sm:$0xff]  ;;  %v11694_v15 = vpack.c.bf16 %v4835_v53, %v4831_v22  ;;  %v4838_v22 = vld [vmem:[%s12472_s4 + $0x100] sm:$0xff] }
 0x77c   :  { %4388 = vmatmul.mubr.f32.vlgmr.msra.gmra.mrb[26].mxu0 %v11409_v24  ;;  %4459 = vmatmul.mubr.f32.vlgmr.msra.gmra.mrb[28].mxu1 %v11409_v24  ;;  %v11680_v0 = vpack.c.bf16 %v4828_v23, %v4824_v3  ;;  %v4837_v10 = vld [vmem:[%s12472_s4 + $0xf8] sm:$0xff]  ;;  %v4842_v53 = vld [vmem:[%s12472_s4 + $0x120] sm:$0xff] }
 0x77d   :  { %7310 = vmatpush1.bf16.msra.mxu0 %v11399_v46  ;;  %7342 = vmatpush1.bf16.msra.mxu1 %v11401_v14  ;;  %12921 = vst [vmem:[#allocation7_spill] sm:$0xff] %v11694_v15  ;;  %v4845_v23 = vld [vmem:[%s12472_s4 + $0x138] sm:$0xff] }
 0x77e   :  { %7312 = vmatprep.subr.bf16.mxu0 %v11413_v25  ;;  %7344 = vmatprep.subr.bf16.mxu1 %v11415_v55 }
 0x77f   :  { %4706 = vmatprep.mubr.f32.mxu0 %v12695_v27  ;;  %4777 = vmatprep.mubr.f32.mxu1 %v12695_v27 }
 0x781   :  { %7314 = vmatpush1.bf16.msra.mxu0 %v11439_v9  ;;  %7346 = vmatpush1.bf16.msra.mxu1 %v11441_v7 }
 0x782   :  { %7316 = vmatprep.subr.bf16.mxu0 %v11448_v44  ;;  %7348 = vmatprep.subr.bf16.mxu1 %v11450_v16 }
 0x785   :  { %7318 = vmatpush1.bf16.msra.mxu0 %v11471_v2  ;;  %7350 = vmatpush1.bf16.msra.mxu1 %v11473_v11 }
 0x786   :  { %7320 = vmatprep.subr.bf16.mxu0 %v11164_v33  ;;  %7352 = vmatprep.subr.bf16.mxu1 %v11477_v38  ;;  %v4625_v33 = vld [vmem:[%s12469_s3 + $0x178] sm:$0xff] }
 0x787   :  { %v11517_v45 = vpack.c.bf16 %v4625_v33, %v4621_v52  ;;  %v4814_v52 = vld [vmem:[%s12472_s4 + $0x40] sm:$0xff] }
 0x788   :  { %v4818_v33 = vld [vmem:[%s12472_s4 + $0x60] sm:$0xff] }
 0x789   :  { %7322 = vmatpush1.bf16.msra.mxu0 %v11180_v34  ;;  %7354 = vmatpush1.bf16.msra.mxu1 %v11493_v49  ;;  %v4629_v34 = vld [vmem:[%s12469_s3 + $0x198] sm:$0xff]  ;;  %v11635_v26 = vpack.c.bf16 %v4818_v33, %v4814_v52  ;;  %v4830_v52 = vld [vmem:[%s12472_s4 + $0xc0] sm:$0xff] }
 0x78a   :  { %7324 = vmatprep.subr.bf16.mxu0 %v11184_v18  ;;  %7356 = vmatprep.subr.bf16.mxu1 %v11497_v8  ;;  %v4633_v18 = vld [vmem:[%s12469_s3 + $0x1b8] sm:$0xff]  ;;  %v4834_v33 = vld [vmem:[%s12472_s4 + $0xe0] sm:$0xff] }
 0x78b   :  { %v11537_v29 = vpack.c.bf16 %v4633_v18, %v4629_v34  ;;  %v4816_v34 = vld [vmem:[%s12472_s4 + $0x50] sm:$0xff] }
 0x78c   :  { %v4820_v18 = vld [vmem:[%s12472_s4 + $0x70] sm:$0xff] }
 0x78d   :  { %7326 = vmatpush1.bf16.msra.mxu0 %v11200_v48  ;;  %7358 = vmatpush1.bf16.msra.mxu1 %v11513_v47  ;;  %v4637_v48 = vld [vmem:[%s12469_s3 + $0x1d8] sm:$0xff]  ;;  %v11644_v51 = vpack.c.bf16 %v4820_v18, %v4816_v34  ;;  %v11705_v34 = vpack.c.bf16 %v4837_v10, %v4833_v36  ;;  %v11707_v18 = vpack.c.bf16 %v4834_v33, %v4830_v52  ;;  %v4840_v52 = vld [vmem:[%s12472_s4 + $0x110] sm:$0xff] }
 0x78e   :  { %7328 = vmatprep.subr.bf16.mxu0 %v11204_v54  ;;  %7360 = vmatprep.subr.bf16.mxu1 %v11517_v45  ;;  %v4641_v54 = vld [vmem:[%s12469_s3 + $0x1f8] sm:$0xff]  ;;  %v11743_v10 = vpack.c.bf16 %v4842_v53, %v4838_v22  ;;  %v4844_v33 = vld [vmem:[%s12472_s4 + $0x130] sm:$0xff]  ;;  %v4846_v22 = vld [vmem:[%s12472_s4 + $0x140] sm:$0xff] }
 0x78f   :  { %v11557_v59 = vpack.c.bf16 %v4641_v54, %v4637_v48  ;;  %v4827_v48 = vld [vmem:[%s12472_s4 + $0xa8] sm:$0xff]  ;;  %v4825_v54 = vld [vmem:[%s12472_s4 + $0x98] sm:$0xff]  ;;  %12922 = vst [vmem:[#allocation8_spill] sm:$0xff] %v11705_v34  ;;  %12923 = vst [vmem:[#allocation9_spill] sm:$0xff] %v11707_v18 }
 0x790   :  { %12927 = vst [vmem:[#allocation13_spill] sm:$0xff] %v11743_v10  ;;  %v4850_v53 = vld [vmem:[%s12472_s4 + $0x160] sm:$0xff] }
 0x791   :  { %7330 = vmatpush1.bf16.msra.mxu0 %v11220_v35  ;;  %7362 = vmatpush1.bf16.msra.mxu1 %v11533_v4  ;;  %v11567_v35 = vpack.c.bf16 %v4640_v5, %v4636_v41  ;;  %v11658_v41 = vpack.c.bf16 %v4827_v48, %v4823_v17  ;;  %v4829_v5 = vld [vmem:[%s12472_s4 + $0xb8] sm:$0xff]  ;;  %v4832_v17 = vld [vmem:[%s12472_s4 + $0xd0] sm:$0xff] }
 0x792   :  { %7332 = vmatprep.subr.bf16.mxu0 %v11224_v20  ;;  %7364 = vmatprep.subr.bf16.mxu1 %v11537_v29  ;;  %v4807_v20 = vld [vmem:[%s12472_s4 + $0x8] sm:$0xff]  ;;  %v4836_v48 = vld [vmem:[%s12472_s4 + $0xf0] sm:$0xff] }
 0x795   :  { %7334 = vmatpush1.bf16.msra.mxu0 %v11240_v30  ;;  %7366 = vmatpush1.bf16.msra.mxu1 %v11553_v43  ;;  %v4811_v30 = vld [vmem:[%s12472_s4 + $0x28] sm:$0xff] }
 0x796   :  { %7336 = vmatprep.subr.bf16.mxu0 %v11244_v62  ;;  %7368 = vmatprep.subr.bf16.mxu1 %v11557_v59  ;;  %v4809_v62 = vld [vmem:[%s12472_s4 + $0x18] sm:$0xff] }
 0x799   :  { %7338 = vmatpush1.bf16.msra.mxu0 %v11254_v57  ;;  %7370 = vmatpush1.bf16.msra.mxu1 %v11567_v35  ;;  %v11586_v57 = vpack.c.bf16 %v4811_v30, %v4807_v20  ;;  %v4822_v20 = vld [vmem:[%s12472_s4 + $0x80] sm:$0xff] }
 0x79a   :  { %v4826_v30 = vld [vmem:[%s12472_s4 + $0xa0] sm:$0xff] }
 0x79b   :  { %7372 = vmatprep.subr.bf16.mxu0 %v11586_v57 }
 0x79c   :  { %4707 = vmatmul.mubr.f32.vlgmr.msra.gmra.mrb[12].mxu0 %v11320_v58  ;;  %4778 = vmatmul.mubr.f32.vlgmr.msra.gmra.mrb[12].mxu1 %v11320_v58  ;;  %v4813_v58 = vld [vmem:[%s12472_s4 + $0x38] sm:$0xff] }
 0x79d   :  { %4934 = vmatprep.mubr.f32.mxu0 %v12695_v27  ;;  %5005 = vmatprep.mubr.f32.mxu1 %v12695_v27  ;;  %v11597_v12 = vpack.c.bf16 %v4813_v58, %v4809_v62  ;;  %v11669_v62 = vpack.c.bf16 %v4829_v5, %v4825_v54  ;;  %v11671_v58 = vpack.c.bf16 %v4826_v30, %v4822_v20  ;;  %v4839_v5 = vld [vmem:[%s12472_s4 + $0x108] sm:$0xff]  ;;  %v4841_v30 = vld [vmem:[%s12472_s4 + $0x118] sm:$0xff] }
 0x79e   :  { %7374 = vmatpush1.bf16.msra.mxu0 %v11599_v6  ;;  %v11716_v54 = vpack.c.bf16 %v4836_v48, %v4832_v17  ;;  %v4843_v20 = vld [vmem:[%s12472_s4 + $0x128] sm:$0xff]  ;;  %v11741_v36 = vpack.c.bf16 %v4845_v23, %v4841_v30  ;;  %v11752_v17 = vpack.c.bf16 %v4844_v33, %v4840_v52  ;;  %v4853_v23 = vld [vmem:[%s12472_s4 + $0x178] sm:$0xff]  ;;  %v11779_v33 = vpack.c.bf16 %v4850_v53, %v4846_v22 }
 0x79f   :  { %7404 = vmatprep.subr.bf16.mxu1 %v11597_v12  ;;  %7376 = vmatprep.subr.bf16.mxu0 %v11622_v32  ;;  %v11730_v3 = vpack.c.bf16 %v4843_v20, %v4839_v5  ;;  %v4847_v48 = vld [vmem:[%s12472_s4 + $0x148] sm:$0xff]  ;;  %v4849_v20 = vld [vmem:[%s12472_s4 + $0x158] sm:$0xff] }
 0x7a0   :  { %7406 = vmatpush1.bf16.msra.mxu1 %v11608_v1  ;;  %12924 = vst [vmem:[#allocation10_spill] sm:$0xff] %v11716_v54  ;;  %12926 = vst [vmem:[#allocation12_spill] sm:$0xff] %v11741_v36  ;;  %v4851_v5 = vld [vmem:[%s12472_s4 + $0x168] sm:$0xff]  ;;  %v11777_v52 = vpack.c.bf16 %v4853_v23, %v4849_v20  ;;  %v4857_v22 = vld [vmem:[%s12472_s4 + $0x198] sm:$0xff] }
 0x7a1   :  { %7408 = vmatprep.subr.bf16.mxu1 %v11633_v21  ;;  %12925 = vst [vmem:[#allocation11_spill] sm:$0xff] %v11730_v3  ;;  %12928 = vst [vmem:[#allocation14_spill] sm:$0xff] %v11752_v17  ;;  %v11766_v30 = vpack.c.bf16 %v4851_v5, %v4847_v48  ;;  %v4848_v48 = vld [vmem:[%s12472_s4 + $0x150] sm:$0xff]  ;;  %v4855_v20 = vld [vmem:[%s12472_s4 + $0x188] sm:$0xff] }
 0x7a2   :  { %7378 = vmatpush1.bf16.msra.mxu0 %v11635_v26  ;;  %12930 = vst [vmem:[#allocation18_spill] sm:$0xff] %v11777_v52  ;;  %12931 = vst [vmem:[#allocation21_spill] sm:$0xff] %v11779_v33  ;;  %v4852_v5 = vld [vmem:[%s12472_s4 + $0x170] sm:$0xff]  ;;  %v4859_v23 = vld [vmem:[%s12472_s4 + $0x1a8] sm:$0xff] }
 0x7a3   :  { %7380 = vmatprep.subr.bf16.mxu0 %v11658_v41  ;;  %12929 = vst [vmem:[#allocation17_spill] sm:$0xff] %v11766_v30  ;;  %v11788_v24 = vpack.c.bf16 %v4852_v5, %v4848_v48  ;;  %v11802_v53 = vpack.c.bf16 %v4859_v23, %v4855_v20  ;;  %v4861_v48 = vld [vmem:[%s12472_s4 + $0x1b8] sm:$0xff]  ;;  %v4854_v5 = vld [vmem:[%s12472_s4 + $0x180] sm:$0xff]  ;;  %v4856_v20 = vld [vmem:[%s12472_s4 + $0x190] sm:$0xff] }
 0x7a4   :  { %7410 = vmatpush1.bf16.msra.mxu1 %v11644_v51  ;;  %v4860_v23 = vld [vmem:[%s12472_s4 + $0x1b0] sm:$0xff] }
 0x7a5   :  { %7412 = vmatprep.subr.bf16.mxu1 %v11669_v62  ;;  %12932 = vst [vmem:[#allocation22_spill] sm:$0xff] %v11788_v24  ;;  %12933 = vst [vmem:[#allocation23_spill] sm:$0xff] %v11802_v53 }
 0x7a6   :  { %7382 = vmatpush1.bf16.msra.mxu0 %v11671_v58 }
 0x7a7   :  { %7384 = vmatprep.subr.bf16.mxu0 %v11694_v15 }
 0x7a8   :  { %7414 = vmatpush1.bf16.msra.mxu1 %v11680_v0 }
 0x7a9   :  { %7416 = vmatprep.subr.bf16.mxu1 %v11705_v34 }
 0x7aa   :  { %7386 = vmatpush1.bf16.msra.mxu0 %v11707_v18 }
 0x7ab   :  { %7388 = vmatprep.subr.bf16.mxu0 %v11730_v3 }
 0x7ac   :  { %7418 = vmatpush1.bf16.msra.mxu1 %v11716_v54 }
 0x7ad   :  { %7420 = vmatprep.subr.bf16.mxu1 %v11741_v36 }
 0x7ae   :  { %7390 = vmatpush1.bf16.msra.mxu0 %v11743_v10 }
 0x7af   :  { %7392 = vmatprep.subr.bf16.mxu0 %v11766_v30 }
 0x7b0   :  { %7422 = vmatpush1.bf16.msra.mxu1 %v11752_v17 }
 0x7b1   :  { %7424 = vmatprep.subr.bf16.mxu1 %v11777_v52  ;;  %v11815_v52 = vpack.c.bf16 %v4858_v39, %v4854_v5  ;;  %v4863_v39 = vld [vmem:[%s12472_s4 + $0x1c8] sm:$0xff] }
 0x7b2   :  { %7394 = vmatpush1.bf16.msra.mxu0 %v11779_v33  ;;  %v11813_v33 = vpack.c.bf16 %v4861_v48, %v4857_v22  ;;  %v4867_v22 = vld [vmem:[%s12472_s4 + $0x1e8] sm:$0xff]  ;;  %v4865_v48 = vld [vmem:[%s12472_s4 + $0x1d8] sm:$0xff] }
 0x7b3   :  { %12935 = vst [vmem:[#allocation24_spill] sm:$0xff] %v11815_v52  ;;  %7396 = vmatprep.subr.bf16.mxu0 %v11802_v53  ;;  %v11838_v5 = vpack.c.bf16 %v4867_v22, %v4863_v39  ;;  %v4864_v39 = vld [vmem:[%s12472_s4 + $0x1d0] sm:$0xff] }
 0x7b4   :  { %7426 = vmatpush1.bf16.msra.mxu1 %v11788_v24  ;;  %12934 = vst [vmem:[#allocation20_spill] sm:$0xff] %v11813_v33  ;;  %v11824_v24 = vpack.c.bf16 %v4860_v23, %v4856_v20  ;;  %v4869_v20 = vld [vmem:[%s12472_s4 + $0x1f8] sm:$0xff]  ;;  %v4862_v23 = vld [vmem:[%s12472_s4 + $0x1c0] sm:$0xff]  ;;  %v4868_v22 = vld [vmem:[%s12472_s4 + $0x1f0] sm:$0xff] }
 0x7b5   :  { %7428 = vmatprep.subr.bf16.mxu1 %v11813_v33  ;;  %12937 = vst [vmem:[#allocation26_spill] sm:$0xff] %v11838_v5  ;;  %v11849_v33 = vpack.c.bf16 %v4869_v20, %v4865_v48  ;;  %v4515_v48 = vld [vmem:[%s12473_s5 + $0x28] sm:$0xff]  ;;  %v4513_v20 = vld [vmem:[%s12473_s5 + $0x18] sm:$0xff] }
 0x7b6   :  { %12936 = vst [vmem:[#allocation25_spill] sm:$0xff] %v11824_v24  ;;  %7398 = vmatpush1.bf16.msra.mxu0 %v11815_v52  ;;  %v4866_v52 = vld [vmem:[%s12472_s4 + $0x1e0] sm:$0xff] }
 0x7b7   :  { %12938 = vst [vmem:[#allocation27_spill] sm:$0xff] %v11849_v33  ;;  %v11851_v53 = vpack.c.bf16 %v4866_v52, %v4862_v23  ;;  %7400 = vmatprep.subr.bf16.mxu0 %v11838_v5  ;;  %v4511_v52 = vld [vmem:[%s12473_s5 + $0x8] sm:$0xff] }
 0x7b8   :  { %7430 = vmatpush1.bf16.msra.mxu1 %v11824_v24  ;;  %v11860_v24 = vpack.c.bf16 %v4868_v22, %v4864_v39  ;;  %v11874_v23 = vpack.c.bf16 %v4515_v48, %v4511_v52  ;;  %v4517_v39 = vld [vmem:[%s12473_s5 + $0x38] sm:$0xff] }
 0x7b9   :  { %12939 = vst [vmem:[#allocation28_spill] sm:$0xff] %v11851_v53  ;;  %7432 = vmatprep.subr.bf16.mxu1 %v11849_v33  ;;  %v11879_v22 = vpack.c.bf16 %v4517_v39, %v4513_v20 }
 0x7ba   :  { %12940 = vst [vmem:[#allocation29_spill] sm:$0xff] %v11860_v24  ;;  %7402 = vmatpush1.bf16.msra.mxu0 %v11851_v53  ;;  %12941 = vst [vmem:[#allocation30_spill] sm:$0xff] %v11874_v23  ;;  %v11886_v53 = vld [vmem:[%s12476_s6] sm:$0xf] }
 0x7bb   :  { %12942 = vst [vmem:[#allocation31_spill] sm:$0xff] %v11879_v22  ;;  %7436 = vmatprep.subr.bf16.mxu0 %v11874_v23  ;;  %v4474_v52 = vrot.slane %v11886_v53, %v12900_v40  ;;  %v4478_v20 = vrot.slane %v11886_v53, %v12901_v60 }
 0x7bc   :  { %7434 = vmatpush1.bf16.msra.mxu1 %v11860_v24  ;;  %v4470_v24 = vrot.slane %v11886_v53, %v12899_v28 }
 0x7bd   :  { %7468 = vmatprep.subr.bf16.mxu1 %v11879_v22 }
 0x84f   :  { %v4389_v48 = vpop.f32.mrb[26].mxu0  ;;  %v4460_v33 = vpop.f32.mrb[28].mxu1 }
 0x850   :  { %v4487_v5 = vadd.f32 %v4470_v24, %v4389_v48  ;;  %v4391_v39 = vpop.f32.mrb[27].mxu0  ;;  %v11894_v23 = vpop.f32.mrb[29].mxu1  ;;  %v4489_v10 = vadd.f32 %v4478_v20, %v4460_v33 }
 0x851   :  { %v4488_v22 = vadd.f32 %v4474_v52, %v4391_v39 }
 0x852   :  { %v4491_v30 = vmul.f32 0.5, %v4487_v5 }
 0x853   :  { %v4495_v17 = vmul.f32 0.5, %v4488_v22 }
 0x854   :  { %7930 = vtanh.f32 %v4491_v30 }
 0x855   :  { %7932 = vtanh.f32 %v4495_v17 }
 0x856   :  { %7934 = vtanh.f32 %v4489_v10 }
 0x85e   :  { %v7931_v28 = vpop.eup %7930 }
 0x85f   :  { %v7933_v36 = vpop.eup %7932  ;;  %v4493_v3 = vadd.f32 1.0, %v7931_v28 }
 0x860   :  { %v4497_v40 = vadd.f32 1.0, %v7933_v36  ;;  %v7935_v18 = vpop.eup %7934 }
 0x861   :  { %v4494_v54 = vmul.f32 0.5, %v4493_v3 }
 0x862   :  { %v4498_v24 = vmul.f32 0.5, %v4497_v40 }
 0x863   :  { %v4505_v48 = vmul.f32 %v7935_v18, %v4494_v54 }
 0x864   :  { %v4504_v60 = vmul.f32 %v4498_v24, %v11310_v31 }
 0x866   :  { %v11897_v34 = vadd.f32 %v4505_v48, %v4504_v60 }
 0x86f   :  { %v4708_v15 = vpop.f32.mrb[12].mxu0  ;;  %v4779_v52 = vpop.f32.mrb[12].mxu1 }
 0x870   :  { %v7737_v5 = vadd.f32 %v4708_v15, %v12723_v56  ;;  %v4710_v30 = vpop.f32.mrb[13].mxu0  ;;  %v4781_v33 = vpop.f32.mrb[13].mxu1  ;;  %v7753_v28 = vadd.f32 %v4779_v52, %v12725_v13 }
 0x871   :  { %v7738_v10 = vadd.f32 %v4710_v30, %v12724_v63  ;;  %v7754_v40 = vadd.f32 %v4781_v33, %v12726_v19  ;;  %v4510_v30 = vld [vmem:[%s12473_s5] sm:$0xff] }
 0x872   :  { %v4788_v17 = vmul.f32 0.5, %v7737_v5  ;;  %v4514_v33 = vld [vmem:[%s12473_s5 + $0x20] sm:$0xff] }
 0x873   :  { %v4792_v22 = vmul.f32 0.5, %v7738_v10  ;;  %v4797_v31 = vmul.f32 0.5, %v7754_v40  ;;  %v4512_v10 = vld [vmem:[%s12473_s5 + $0x10] sm:$0xff]  ;;  %v4525_v40 = vld [vmem:[%s12473_s5 + $0x78] sm:$0xff] }
 0x874   :  { %7936 = vtanh.f32 %v4788_v17  ;;  %v4519_v17 = vld [vmem:[%s12473_s5 + $0x48] sm:$0xff] }
 0x875   :  { %7938 = vtanh.f32 %v4792_v22  ;;  %v4523_v22 = vld [vmem:[%s12473_s5 + $0x68] sm:$0xff] }
 0x876   :  { %7940 = vtanh.f32 %v7753_v28  ;;  %v4521_v28 = vld [vmem:[%s12473_s5 + $0x58] sm:$0xff] }
 0x877   :  { %7942 = vtanh.f32 %v4797_v31 }
 0x87e   :  { %v7937_v60 = vpop.eup %7936 }
 0x87f   :  { %v7939_v18 = vpop.eup %7938  ;;  %v4790_v54 = vadd.f32 1.0, %v7937_v60 }
 0x880   :  { %v4794_v3 = vadd.f32 1.0, %v7939_v18  ;;  %v7941_v36 = vpop.eup %7940  ;;  %v11931_v18 = vpack.c.bf16 %v4514_v33, %v4510_v30  ;;  %v4482_v30 = vrot.slane %v11886_v53, %v12728_v37  ;;  %v4531_v33 = vld [vmem:[%s12473_s5 + $0xa8] sm:$0xff] }
 0x881   :  { %v4791_v15 = vmul.f32 0.5, %v4790_v54  ;;  %v7943_v52 = vpop.eup %7942 }
 0x882   :  { %v4795_v20 = vmul.f32 0.5, %v4794_v3  ;;  %v4799_v5 = vadd.f32 1.0, %v7943_v52  ;;  %v4518_v3 = vld [vmem:[%s12473_s5 + $0x40] sm:$0xff]  ;;  %v4524_v52 = vld [vmem:[%s12473_s5 + $0x70] sm:$0xff] }
 0x883   :  { %v4802_v39 = vmul.f32 %v7941_v36, %v4791_v15  ;;  %v4522_v15 = vld [vmem:[%s12473_s5 + $0x60] sm:$0xff] }
 0x884   :  { %v4801_v24 = vmul.f32 %v4795_v20, %v11317_v61  ;;  %v4516_v61 = vld [vmem:[%s12473_s5 + $0x30] sm:$0xff]  ;;  %v4800_v31 = vmul.f32 0.5, %v4799_v5  ;;  %v11943_v20 = vpack.c.bf16 %v4523_v22, %v4519_v17  ;;  %v4527_v5 = vld [vmem:[%s12473_s5 + $0x88] sm:$0xff]  ;;  %v11971_v53 = vpack.c.bf16 %v4522_v15, %v4518_v3  ;;  %v4526_v22 = vld [vmem:[%s12473_s5 + $0x80] sm:$0xff] }
 0x885   :  { %v11933_v54 = vpack.c.bf16 %v4516_v61, %v4512_v10  ;;  %v4529_v10 = vld [vmem:[%s12473_s5 + $0x98] sm:$0xff]  ;;  %v4532_v3 = vld [vmem:[%s12473_s5 + $0xb0] sm:$0xff]  ;;  %v4535_v15 = vld [vmem:[%s12473_s5 + $0xc8] sm:$0xff] }
 0x886   :  { %v11904_v48 = vadd.f32 %v4802_v39, %v4801_v24  ;;  %v11945_v39 = vpack.c.bf16 %v4525_v40, %v4521_v28  ;;  %v4520_v24 = vld [vmem:[%s12473_s5 + $0x50] sm:$0xff]  ;;  %v4533_v61 = vld [vmem:[%s12473_s5 + $0xb8] sm:$0xff]  ;;  %12944 = vst [vmem:[#allocation33_spill] sm:$0xff] %v11971_v53  ;;  %v4530_v28 = vld [vmem:[%s12473_s5 + $0xa0] sm:$0xff]  ;;  %v11983_v40 = vpack.c.bf16 %v4531_v33, %v4527_v5 }
 0x887   :  { %v11973_v17 = vpack.c.bf16 %v4524_v52, %v4520_v24  ;;  %v4490_v24 = vadd.f32 %v4482_v30, %v11894_v23  ;;  %v4539_v52 = vld [vmem:[%s12473_s5 + $0xe8] sm:$0xff]  ;;  %v4537_v5 = vld [vmem:[%s12473_s5 + $0xd8] sm:$0xff]  ;;  %v12010_v23 = vpack.c.bf16 %v4530_v28, %v4526_v22  ;;  %v4536_v22 = vld [vmem:[%s12473_s5 + $0xd0] sm:$0xff] }
 0x888   :  { %7944 = vtanh.f32 %v11904_v48  ;;  %12943 = vst [vmem:[#allocation32_spill] sm:$0xff] %v11945_v39  ;;  %12946 = vst [vmem:[#allocation35_spill] sm:$0xff] %v11983_v40  ;;  %v4541_v33 = vld [vmem:[%s12473_s5 + $0xf8] sm:$0xff]  ;;  %v4540_v28 = vld [vmem:[%s12473_s5 + $0xf0] sm:$0xff] }
 0x889   :  { %12945 = vst [vmem:[#allocation34_spill] sm:$0xff] %v11973_v17  ;;  %12948 = vst [vmem:[#allocation37_spill] sm:$0xff] %v12010_v23 }
 0x892   :  { %v7945_v60 = vpop.eup %7944 }
 0x893   :  { %v11941_v36 = vmul.f32 %v7945_v60, %v4800_v31  ;;  %v11985_v31 = vpack.c.bf16 %v4533_v61, %v4529_v10  ;;  %v4528_v60 = vld [vmem:[%s12473_s5 + $0x90] sm:$0xff]  ;;  %v4534_v10 = vld [vmem:[%s12473_s5 + $0xc0] sm:$0xff] }
 0x894   :  { %v12012_v30 = vpack.c.bf16 %v4532_v3, %v4528_v60  ;;  %v4538_v61 = vld [vmem:[%s12473_s5 + $0xe0] sm:$0xff]  ;;  %v4543_v60 = vld [vmem:[%s12473_s5 + $0x108] sm:$0xff]  ;;  %v4500_v3 = vmul.f32 0.5, %v4490_v24 }
 0x895   :  { %4935 = vmatmul.mubr.f32.vlgmr.msra.gmra.mrb[28].mxu0 %v11941_v36  ;;  %5006 = vmatmul.mubr.f32.vlgmr.msra.gmra.mrb[30].mxu1 %v11941_v36  ;;  %12947 = vst [vmem:[#allocation36_spill] sm:$0xff] %v11985_v31  ;;  %v4542_v24 = vld [vmem:[%s12473_s5 + $0x100] sm:$0xff] }
 0x896   :  { %7438 = vmatpush1.bf16.msra.mxu0 %v11931_v18  ;;  %7470 = vmatpush1.bf16.msra.mxu1 %v11933_v54  ;;  %12949 = vst [vmem:[#allocation38_spill] sm:$0xff] %v12012_v30  ;;  %7946 = vtanh.f32 %v4500_v3  ;;  %v4550_v3 = vld [vmem:[%s12473_s5 + $0x140] sm:$0xff] }
 0x897   :  { %7440 = vmatprep.subr.bf16.mxu0 %v11943_v20  ;;  %7472 = vmatprep.subr.bf16.mxu1 %v11945_v39  ;;  %v12022_v39 = vpack.c.bf16 %v4539_v52, %v4535_v15  ;;  %v4547_v15 = vld [vmem:[%s12473_s5 + $0x128] sm:$0xff]  ;;  %v4545_v52 = vld [vmem:[%s12473_s5 + $0x118] sm:$0xff]  ;;  %7948 = vtanh.f32 %v11897_v34 }
 0x898   :  { %5076 = vmatprep.mubr.f32.mxu0 %v12695_v27  ;;  %5147 = vmatprep.mubr.f32.mxu1 %v12695_v27 }
 0x899   :  { %12950 = vst [vmem:[#allocation39_spill] sm:$0xff] %v12022_v39 }
 0x89a   :  { %7442 = vmatpush1.bf16.msra.mxu0 %v11971_v53  ;;  %7474 = vmatpush1.bf16.msra.mxu1 %v11973_v17  ;;  %v12024_v53 = vpack.c.bf16 %v4541_v33, %v4537_v5  ;;  %v4549_v5 = vld [vmem:[%s12473_s5 + $0x138] sm:$0xff]  ;;  %v12046_v33 = vpack.c.bf16 %v4538_v61, %v4534_v10  ;;  %v12058_v17 = vpack.c.bf16 %v4547_v15, %v4543_v60  ;;  %v4544_v10 = vld [vmem:[%s12473_s5 + $0x110] sm:$0xff] }
 0x89b   :  { %7444 = vmatprep.subr.bf16.mxu0 %v11983_v40  ;;  %7476 = vmatprep.subr.bf16.mxu1 %v11985_v31  ;;  %v12048_v31 = vpack.c.bf16 %v4540_v28, %v4536_v22  ;;  %v4546_v40 = vld [vmem:[%s12473_s5 + $0x120] sm:$0xff]  ;;  %v4548_v61 = vld [vmem:[%s12473_s5 + $0x130] sm:$0xff]  ;;  %v4551_v22 = vld [vmem:[%s12473_s5 + $0x148] sm:$0xff] }
 0x89c   :  { %12951 = vst [vmem:[#allocation40_spill] sm:$0xff] %v12024_v53  ;;  %12952 = vst [vmem:[#allocation41_spill] sm:$0xff] %v12046_v33  ;;  %v4555_v28 = vld [vmem:[%s12473_s5 + $0x168] sm:$0xff]  ;;  %v4553_v60 = vld [vmem:[%s12473_s5 + $0x158] sm:$0xff] }
 0x89d   :  { %12953 = vst [vmem:[#allocation42_spill] sm:$0xff] %v12048_v31  ;;  %12954 = vst [vmem:[#allocation43_spill] sm:$0xff] %v12058_v17  ;;  %v4557_v15 = vld [vmem:[%s12473_s5 + $0x178] sm:$0xff] }
 0x89e   :  { %7446 = vmatpush1.bf16.msra.mxu0 %v12010_v23  ;;  %7478 = vmatpush1.bf16.msra.mxu1 %v12012_v30  ;;  %v12060_v23 = vpack.c.bf16 %v4549_v5, %v4545_v52  ;;  %v12082_v52 = vpack.c.bf16 %v4546_v40, %v4542_v24  ;;  %v12084_v5 = vpack.c.bf16 %v4548_v61, %v4544_v10  ;;  %v4552_v40 = vld [vmem:[%s12473_s5 + $0x150] sm:$0xff]  ;;  %v4559_v10 = vld [vmem:[%s12473_s5 + $0x188] sm:$0xff] }
 0x89f   :  { %7448 = vmatprep.subr.bf16.mxu0 %v12022_v39  ;;  %7480 = vmatprep.subr.bf16.mxu1 %v12024_v53  ;;  %v4554_v53 = vld [vmem:[%s12473_s5 + $0x160] sm:$0xff]  ;;  %v12094_v39 = vpack.c.bf16 %v4555_v28, %v4551_v22  ;;  %v4556_v24 = vld [vmem:[%s12473_s5 + $0x170] sm:$0xff]  ;;  %v4563_v61 = vld [vmem:[%s12473_s5 + $0x1a8] sm:$0xff] }
 0x8a0   :  { %12955 = vst [vmem:[#allocation44_spill] sm:$0xff] %v12060_v23  ;;  %12956 = vst [vmem:[#allocation45_spill] sm:$0xff] %v12082_v52  ;;  %v4561_v22 = vld [vmem:[%s12473_s5 + $0x198] sm:$0xff] }
 0x8a1   :  { %12957 = vst [vmem:[#allocation46_spill] sm:$0xff] %v12084_v5  ;;  %12958 = vst [vmem:[#allocation47_spill] sm:$0xff] %v12094_v39  ;;  %v4565_v28 = vld [vmem:[%s12473_s5 + $0x1b8] sm:$0xff] }
 0x8a2   :  { %7450 = vmatpush1.bf16.msra.mxu0 %v12046_v33  ;;  %7482 = vmatpush1.bf16.msra.mxu1 %v12048_v31  ;;  %v12096_v33 = vpack.c.bf16 %v4557_v15, %v4553_v60  ;;  %v12119_v60 = vpack.c.bf16 %v4554_v53, %v4550_v3  ;;  %v12121_v15 = vpack.c.bf16 %v4556_v24, %v4552_v40  ;;  %v4560_v53 = vld [vmem:[%s12473_s5 + $0x190] sm:$0xff]  ;;  %v4567_v40 = vld [vmem:[%s12473_s5 + $0x1c8] sm:$0xff] }
 0x8a3   :  { %7452 = vmatprep.subr.bf16.mxu0 %v12058_v17  ;;  %7484 = vmatprep.subr.bf16.mxu1 %v12060_v23  ;;  %v4558_v23 = vld [vmem:[%s12473_s5 + $0x180] sm:$0xff]  ;;  %v12131_v31 = vpack.c.bf16 %v4563_v61, %v4559_v10  ;;  %v4564_v3 = vld [vmem:[%s12473_s5 + $0x1b0] sm:$0xff]  ;;  %v4571_v24 = vld [vmem:[%s12473_s5 + $0x1e8] sm:$0xff] }
 0x8a4   :  { %12959 = vst [vmem:[#allocation49_spill] sm:$0xff] %v12096_v33  ;;  %12960 = vst [vmem:[#allocation51_spill] sm:$0xff] %v12121_v15  ;;  %v4562_v17 = vld [vmem:[%s12473_s5 + $0x1a0] sm:$0xff]  ;;  %v4569_v10 = vld [vmem:[%s12473_s5 + $0x1d8] sm:$0xff] }
 0x8a5   :  { %v4573_v61 = vld [vmem:[%s12473_s5 + $0x1f8] sm:$0xff] }
 0x8a6   :  { %7454 = vmatpush1.bf16.msra.mxu0 %v12082_v52  ;;  %7486 = vmatpush1.bf16.msra.mxu1 %v12084_v5  ;;  %v12133_v52 = vpack.c.bf16 %v4565_v28, %v4561_v22  ;;  %v7947_v22 = vpop.eup %7946  ;;  %v12155_v28 = vpack.c.bf16 %v4562_v17, %v4558_v23  ;;  %v12164_v5 = vpack.c.bf16 %v4571_v24, %v4567_v40  ;;  %v4568_v17 = vld [vmem:[%s12473_s5 + $0x1d0] sm:$0xff] }
 0x8a7   :  { %7456 = vmatprep.subr.bf16.mxu0 %v12094_v39  ;;  %7488 = vmatprep.subr.bf16.mxu1 %v12096_v33  ;;  %v12157_v33 = vpack.c.bf16 %v4564_v3, %v4560_v53  ;;  %v4566_v39 = vld [vmem:[%s12473_s5 + $0x1c0] sm:$0xff]  ;;  %v12166_v30 = vpack.c.bf16 %v4573_v61, %v4569_v10  ;;  %v4572_v23 = vld [vmem:[%s12473_s5 + $0x1f0] sm:$0xff]  ;;  %v4502_v53 = vadd.f32 1.0, %v7947_v22  ;;  %v7949_v24 = vpop.eup %7948 }
 0x8a8   :  { %v12181_v40 = vpack.c.bf16 %v4572_v23, %v4568_v17  ;;  %v5307_v22 = vld [vmem:[%s12469_s3 + $0x140] sm:$0xff]  ;;  %v5316_v23 = vld [vmem:[%s12469_s3 + $0x188] sm:$0xff] }
 0x8a9   :  { %v4503_v10 = vmul.f32 0.5, %v4502_v53  ;;  %v5311_v17 = vld [vmem:[%s12469_s3 + $0x160] sm:$0xff] }
 0x8aa   :  { %7458 = vmatpush1.bf16.msra.mxu0 %v12119_v60  ;;  %7490 = vmatpush1.bf16.msra.mxu1 %v12121_v15  ;;  %v4570_v15 = vld [vmem:[%s12473_s5 + $0x1e0] sm:$0xff] }
 0x8ab   :  { %7460 = vmatprep.subr.bf16.mxu0 %v12131_v31  ;;  %7492 = vmatprep.subr.bf16.mxu1 %v12133_v52  ;;  %v12179_v3 = vpack.c.bf16 %v4570_v15, %v4566_v39  ;;  %v12187_v61 = vmul.f32 %v7949_v24, %v4503_v10  ;;  %v5292_v39 = vld [vmem:[%s12469_s3 + $0xc8] sm:$0xff]  ;;  %v5315_v24 = vld [vmem:[%s12469_s3 + $0x180] sm:$0xff] }
 0x8ac   :  { %v5308_v15 = vld [vmem:[%s12469_s3 + $0x148] sm:$0xff]  ;;  %v5319_v10 = vld [vmem:[%s12469_s3 + $0x1a0] sm:$0xff] }
 0x8ae   :  { %7462 = vmatpush1.bf16.msra.mxu0 %v12155_v28  ;;  %7494 = vmatpush1.bf16.msra.mxu1 %v12157_v33 }
 0x8af   :  { %7464 = vmatprep.subr.bf16.mxu0 %v12164_v5  ;;  %7496 = vmatprep.subr.bf16.mxu1 %v12166_v30 }
 0x8b2   :  { %7466 = vmatpush1.bf16.msra.mxu0 %v12179_v3  ;;  %7498 = vmatpush1.bf16.msra.mxu1 %v12181_v40 }
 0x8b3   :  { %7500 = vmatprep.subr.bf16.mxu0 %v11375_v42  ;;  %7532 = vmatprep.subr.bf16.mxu1 %v11377_v50  ;;  %v5296_v42 = vld [vmem:[%s12469_s3 + $0xe8] sm:$0xff] }
 0x8b4   :  { %v7511_v50 = vpack.c.bf16 %v5296_v42, %v5292_v39  ;;  %v5324_v39 = vld [vmem:[%s12469_s3 + $0x1c8] sm:$0xff] }
 0x8b5   :  { %5077 = vmatmul.mubr.f32.vlgmr.msra.gmra.mrb[28].mxu0 %v12187_v61  ;;  %5148 = vmatmul.mubr.f32.vlgmr.msra.gmra.mrb[30].mxu1 %v12187_v61 }
 0x8b6   :  { %7502 = vmatpush1.bf16.msra.mxu0 %v11399_v46  ;;  %7534 = vmatpush1.bf16.msra.mxu1 %v11401_v14  ;;  %v5291_v46 = vld [vmem:[%s12469_s3 + $0xc0] sm:$0xff] }
 0x8b7   :  { %7504 = vmatprep.subr.bf16.mxu0 %v11413_v25  ;;  %7536 = vmatprep.subr.bf16.mxu1 %v11415_v55  ;;  %v5295_v14 = vld [vmem:[%s12469_s3 + $0xe0] sm:$0xff]  ;;  %v5300_v25 = vld [vmem:[%s12469_s3 + $0x108] sm:$0xff] }
 0x8b8   :  { %5395 = vmatprep.mubr.f32.mxu0 %v12695_v27  ;;  %5466 = vmatprep.mubr.f32.mxu1 %v12695_v27  ;;  %v5304_v55 = vld [vmem:[%s12469_s3 + $0x128] sm:$0xff] }
 0x8ba   :  { %7506 = vmatpush1.bf16.msra.mxu0 %v11439_v9  ;;  %7538 = vmatpush1.bf16.msra.mxu1 %v11441_v7  ;;  %v7513_v9 = vpack.c.bf16 %v5295_v14, %v5291_v46  ;;  %v7515_v7 = vpack.c.bf16 %v5304_v55, %v5300_v25  ;;  %v5327_v46 = vld [vmem:[%s12469_s3 + $0x1e0] sm:$0xff]  ;;  %v12980_v55 = vld [vmem:[#allocation29_spill] sm:$0xff] }
 0x8bb   :  { %7508 = vmatprep.subr.bf16.mxu0 %v11448_v44  ;;  %7540 = vmatprep.subr.bf16.mxu1 %v11450_v16  ;;  %v5299_v44 = vld [vmem:[%s12469_s3 + $0x100] sm:$0xff] }
 0x8bc   :  { %v5303_v16 = vld [vmem:[%s12469_s3 + $0x120] sm:$0xff] }
 0x8bd   :  { %v12979_v25 = vld [vmem:[#allocation28_spill] sm:$0xff] }
 0x8be   :  { %7510 = vmatpush1.bf16.msra.mxu0 %v11471_v2  ;;  %7542 = vmatpush1.bf16.msra.mxu1 %v11473_v11  ;;  %v5312_v2 = vld [vmem:[%s12469_s3 + $0x168] sm:$0xff]  ;;  %v7517_v11 = vpack.c.bf16 %v5303_v16, %v5299_v44  ;;  %v12316_v44 = vld [vmem:[%s12476_s6] sm:$0xf]  ;;  %v12983_v16 = vld [vmem:[#allocation15_spill] sm:$0xff] }
 0x8bf   :  { %7512 = vmatprep.subr.bf16.mxu0 %v7511_v50  ;;  %7544 = vmatprep.subr.bf16.mxu1 %v11477_v38  ;;  %v7519_v38 = vpack.c.bf16 %v5312_v2, %v5308_v15  ;;  %v5323_v50 = vld [vmem:[%s12469_s3 + $0x1c0] sm:$0xff]  ;;  %v5159_v15 = vrot.slane %v12316_v44, %v12983_v16 }
 0x8c0   :  { %v7529_v14 = vpack.c.bf16 %v5327_v46, %v5323_v50  ;;  %v12984_v2 = vld [vmem:[#allocation16_spill] sm:$0xff] }
 0x8c2   :  { %7514 = vmatpush1.bf16.msra.mxu0 %v7513_v9  ;;  %7546 = vmatpush1.bf16.msra.mxu1 %v11493_v49  ;;  %v5320_v49 = vld [vmem:[%s12469_s3 + $0x1a8] sm:$0xff]  ;;  %v12981_v9 = vld [vmem:[#allocation30_spill] sm:$0xff] }
 0x8c3   :  { %7516 = vmatprep.subr.bf16.mxu0 %v7515_v7  ;;  %7548 = vmatprep.subr.bf16.mxu1 %v11497_v8  ;;  %v7521_v8 = vpack.c.bf16 %v5311_v17, %v5307_v22  ;;  %v7523_v53 = vpack.c.bf16 %v5320_v49, %v5316_v23  ;;  %v12982_v7 = vld [vmem:[#allocation31_spill] sm:$0xff] }
 0x8c4   :  { %v12985_v23 = vld [vmem:[#allocation19_spill] sm:$0xff] }
 0x8c5   :  { %v5167_v49 = vrot.slane %v12316_v44, %v12985_v23 }
 0x8c6   :  { %7518 = vmatpush1.bf16.msra.mxu0 %v7517_v11  ;;  %7550 = vmatpush1.bf16.msra.mxu1 %v11513_v47  ;;  %v5328_v47 = vld [vmem:[%s12469_s3 + $0x1e8] sm:$0xff]  ;;  %v5163_v11 = vrot.slane %v12316_v44, %v12984_v2 }
 0x8c7   :  { %7520 = vmatprep.subr.bf16.mxu0 %v7519_v38  ;;  %7552 = vmatprep.subr.bf16.mxu1 %v11517_v45  ;;  %v7525_v45 = vpack.c.bf16 %v5319_v10, %v5315_v24  ;;  %v7527_v42 = vpack.c.bf16 %v5328_v47, %v5324_v39 }
 0x8ca   :  { %7522 = vmatpush1.bf16.msra.mxu0 %v7521_v8  ;;  %7554 = vmatpush1.bf16.msra.mxu1 %v11533_v4  ;;  %v12961_v4 = vld [vmem:[#allocation7_spill] sm:$0xff] }
 0x8cb   :  { %7524 = vmatprep.subr.bf16.mxu0 %v7523_v53  ;;  %7556 = vmatprep.subr.bf16.mxu1 %v11537_v29  ;;  %v12962_v29 = vld [vmem:[#allocation8_spill] sm:$0xff] }
 0x8ce   :  { %7526 = vmatpush1.bf16.msra.mxu0 %v7525_v45  ;;  %7558 = vmatpush1.bf16.msra.mxu1 %v11553_v43  ;;  %v12963_v43 = vld [vmem:[#allocation9_spill] sm:$0xff] }
 0x8cf   :  { %7528 = vmatprep.subr.bf16.mxu0 %v7527_v42  ;;  %7560 = vmatprep.subr.bf16.mxu1 %v11557_v59  ;;  %v12964_v59 = vld [vmem:[#allocation10_spill] sm:$0xff] }
 0x8d2   :  { %7530 = vmatpush1.bf16.msra.mxu0 %v7529_v14  ;;  %7562 = vmatpush1.bf16.msra.mxu1 %v11567_v35  ;;  %v12965_v35 = vld [vmem:[#allocation11_spill] sm:$0xff] }
 0x8d3   :  { %7564 = vmatprep.subr.bf16.mxu0 %v11586_v57  ;;  %7596 = vmatprep.subr.bf16.mxu1 %v11597_v12  ;;  %v12966_v57 = vld [vmem:[#allocation12_spill] sm:$0xff]  ;;  %v12967_v12 = vld [vmem:[#allocation13_spill] sm:$0xff] }
 0x8d5   :  { %5396 = vmatmul.mubr.f32.vlgmr.msra.gmra.mrb[14].mxu0 %v11941_v36  ;;  %5467 = vmatmul.mubr.f32.vlgmr.msra.gmra.mrb[14].mxu1 %v11941_v36  ;;  %v12978_v36 = vld [vmem:[#allocation27_spill] sm:$0xff] }
 0x8d6   :  { %7566 = vmatpush1.bf16.msra.mxu0 %v11599_v6  ;;  %7598 = vmatpush1.bf16.msra.mxu1 %v11608_v1  ;;  %v12968_v6 = vld [vmem:[#allocation14_spill] sm:$0xff]  ;;  %v12969_v1 = vld [vmem:[#allocation17_spill] sm:$0xff] }
 0x8d7   :  { %7568 = vmatprep.subr.bf16.mxu0 %v11622_v32  ;;  %7600 = vmatprep.subr.bf16.mxu1 %v11633_v21  ;;  %v12970_v32 = vld [vmem:[#allocation18_spill] sm:$0xff]  ;;  %v12971_v21 = vld [vmem:[#allocation21_spill] sm:$0xff] }
 0x8d8   :  { %5623 = vmatprep.mubr.f32.mxu0 %v12695_v27  ;;  %5694 = vmatprep.mubr.f32.mxu1 %v12695_v27 }
 0x8da   :  { %7570 = vmatpush1.bf16.msra.mxu0 %v11635_v26  ;;  %7602 = vmatpush1.bf16.msra.mxu1 %v11644_v51  ;;  %v12972_v26 = vld [vmem:[#allocation22_spill] sm:$0xff]  ;;  %v12973_v51 = vld [vmem:[#allocation23_spill] sm:$0xff] }
 0x8db   :  { %7572 = vmatprep.subr.bf16.mxu0 %v11658_v41  ;;  %7604 = vmatprep.subr.bf16.mxu1 %v11669_v62  ;;  %v12974_v41 = vld [vmem:[#allocation20_spill] sm:$0xff] }
 0x8dc   :  { %v12975_v62 = vld [vmem:[#allocation24_spill] sm:$0xff] }
 0x8de   :  { %7574 = vmatpush1.bf16.msra.mxu0 %v11671_v58  ;;  %7606 = vmatpush1.bf16.msra.mxu1 %v11680_v0  ;;  %v12976_v58 = vld [vmem:[#allocation25_spill] sm:$0xff]  ;;  %v12977_v0 = vld [vmem:[#allocation26_spill] sm:$0xff] }
 0x8df   :  { %7576 = vmatprep.subr.bf16.mxu0 %v12961_v4  ;;  %7608 = vmatprep.subr.bf16.mxu1 %v12962_v29 }
 0x8e2   :  { %7578 = vmatpush1.bf16.msra.mxu0 %v12963_v43  ;;  %7610 = vmatpush1.bf16.msra.mxu1 %v12964_v59 }
 0x8e3   :  { %7580 = vmatprep.subr.bf16.mxu0 %v12965_v35  ;;  %7612 = vmatprep.subr.bf16.mxu1 %v12966_v57 }
 0x8e6   :  { %7582 = vmatpush1.bf16.msra.mxu0 %v12967_v12  ;;  %7614 = vmatpush1.bf16.msra.mxu1 %v12968_v6 }
 0x8e7   :  { %7584 = vmatprep.subr.bf16.mxu0 %v12969_v1  ;;  %7616 = vmatprep.subr.bf16.mxu1 %v12970_v32 }
 0x8ea   :  { %7586 = vmatpush1.bf16.msra.mxu0 %v12971_v21  ;;  %7618 = vmatpush1.bf16.msra.mxu1 %v12972_v26 }
 0x8eb   :  { %7588 = vmatprep.subr.bf16.mxu0 %v12973_v51  ;;  %7620 = vmatprep.subr.bf16.mxu1 %v12974_v41 }
 0x8ee   :  { %7590 = vmatpush1.bf16.msra.mxu0 %v12975_v62  ;;  %7622 = vmatpush1.bf16.msra.mxu1 %v12976_v58 }
 0x8ef   :  { %7592 = vmatprep.subr.bf16.mxu0 %v12977_v0  ;;  %7624 = vmatprep.subr.bf16.mxu1 %v12978_v36 }
 0x8f2   :  { %7594 = vmatpush1.bf16.msra.mxu0 %v12979_v25  ;;  %7626 = vmatpush1.bf16.msra.mxu1 %v12980_v55 }
 0x8f3   :  { %7628 = vmatprep.subr.bf16.mxu0 %v12981_v9  ;;  %7660 = vmatprep.subr.bf16.mxu1 %v12982_v7 }
 0x988   :  { %v5078_v38 = vpop.f32.mrb[28].mxu0  ;;  %v5149_v22 = vpop.f32.mrb[30].mxu1 }
 0x989   :  { %v5176_v17 = vadd.f32 %v5159_v15, %v5078_v38  ;;  %v5080_v8 = vpop.f32.mrb[29].mxu0  ;;  %v5151_v53 = vpop.f32.mrb[31].mxu1  ;;  %v5178_v47 = vadd.f32 %v5167_v49, %v5149_v22 }
 0x98a   :  { %v5177_v24 = vadd.f32 %v5163_v11, %v5080_v8  ;;  %v12988_v8 = vld [vmem:[#allocation34_spill] sm:$0xff] }
 0x98b   :  { %v5180_v10 = vmul.f32 0.5, %v5176_v17  ;;  %v5171_v17 = vrot.slane %v12316_v44, %v12728_v37  ;;  %v12987_v44 = vld [vmem:[#allocation33_spill] sm:$0xff] }
 0x98c   :  { %v5184_v39 = vmul.f32 0.5, %v5177_v24  ;;  %v12989_v24 = vld [vmem:[#allocation35_spill] sm:$0xff] }
 0x98d   :  { %7950 = vtanh.f32 %v5180_v10  ;;  %v5179_v49 = vadd.f32 %v5171_v17, %v5151_v53  ;;  %v12990_v10 = vld [vmem:[#allocation36_spill] sm:$0xff] }
 0x98e   :  { %7952 = vtanh.f32 %v5184_v39  ;;  %v12991_v39 = vld [vmem:[#allocation37_spill] sm:$0xff]  ;;  %v12994_v53 = vld [vmem:[#allocation40_spill] sm:$0xff] }
 0x98f   :  { %7954 = vtanh.f32 %v5178_v47  ;;  %v12995_v47 = vld [vmem:[#allocation41_spill] sm:$0xff] }
 0x997   :  { %v7951_v45 = vpop.eup %7950 }
 0x998   :  { %v7953_v42 = vpop.eup %7952  ;;  %v5182_v50 = vadd.f32 1.0, %v7951_v45  ;;  %v12997_v45 = vld [vmem:[#allocation43_spill] sm:$0xff] }
 0x999   :  { %v5186_v46 = vadd.f32 1.0, %v7953_v42  ;;  %v7955_v4 = vpop.eup %7954  ;;  %v12998_v42 = vld [vmem:[#allocation44_spill] sm:$0xff] }
 0x99a   :  { %v5183_v14 = vmul.f32 0.5, %v5182_v50  ;;  %v12999_v50 = vld [vmem:[#allocation45_spill] sm:$0xff] }
 0x99b   :  { %v5187_v29 = vmul.f32 0.5, %v5186_v46  ;;  %v13000_v46 = vld [vmem:[#allocation46_spill] sm:$0xff] }
 0x99c   :  { %v5194_v43 = vmul.f32 %v7955_v4, %v5183_v14  ;;  %v13001_v14 = vld [vmem:[#allocation47_spill] sm:$0xff]  ;;  %v13002_v4 = vld [vmem:[#allocation49_spill] sm:$0xff] }
 0x99d   :  { %v5193_v59 = vmul.f32 %v5187_v29, %v11897_v34 }
 0x99f   :  { %v12325_v35 = vadd.f32 %v5194_v43, %v5193_v59  ;;  %v13003_v43 = vld [vmem:[#allocation51_spill] sm:$0xff]  ;;  %v5896_v59 = vld [vmem:[%s12479_s7] sm:$0xff] }
 0x9a8   :  { %v5397_v57 = vpop.f32.mrb[14].mxu0  ;;  %v5468_v12 = vpop.f32.mrb[14].mxu1 }
 0x9a9   :  { %v7739_v6 = vadd.f32 %v5397_v57, %v12723_v56  ;;  %v5399_v1 = vpop.f32.mrb[15].mxu0  ;;  %v5470_v32 = vpop.f32.mrb[15].mxu1  ;;  %v7755_v41 = vadd.f32 %v5468_v12, %v12725_v13  ;;  %v5897_v57 = vld [vmem:[%s12479_s7 + $0x8] sm:$0xff] }
 0x9aa   :  { %v7740_v21 = vadd.f32 %v5399_v1, %v12724_v63  ;;  %v7756_v62 = vadd.f32 %v5470_v32, %v12726_v19  ;;  %v13004_v32 = vld [vmem:[#allocation4_spill] sm:$0xff] }
 0x9ab   :  { %v5477_v26 = vmul.f32 0.5, %v7739_v6  ;;  %v5899_v6 = vld [vmem:[%s12479_s7 + $0x18] sm:$0xff] }
 0x9ac   :  { %v5481_v51 = vmul.f32 0.5, %v7740_v21  ;;  %v5486_v34 = vmul.f32 0.5, %v7756_v62  ;;  %v5903_v21 = vld [vmem:[%s12479_s7 + $0x38] sm:$0xff] }
 0x9ad   :  { %7956 = vtanh.f32 %v5477_v26 }
 0x9ae   :  { %7958 = vtanh.f32 %v5481_v51  ;;  %v5904_v51 = vld [vmem:[%s12479_s7 + $0x40] sm:$0xff] }
 0x9af   :  { %7960 = vtanh.f32 %v7755_v41  ;;  %v5905_v41 = vld [vmem:[%s12479_s7 + $0x48] sm:$0xff] }
 0x9b0   :  { %7962 = vtanh.f32 %v5486_v34  ;;  %v7707_v62 = vpack.c.bf16 %v5905_v41, %v5904_v51  ;;  %v5906_v34 = vld [vmem:[%s12479_s7 + $0x50] sm:$0xff] }
 0x9b7   :  { %v7957_v58 = vpop.eup %7956 }
 0x9b8   :  { %v7959_v0 = vpop.eup %7958  ;;  %v5479_v36 = vadd.f32 1.0, %v7957_v58  ;;  %v5907_v58 = vld [vmem:[%s12479_s7 + $0x58] sm:$0xff] }
 0x9b9   :  { %v5483_v25 = vadd.f32 1.0, %v7959_v0  ;;  %v7961_v55 = vpop.eup %7960  ;;  %v7711_v0 = vpack.c.bf16 %v5907_v58, %v5906_v34 }
 0x9ba   :  { %v5480_v56 = vmul.f32 0.5, %v5479_v36  ;;  %v7963_v13 = vpop.eup %7962  ;;  %v5908_v36 = vld [vmem:[%s12479_s7 + $0x60] sm:$0xff] }
 0x9bb   :  { %v5484_v9 = vmul.f32 0.5, %v5483_v25  ;;  %v5488_v19 = vadd.f32 1.0, %v7963_v13  ;;  %v5909_v25 = vld [vmem:[%s12479_s7 + $0x68] sm:$0xff]  ;;  %v13007_v13 = vld [vmem:[#allocation50_spill] sm:$0xff] }
 0x9bc   :  { %v5491_v7 = vmul.f32 %v7961_v55, %v5480_v56  ;;  %v7715_v56 = vpack.c.bf16 %v5909_v25, %v5908_v36  ;;  %v5910_v55 = vld [vmem:[%s12479_s7 + $0x70] sm:$0xff] }
 0x9bd   :  { %v5490_v63 = vmul.f32 %v5484_v9, %v11904_v48  ;;  %v5489_v11 = vmul.f32 0.5, %v5488_v19  ;;  %v12986_v48 = vld [vmem:[#allocation32_spill] sm:$0xff]  ;;  %v5911_v9 = vld [vmem:[%s12479_s7 + $0x78] sm:$0xff]  ;;  %v13008_v19 = vld [vmem:[#allocation6_spill] sm:$0xff] }
 0x9bf   :  { %v5492_v15 = vadd.f32 %v5491_v7, %v5490_v63  ;;  %v7719_v7 = vpack.c.bf16 %v5911_v9, %v5910_v55  ;;  %v13005_v63 = vld [vmem:[#allocation48_spill] sm:$0xff] }
 0x9c1   :  { %7964 = vtanh.f32 %v5492_v15  ;;  %6035 = vst [vmem:[%s12477_s13] sm:$0xff] %v5492_v15  ;;  %v13006_v15 = vld [vmem:[#allocation5_spill] sm:$0xff] }
 0x9cb   :  { %v7965_v38 = vpop.eup %7964 }
 0x9cc   :  { %v5494_v22 = vmul.f32 %v7965_v38, %v5489_v11  ;;  %v5843_v11 = vld [vmem:[%s12476_s6] sm:$0xf] }
 0x9cd   :  { %v5848_v38 = vrot.slane %v5843_v11, %v12983_v16 }
 0x9ce   :  { %5624 = vmatmul.mubr.f32.vlgmr.msra.gmra.mrb[30].mxu0 %v5494_v22  ;;  %5695 = vmatmul.mubr.f32.vlgmr.msra.gmra.mrb[32].mxu1 %v5494_v22  ;;  %6032 = vst [vmem:[%s12478_s12] sm:$0xff] %v5494_v22  ;;  %v5852_v22 = vrot.slane %v5843_v11, %v12984_v2 }
 0x9cf   :  { %7630 = vmatpush1.bf16.msra.mxu0 %v11931_v18  ;;  %7662 = vmatpush1.bf16.msra.mxu1 %v11933_v54  ;;  %v5189_v18 = vmul.f32 0.5, %v5179_v49  ;;  %v12992_v54 = vld [vmem:[#allocation38_spill] sm:$0xff] }
 0x9d0   :  { %7632 = vmatprep.subr.bf16.mxu0 %v11943_v20  ;;  %7664 = vmatprep.subr.bf16.mxu1 %v12986_v48  ;;  %v12993_v20 = vld [vmem:[#allocation39_spill] sm:$0xff] }
 0x9d1   :  { %5765 = vmatprep.mubr.f32.mxu0 %v12695_v27  ;;  %5836 = vmatprep.mubr.f32.mxu1 %v12695_v27  ;;  %7966 = vtanh.f32 %v5189_v18  ;;  %v12996_v27 = vld [vmem:[#allocation42_spill] sm:$0xff] }
 0x9d2   :  { %7968 = vtanh.f32 %v12325_v35 }
 0x9d3   :  { %7634 = vmatpush1.bf16.msra.mxu0 %v12987_v44  ;;  %7666 = vmatpush1.bf16.msra.mxu1 %v12988_v8  ;;  %v5856_v44 = vrot.slane %v5843_v11, %v12985_v23 }
 0x9d4   :  { %7636 = vmatprep.subr.bf16.mxu0 %v12989_v24  ;;  %7668 = vmatprep.subr.bf16.mxu1 %v12990_v10 }
 0x9d7   :  { %7638 = vmatpush1.bf16.msra.mxu0 %v12991_v39  ;;  %7670 = vmatpush1.bf16.msra.mxu1 %v12992_v54  ;;  %v5860_v54 = vrot.slane %v5843_v11, %v12728_v37 }
 0x9d8   :  { %7640 = vmatprep.subr.bf16.mxu0 %v12993_v20  ;;  %7672 = vmatprep.subr.bf16.mxu1 %v12994_v53 }
 0x9db   :  { %7642 = vmatpush1.bf16.msra.mxu0 %v12995_v47  ;;  %7674 = vmatpush1.bf16.msra.mxu1 %v12996_v27  ;;  %v7967_v29 = vpop.eup %7966 }
 0x9dc   :  { %7644 = vmatprep.subr.bf16.mxu0 %v12997_v45  ;;  %7676 = vmatprep.subr.bf16.mxu1 %v12998_v42  ;;  %v5191_v12 = vadd.f32 1.0, %v7967_v29  ;;  %v6068_v29 = vld [vmem:[%s12480_s8] ss:$0 sm:$0xff] }
 0x9de   :  { %v5192_v1 = vmul.f32 0.5, %v5191_v12 }
 0x9df   :  { %7646 = vmatpush1.bf16.msra.mxu0 %v12999_v50  ;;  %7678 = vmatpush1.bf16.msra.mxu1 %v13000_v46 }
 0x9e0   :  { %7648 = vmatprep.subr.bf16.mxu0 %v13001_v14  ;;  %7680 = vmatprep.subr.bf16.mxu1 %v13002_v4 }
 0x9e3   :  { %7650 = vmatpush1.bf16.msra.mxu0 %v12119_v60  ;;  %7682 = vmatpush1.bf16.msra.mxu1 %v13003_v43  ;;  %v7969_v60 = vpop.eup %7968 }
 0x9e4   :  { %7652 = vmatprep.subr.bf16.mxu0 %v12131_v31  ;;  %7684 = vmatprep.subr.bf16.mxu1 %v12133_v52  ;;  %v7691_v31 = vpack.c.bf16 %v5897_v57, %v5896_v59  ;;  %v5898_v52 = vld [vmem:[%s12479_s7 + $0x10] sm:$0xff] }
 0x9e7   :  { %7654 = vmatpush1.bf16.msra.mxu0 %v12155_v28  ;;  %7686 = vmatpush1.bf16.msra.mxu1 %v12157_v33  ;;  %v5197_v33 = vmul.f32 %v7969_v60, %v5192_v1  ;;  %v5901_v28 = vld [vmem:[%s12479_s7 + $0x28] sm:$0xff] }
 0x9e8   :  { %7656 = vmatprep.subr.bf16.mxu0 %v12164_v5  ;;  %7688 = vmatprep.subr.bf16.mxu1 %v12166_v30  ;;  %v7695_v5 = vpack.c.bf16 %v5899_v6, %v5898_v52  ;;  %v5900_v30 = vld [vmem:[%s12479_s7 + $0x20] sm:$0xff] }
 0x9eb   :  { %7658 = vmatpush1.bf16.msra.mxu0 %v12179_v3  ;;  %7690 = vmatpush1.bf16.msra.mxu1 %v12181_v40  ;;  %v7699_v3 = vpack.c.bf16 %v5901_v28, %v5900_v30  ;;  %v5902_v40 = vld [vmem:[%s12479_s7 + $0x30] sm:$0xff] }
 0x9ec   :  { %7692 = vmatprep.subr.bf16.mxu0 %v7691_v31  ;;  %v7703_v26 = vpack.c.bf16 %v5903_v21, %v5902_v40 }
 0x9ee   :  { %5766 = vmatmul.mubr.f32.vlgmr.msra.gmra.mrb[30].mxu0 %v5197_v33  ;;  %5837 = vmatmul.mubr.f32.vlgmr.msra.gmra.mrb[32].mxu1 %v5197_v33 }
 0x9ef   :  { %7694 = vmatpush3.bf16.msra.mxu0 %v7691_v31  ;;  %6127 = vmatprep.mubr.f32.mxu0 %v13004_v32 }
 0x9f0   :  { %7696 = vmatprep.subr.bf16.mxu0 %v7695_v5 }
 0x9f3   :  { %7698 = vmatpush3.bf16.msra.mxu0 %v7695_v5 }
 0x9f4   :  { %7700 = vmatprep.subr.bf16.mxu0 %v7699_v3 }
 0x9f7   :  { %7702 = vmatpush3.bf16.msra.mxu0 %v7699_v3 }
 0x9f8   :  { %7704 = vmatprep.subr.bf16.mxu0 %v7703_v26 }
 0x9fb   :  { %7706 = vmatpush3.bf16.msra.mxu0 %v7703_v26 }
 0x9fc   :  { %7708 = vmatprep.subr.bf16.mxu0 %v7707_v62 }
 0x9ff   :  { %7710 = vmatpush3.bf16.msra.mxu0 %v7707_v62 }
 0xa00   :  { %7712 = vmatprep.subr.bf16.mxu0 %v7711_v0 }
 0xa03   :  { %7714 = vmatpush3.bf16.msra.mxu0 %v7711_v0 }
 0xa04   :  { %7716 = vmatprep.subr.bf16.mxu0 %v7715_v56 }
 0xa07   :  { %7718 = vmatpush3.bf16.msra.mxu0 %v7715_v56 }
 0xa08   :  { %7720 = vmatprep.subr.bf16.mxu0 %v7719_v7 }
 0xa0b   :  { %7722 = vmatpush3.bf16.msra.mxu0 %v7719_v7 }
 0xa0e   :  { %6128 = vmatmul.mubr.f32.vlgmr.msra.gmra.mrb[32].mxu0 %v13005_v63 }
 0xa0f   :  { %6130 = vmatprep.mubr.f32.mxu0 %v13006_v15 }
 0xa12   :  { %6131 = vmatmul.mubr.f32.gmra.mrb[34].mxu0 %v13007_v13 }
 0xa13   :  { %6133 = vmatprep.mubr.f32.mxu0 %v13008_v19 }
 0xa16   :  { %6134 = vmatmul.mubr.f32.gmra.mrb[36].mxu0 %v12187_v61 }
 0xa17   :  { %6136 = vmatprep.mubr.f32.mxu0 %v5197_v33 }
 0xac1   :  { %v5767_v17 = vpop.f32.mrb[30].mxu0  ;;  %v5838_v48 = vpop.f32.mrb[32].mxu1 }
 0xac2   :  { %v5865_v49 = vadd.f32 %v5848_v38, %v5767_v17  ;;  %v5769_v8 = vpop.f32.mrb[31].mxu0  ;;  %v5840_v24 = vpop.f32.mrb[33].mxu1  ;;  %v5867_v61 = vadd.f32 %v5856_v44, %v5838_v48 }
 0xac3   :  { %v5866_v10 = vadd.f32 %v5852_v22, %v5769_v8  ;;  %v5868_v20 = vadd.f32 %v5860_v54, %v5840_v24 }
 0xac4   :  { %v5869_v18 = vmul.f32 0.5, %v5865_v49 }
 0xac5   :  { %v5873_v39 = vmul.f32 0.5, %v5866_v10  ;;  %v5878_v16 = vmul.f32 0.5, %v5868_v20 }
 0xac6   :  { %7970 = vtanh.f32 %v5869_v18 }
 0xac7   :  { %7972 = vtanh.f32 %v5873_v39 }
 0xac8   :  { %7974 = vtanh.f32 %v5867_v61 }
 0xac9   :  { %7976 = vtanh.f32 %v5878_v16 }
 0xad0   :  { %v7971_v53 = vpop.eup %7970 }
 0xad1   :  { %v7973_v2 = vpop.eup %7972  ;;  %v5871_v47 = vadd.f32 1.0, %v7971_v53 }
 0xad2   :  { %v5875_v27 = vadd.f32 1.0, %v7973_v2  ;;  %v7975_v23 = vpop.eup %7974 }
 0xad3   :  { %v5872_v45 = vmul.f32 0.5, %v5871_v47  ;;  %v7977_v37 = vpop.eup %7976 }
 0xad4   :  { %v5876_v42 = vmul.f32 0.5, %v5875_v27  ;;  %v5880_v4 = vadd.f32 1.0, %v7977_v37 }
 0xad5   :  { %v5883_v50 = vmul.f32 %v7975_v23, %v5872_v45 }
 0xad6   :  { %v5882_v46 = vmul.f32 %v5876_v42, %v12325_v35  ;;  %v5881_v12 = vmul.f32 0.5, %v5880_v4 }
 0xad8   :  { %v5884_v14 = vadd.f32 %v5883_v50, %v5882_v46 }
 0xada   :  { %7978 = vtanh.f32 %v5884_v14  ;;  %6070 = vst [vmem:[%s12477_s13 + $0x8] sm:$0xff] %v5884_v14 }
 0xae1   :  { %v6129_v43 = vpop.f32.mrb[32].mxu0 }
 0xae2   :  { %v5991_v59 = vadd.f32 %v6129_v43, %v6068_v29  ;;  %v5985_v57 = vpop.f32.mrb[33].mxu0 }
 0xae3   :  { %v5986_v31 = vadd.f32 %v6068_v29, %v5985_v57 }
 0xae4   :  { %v7979_v60 = vpop.eup %7978  ;;  %6025 = vst [vmem:[%s12481_s11 + $0x8] sm:$0xff] %v5991_v59 }
 0xae5   :  { %6024 = vst [vmem:[%s12481_s11] sm:$0xff] %v5986_v31  ;;  %v6132_v35 = vpop.f32.mrb[34].mxu0  ;;  %v5886_v52 = vmul.f32 %v7979_v60, %v5881_v12 }
 0xae6   :  { %v6001_v6 = vadd.f32 %v6132_v35, %v6068_v29  ;;  %v5995_v1 = vpop.f32.mrb[35].mxu0 }
 0xae7   :  { %v5996_v33 = vadd.f32 %v6068_v29, %v5995_v1  ;;  %6137 = vmatmul.mubr.f32.gmra.mrb[38].mxu0 %v5886_v52  ;;  %6069 = vst [vmem:[%s12478_s12 + $0x8] sm:$0xff] %v5886_v52 }
 0xae8   :  { %6027 = vst [vmem:[%s12481_s11 + $0x18] sm:$0xff] %v6001_v6 }
 0xae9   :  { %6026 = vst [vmem:[%s12481_s11 + $0x10] sm:$0xff] %v5996_v33  ;;  %v6135_v5 = vpop.f32.mrb[36].mxu0 }
 0xaea   :  { %v6011_v30 = vadd.f32 %v6135_v5, %v6068_v29  ;;  %v6005_v28 = vpop.f32.mrb[37].mxu0 }
 0xaeb   :  { %v6006_v32 = vadd.f32 %v6068_v29, %v6005_v28 }
 0xaec   :  { %6029 = vst [vmem:[%s12481_s11 + $0x28] sm:$0xff] %v6011_v30 }
 0xaed   :  { %6028 = vst [vmem:[%s12481_s11 + $0x20] sm:$0xff] %v6006_v32 }
 0xbba   :  { %v6138_v3 = vpop.f32.mrb[38].mxu0 }
 0xbbb   :  { %v6021_v40 = vadd.f32 %v6138_v3, %v6068_v29  ;;  %v6015_v21 = vpop.f32.mrb[39].mxu0 }
 0xbbc   :  { %v6016_v26 = vadd.f32 %v6068_v29, %v6015_v21 }
 0xbbd   :  { %6031 = vst [vmem:[%s12481_s11 + $0x38] sm:$0xff] %v6021_v40 }
 0xbbe   :  { %6030 = vst [vmem:[%s12481_s11 + $0x30] sm:$0xff] %v6016_v26 }

</bundles_post_ra>
